<compile_context>
chip_gen: v5e
topology: v5e:2x2
jax: 0.10.0
libtpu: 0.0.40
codegen_flags: <defaults>
</compile_context>

<pallas_src>
import jax
import jax.numpy as jnp
import numpy as np
from jax.experimental import pallas as pl
from jax.experimental.pallas import tpu as pltpu


def lstm_kernel(x_ref, wih_ref, whh_ref, b_ref, wfc_ref, bfc_ref, out_ref):
    TB, H = x_ref.shape
    B = out_ref.shape[0]
    T = TB // B
    L = wih_ref.shape[0]

    seq = x_ref[...]                                          # (T*B, H)
    h = jnp.zeros((B, H), jnp.float32)

    # L and T are small and static -> fully unrolled layer/time loops.
    for l in range(L):
        # One big input-projection matmul per layer (+ bias broadcast),
        # hoisted off the recurrent critical path.
        xproj = (jnp.dot(seq, wih_ref[l],
                         preferred_element_type=jnp.float32)
                 + b_ref[l])                                  # (T*B, 4H)
        w_hh = whh_ref[l]                                     # (H, 4H)

        h = jnp.zeros((B, H), jnp.float32)
        c = jnp.zeros((B, H), jnp.float32)
        outs = []
        for t in range(T):
            gates = xproj[t * B:(t + 1) * B, :] + jnp.dot(
                h, w_hh, preferred_element_type=jnp.float32)  # (B, 4H)

            # Whole-vreg nonlinearities (2 EUP pushes), then lane-slice.
            sig = jax.nn.sigmoid(gates)
            th = jnp.tanh(gates)
            i_g = sig[:, 0:H]
            f_g = sig[:, H:2 * H]
            g_g = th[:, 2 * H:3 * H]
            o_g = sig[:, 3 * H:4 * H]

            c = f_g * c + i_g * g_g
            h = o_g * jnp.tanh(c)
            outs.append(h)

        # Assemble the layer's output sequence once (no per-step VMEM stores).
        seq = jnp.concatenate(outs, axis=0)                   # (T*B, H)

    # fc head on the last layer's last hidden state.
    out_ref[...] = (jnp.dot(h, wfc_ref[...],
                            preferred_element_type=jnp.float32)
                    + bfc_ref[...])


def lstm_model_forward(x, params, hidden_size):
    """x: (batch, seq, input_size) f32 -> (batch, output_size) f32."""
    B, T, I = x.shape
    H = hidden_size
    wih, whh, b, wfc, bfc = params
    L = wih.shape[0]
    O = wfc.shape[-1]

    # glue: pad raw features to H, go to (seq, batch, H), flatten to (T*B, H)
    x_pad = jnp.zeros((T, B, H), jnp.float32)
    x_pad = x_pad.at[:, :, :I].set(jnp.transpose(x, (1, 0, 2)))
    x_flat = x_pad.reshape(T * B, H)

    out = pl.pallas_call(
        lstm_kernel,
        out_shape=jax.ShapeDtypeStruct((B, O), jnp.float32),
        in_specs=[
            pl.BlockSpec((T * B, H), lambda: (0, 0)),          # x (flat)
            pl.BlockSpec((L, H, 4 * H), lambda: (0, 0, 0)),    # W_ih stack
            pl.BlockSpec((L, H, 4 * H), lambda: (0, 0, 0)),    # W_hh stack
            pl.BlockSpec((L, 1, 4 * H), lambda: (0, 0, 0)),    # bias stack
            pl.BlockSpec((H, O), lambda: (0, 0)),              # fc W
            pl.BlockSpec((1, O), lambda: (0, 0)),              # fc b
        ],
        out_specs=pl.BlockSpec((B, O), lambda: (0, 0)),
    )(x_flat, wih, whh, b, wfc, bfc)
    return out


def init_params(key, input_size, hidden_size, num_layers, output_size):
    """Deterministic PyTorch-style init: U(-1/sqrt(H), 1/sqrt(H))."""
    H, L, I, O = hidden_size, num_layers, input_size, output_size
    bound = 1.0 / np.sqrt(H)
    keys = jax.random.split(key, 4 * L + 2)

    wih_list, whh_list, b_list = [], [], []
    for l in range(L):
        in_dim = I if l == 0 else H
        k_wi, k_wh, k_bi, k_bh = keys[4 * l:4 * l + 4]
        w_ih = jax.random.uniform(k_wi, (4 * H, in_dim), jnp.float32, -bound, bound)
        w_hh = jax.random.uniform(k_wh, (4 * H, H), jnp.float32, -bound, bound)
        b_ih = jax.random.uniform(k_bi, (4 * H,), jnp.float32, -bound, bound)
        b_hh = jax.random.uniform(k_bh, (4 * H,), jnp.float32, -bound, bound)
        # transpose to (in, 4H); zero-pad layer-0 input rows up to H
        w_ih_t = jnp.zeros((H, 4 * H), jnp.float32).at[:in_dim, :].set(w_ih.T)
        wih_list.append(w_ih_t)
        whh_list.append(w_hh.T)
        b_list.append((b_ih + b_hh).reshape(1, 4 * H))

    k_fw, k_fb = keys[4 * L:4 * L + 2]
    fc_bound = 1.0 / np.sqrt(H)
    w_fc = jax.random.uniform(k_fw, (O, H), jnp.float32, -fc_bound, fc_bound)
    b_fc = jax.random.uniform(k_fb, (O,), jnp.float32, -fc_bound, fc_bound)

    return (jnp.stack(wih_list), jnp.stack(whh_list), jnp.stack(b_list),
            w_fc.T, b_fc.reshape(1, O))


def reference_forward(x, params, hidden_size, input_size):
    """Plain-JAX reference (eval-mode LSTM + fc) for correctness check."""
    wih, whh, b, wfc, bfc = params
    B, T, I = x.shape
    H = hidden_size
    L = wih.shape[0]
    seq = jnp.zeros((T, B, H), jnp.float32).at[:, :, :I].set(
        jnp.transpose(x, (1, 0, 2)))
    for l in range(L):
        h = jnp.zeros((B, H), jnp.float32)
        c = jnp.zeros((B, H), jnp.float32)
        outs = []
        for t in range(T):
            gates = seq[t] @ wih[l] + h @ whh[l] + b[l]
            i_g = jax.nn.sigmoid(gates[:, 0:H])
            f_g = jax.nn.sigmoid(gates[:, H:2 * H])
            g_g = jnp.tanh(gates[:, 2 * H:3 * H])
            o_g = jax.nn.sigmoid(gates[:, 3 * H:4 * H])
            c = f_g * c + i_g * g_g
            h = o_g * jnp.tanh(c)
            outs.append(h)
        seq = jnp.stack(outs)
    return seq[-1] @ wfc + bfc


if __name__ == "__main__":
    # small shapes consistent with the module:
    # LSTM(input_size, hidden, 4 layers, batch_first) + fc(hidden -> 8 features)
    batch, seq_len, input_size = 2, 8, 5
    hidden_size, num_layers, output_size = 32, 4, 8

    key = jax.random.PRNGKey(0)
    k_x, k_p = jax.random.split(key)
    x = jax.random.normal(k_x, (batch, seq_len, input_size), jnp.float32)
    params = init_params(k_p, input_size, hidden_size, num_layers, output_size)

    out = lstm_model_forward(x, params, hidden_size)
    out = jax.block_until_ready(out)

    ref = reference_forward(x, params, hidden_size, input_size)
    assert out.shape == (batch, output_size)
    np.testing.assert_allclose(np.asarray(out), np.asarray(ref), atol=1e-3, rtol=1e-3)

    print("KERNEL_OK")
</pallas_src>

<mosaic_0001>
module attributes {stable_mosaic.version = 11 : i64} {
  func.func @lstm_kernel(%arg0: memref<16x32xf32, #tpu.memory_space<vmem>>, %arg1: memref<4x32x128xf32, #tpu.memory_space<vmem>>, %arg2: memref<4x32x128xf32, #tpu.memory_space<vmem>>, %arg3: memref<4x1x128xf32, #tpu.memory_space<vmem>>, %arg4: memref<32x8xf32, #tpu.memory_space<vmem>>, %arg5: memref<1x8xf32, #tpu.memory_space<vmem>>, %arg6: memref<2x8xf32, #tpu.memory_space<vmem>>) attributes {dimension_semantics = [], scalar_prefetch = 0 : i64, scratch_operands = 0 : i64, tpu.core_type = #tpu.core_type<tc>} {
    %c0 = arith.constant 0 : index
    %c0_0 = arith.constant 0 : index
    %0 = vector.load %arg0[%c0, %c0_0] : memref<16x32xf32, #tpu.memory_space<vmem>>, vector<16x32xf32>
    %c0_1 = arith.constant 0 : index
    %c0_2 = arith.constant 0 : index
    %c0_3 = arith.constant 0 : index
    %1 = vector.load %arg1[%c0_1, %c0_2, %c0_3] : memref<4x32x128xf32, #tpu.memory_space<vmem>>, vector<1x32x128xf32>
    %2 = vector.shape_cast %1 : vector<1x32x128xf32> to vector<32x128xf32>
    %cst = arith.constant dense<0.000000e+00> : vector<16x128xf32>
    %3 = tpu.matmul %0, %2, %cst {dimension_numbers = #tpu.dot_dimension_numbers<[1], [0], [0], [1], [0, 0, 1, 1], [], []>} : vector<16x32xf32>, vector<32x128xf32>, vector<16x128xf32> -> vector<16x128xf32>
    %c0_4 = arith.constant 0 : index
    %c0_5 = arith.constant 0 : index
    %c0_6 = arith.constant 0 : index
    %4 = vector.load %arg3[%c0_4, %c0_5, %c0_6] : memref<4x1x128xf32, #tpu.memory_space<vmem>>, vector<1x1x128xf32>
    %5 = vector.shape_cast %4 : vector<1x1x128xf32> to vector<1x128xf32>
    %6 = vector.broadcast %5 : vector<1x128xf32> to vector<16x128xf32>
    %7 = arith.addf %3, %6 : vector<16x128xf32>
    %c0_7 = arith.constant 0 : index
    %c0_8 = arith.constant 0 : index
    %c0_9 = arith.constant 0 : index
    %8 = vector.load %arg2[%c0_7, %c0_8, %c0_9] : memref<4x32x128xf32, #tpu.memory_space<vmem>>, vector<1x32x128xf32>
    %9 = vector.shape_cast %8 : vector<1x32x128xf32> to vector<32x128xf32>
    %cst_10 = arith.constant 0.000000e+00 : f32
    %10 = vector.broadcast %cst_10 : f32 to vector<2x32xf32>
    %cst_11 = arith.constant 0.000000e+00 : f32
    %11 = vector.broadcast %cst_11 : f32 to vector<2x32xf32>
    %12 = vector.extract_strided_slice %7 {offsets = [0, 0], sizes = [2, 128], strides = [1, 1]} : vector<16x128xf32> to vector<2x128xf32>
    %cst_12 = arith.constant dense<0.000000e+00> : vector<2x128xf32>
    %13 = tpu.matmul %10, %9, %cst_12 {dimension_numbers = #tpu.dot_dimension_numbers<[1], [0], [0], [1], [0, 0, 1, 1], [], []>} : vector<2x32xf32>, vector<32x128xf32>, vector<2x128xf32> -> vector<2x128xf32>
    %14 = arith.addf %12, %13 : vector<2x128xf32>
    %15 = arith.negf %14 : vector<2x128xf32>
    %16 = math.exp %15 : vector<2x128xf32>
    %cst_13 = arith.constant 1.000000e+00 : f32
    %17 = vector.broadcast %cst_13 : f32 to vector<2x128xf32>
    %18 = arith.addf %17, %16 : vector<2x128xf32>
    %19 = arith.divf %17, %18 : vector<2x128xf32>
    %20 = math.tanh %14 : vector<2x128xf32>
    %21 = vector.extract_strided_slice %19 {offsets = [0, 0], sizes = [2, 32], strides = [1, 1]} : vector<2x128xf32> to vector<2x32xf32>
    %22 = vector.extract_strided_slice %19 {offsets = [0, 32], sizes = [2, 32], strides = [1, 1]} : vector<2x128xf32> to vector<2x32xf32>
    %23 = vector.extract_strided_slice %20 {offsets = [0, 64], sizes = [2, 32], strides = [1, 1]} : vector<2x128xf32> to vector<2x32xf32>
    %24 = vector.extract_strided_slice %19 {offsets = [0, 96], sizes = [2, 32], strides = [1, 1]} : vector<2x128xf32> to vector<2x32xf32>
    %25 = arith.mulf %22, %11 : vector<2x32xf32>
    %26 = arith.mulf %21, %23 : vector<2x32xf32>
    %27 = arith.addf %25, %26 : vector<2x32xf32>
    %28 = math.tanh %27 : vector<2x32xf32>
    %29 = arith.mulf %24, %28 : vector<2x32xf32>
    %30 = vector.extract_strided_slice %7 {offsets = [2, 0], sizes = [2, 128], strides = [1, 1]} : vector<16x128xf32> to vector<2x128xf32>
    %cst_14 = arith.constant dense<0.000000e+00> : vector<2x128xf32>
    %31 = tpu.matmul %29, %9, %cst_14 {dimension_numbers = #tpu.dot_dimension_numbers<[1], [0], [0], [1], [0, 0, 1, 1], [], []>} : vector<2x32xf32>, vector<32x128xf32>, vector<2x128xf32> -> vector<2x128xf32>
    %32 = arith.addf %30, %31 : vector<2x128xf32>
    %33 = arith.negf %32 : vector<2x128xf32>
    %34 = math.exp %33 : vector<2x128xf32>
    %cst_15 = arith.constant 1.000000e+00 : f32
    %35 = vector.broadcast %cst_15 : f32 to vector<2x128xf32>
    %36 = arith.addf %35, %34 : vector<2x128xf32>
    %37 = arith.divf %35, %36 : vector<2x128xf32>
    %38 = math.tanh %32 : vector<2x128xf32>
    %39 = vector.extract_strided_slice %37 {offsets = [0, 0], sizes = [2, 32], strides = [1, 1]} : vector<2x128xf32> to vector<2x32xf32>
    %40 = vector.extract_strided_slice %37 {offsets = [0, 32], sizes = [2, 32], strides = [1, 1]} : vector<2x128xf32> to vector<2x32xf32>
    %41 = vector.extract_strided_slice %38 {offsets = [0, 64], sizes = [2, 32], strides = [1, 1]} : vector<2x128xf32> to vector<2x32xf32>
    %42 = vector.extract_strided_slice %37 {offsets = [0, 96], sizes = [2, 32], strides = [1, 1]} : vector<2x128xf32> to vector<2x32xf32>
    %43 = arith.mulf %40, %27 : vector<2x32xf32>
    %44 = arith.mulf %39, %41 : vector<2x32xf32>
    %45 = arith.addf %43, %44 : vector<2x32xf32>
    %46 = math.tanh %45 : vector<2x32xf32>
    %47 = arith.mulf %42, %46 : vector<2x32xf32>
    %48 = vector.extract_strided_slice %7 {offsets = [4, 0], sizes = [2, 128], strides = [1, 1]} : vector<16x128xf32> to vector<2x128xf32>
    %cst_16 = arith.constant dense<0.000000e+00> : vector<2x128xf32>
    %49 = tpu.matmul %47, %9, %cst_16 {dimension_numbers = #tpu.dot_dimension_numbers<[1], [0], [0], [1], [0, 0, 1, 1], [], []>} : vector<2x32xf32>, vector<32x128xf32>, vector<2x128xf32> -> vector<2x128xf32>
    %50 = arith.addf %48, %49 : vector<2x128xf32>
    %51 = arith.negf %50 : vector<2x128xf32>
    %52 = math.exp %51 : vector<2x128xf32>
    %cst_17 = arith.constant 1.000000e+00 : f32
    %53 = vector.broadcast %cst_17 : f32 to vector<2x128xf32>
    %54 = arith.addf %53, %52 : vector<2x128xf32>
    %55 = arith.divf %53, %54 : vector<2x128xf32>
    %56 = math.tanh %50 : vector<2x128xf32>
    %57 = vector.extract_strided_slice %55 {offsets = [0, 0], sizes = [2, 32], strides = [1, 1]} : vector<2x128xf32> to vector<2x32xf32>
    %58 = vector.extract_strided_slice %55 {offsets = [0, 32], sizes = [2, 32], strides = [1, 1]} : vector<2x128xf32> to vector<2x32xf32>
    %59 = vector.extract_strided_slice %56 {offsets = [0, 64], sizes = [2, 32], strides = [1, 1]} : vector<2x128xf32> to vector<2x32xf32>
    %60 = vector.extract_strided_slice %55 {offsets = [0, 96], sizes = [2, 32], strides = [1, 1]} : vector<2x128xf32> to vector<2x32xf32>
    %61 = arith.mulf %58, %45 : vector<2x32xf32>
    %62 = arith.mulf %57, %59 : vector<2x32xf32>
    %63 = arith.addf %61, %62 : vector<2x32xf32>
    %64 = math.tanh %63 : vector<2x32xf32>
    %65 = arith.mulf %60, %64 : vector<2x32xf32>
    %66 = vector.extract_strided_slice %7 {offsets = [6, 0], sizes = [2, 128], strides = [1, 1]} : vector<16x128xf32> to vector<2x128xf32>
    %cst_18 = arith.constant dense<0.000000e+00> : vector<2x128xf32>
    %67 = tpu.matmul %65, %9, %cst_18 {dimension_numbers = #tpu.dot_dimension_numbers<[1], [0], [0], [1], [0, 0, 1, 1], [], []>} : vector<2x32xf32>, vector<32x128xf32>, vector<2x128xf32> -> vector<2x128xf32>
    %68 = arith.addf %66, %67 : vector<2x128xf32>
    %69 = arith.negf %68 : vector<2x128xf32>
    %70 = math.exp %69 : vector<2x128xf32>
    %cst_19 = arith.constant 1.000000e+00 : f32
    %71 = vector.broadcast %cst_19 : f32 to vector<2x128xf32>
    %72 = arith.addf %71, %70 : vector<2x128xf32>
    %73 = arith.divf %71, %72 : vector<2x128xf32>
    %74 = math.tanh %68 : vector<2x128xf32>
    %75 = vector.extract_strided_slice %73 {offsets = [0, 0], sizes = [2, 32], strides = [1, 1]} : vector<2x128xf32> to vector<2x32xf32>
    %76 = vector.extract_strided_slice %73 {offsets = [0, 32], sizes = [2, 32], strides = [1, 1]} : vector<2x128xf32> to vector<2x32xf32>
    %77 = vector.extract_strided_slice %74 {offsets = [0, 64], sizes = [2, 32], strides = [1, 1]} : vector<2x128xf32> to vector<2x32xf32>
    %78 = vector.extract_strided_slice %73 {offsets = [0, 96], sizes = [2, 32], strides = [1, 1]} : vector<2x128xf32> to vector<2x32xf32>
    %79 = arith.mulf %76, %63 : vector<2x32xf32>
    %80 = arith.mulf %75, %77 : vector<2x32xf32>
    %81 = arith.addf %79, %80 : vector<2x32xf32>
    %82 = math.tanh %81 : vector<2x32xf32>
    %83 = arith.mulf %78, %82 : vector<2x32xf32>
    %84 = vector.extract_strided_slice %7 {offsets = [8, 0], sizes = [2, 128], strides = [1, 1]} : vector<16x128xf32> to vector<2x128xf32>
    %cst_20 = arith.constant dense<0.000000e+00> : vector<2x128xf32>
    %85 = tpu.matmul %83, %9, %cst_20 {dimension_numbers = #tpu.dot_dimension_numbers<[1], [0], [0], [1], [0, 0, 1, 1], [], []>} : vector<2x32xf32>, vector<32x128xf32>, vector<2x128xf32> -> vector<2x128xf32>
    %86 = arith.addf %84, %85 : vector<2x128xf32>
    %87 = arith.negf %86 : vector<2x128xf32>
    %88 = math.exp %87 : vector<2x128xf32>
    %cst_21 = arith.constant 1.000000e+00 : f32
    %89 = vector.broadcast %cst_21 : f32 to vector<2x128xf32>
    %90 = arith.addf %89, %88 : vector<2x128xf32>
    %91 = arith.divf %89, %90 : vector<2x128xf32>
    %92 = math.tanh %86 : vector<2x128xf32>
    %93 = vector.extract_strided_slice %91 {offsets = [0, 0], sizes = [2, 32], strides = [1, 1]} : vector<2x128xf32> to vector<2x32xf32>
    %94 = vector.extract_strided_slice %91 {offsets = [0, 32], sizes = [2, 32], strides = [1, 1]} : vector<2x128xf32> to vector<2x32xf32>
    %95 = vector.extract_strided_slice %92 {offsets = [0, 64], sizes = [2, 32], strides = [1, 1]} : vector<2x128xf32> to vector<2x32xf32>
    %96 = vector.extract_strided_slice %91 {offsets = [0, 96], sizes = [2, 32], strides = [1, 1]} : vector<2x128xf32> to vector<2x32xf32>
    %97 = arith.mulf %94, %81 : vector<2x32xf32>
    %98 = arith.mulf %93, %95 : vector<2x32xf32>
    %99 = arith.addf %97, %98 : vector<2x32xf32>
    %100 = math.tanh %99 : vector<2x32xf32>
    %101 = arith.mulf %96, %100 : vector<2x32xf32>
    %102 = vector.extract_strided_slice %7 {offsets = [10, 0], sizes = [2, 128], strides = [1, 1]} : vector<16x128xf32> to vector<2x128xf32>
    %cst_22 = arith.constant dense<0.000000e+00> : vector<2x128xf32>
    %103 = tpu.matmul %101, %9, %cst_22 {dimension_numbers = #tpu.dot_dimension_numbers<[1], [0], [0], [1], [0, 0, 1, 1], [], []>} : vector<2x32xf32>, vector<32x128xf32>, vector<2x128xf32> -> vector<2x128xf32>
    %104 = arith.addf %102, %103 : vector<2x128xf32>
    %105 = arith.negf %104 : vector<2x128xf32>
    %106 = math.exp %105 : vector<2x128xf32>
    %cst_23 = arith.constant 1.000000e+00 : f32
    %107 = vector.broadcast %cst_23 : f32 to vector<2x128xf32>
    %108 = arith.addf %107, %106 : vector<2x128xf32>
    %109 = arith.divf %107, %108 : vector<2x128xf32>
    %110 = math.tanh %104 : vector<2x128xf32>
    %111 = vector.extract_strided_slice %109 {offsets = [0, 0], sizes = [2, 32], strides = [1, 1]} : vector<2x128xf32> to vector<2x32xf32>
    %112 = vector.extract_strided_slice %109 {offsets = [0, 32], sizes = [2, 32], strides = [1, 1]} : vector<2x128xf32> to vector<2x32xf32>
    %113 = vector.extract_strided_slice %110 {offsets = [0, 64], sizes = [2, 32], strides = [1, 1]} : vector<2x128xf32> to vector<2x32xf32>
    %114 = vector.extract_strided_slice %109 {offsets = [0, 96], sizes = [2, 32], strides = [1, 1]} : vector<2x128xf32> to vector<2x32xf32>
    %115 = arith.mulf %112, %99 : vector<2x32xf32>
    %116 = arith.mulf %111, %113 : vector<2x32xf32>
    %117 = arith.addf %115, %116 : vector<2x32xf32>
    %118 = math.tanh %117 : vector<2x32xf32>
    %119 = arith.mulf %114, %118 : vector<2x32xf32>
    %120 = vector.extract_strided_slice %7 {offsets = [12, 0], sizes = [2, 128], strides = [1, 1]} : vector<16x128xf32> to vector<2x128xf32>
    %cst_24 = arith.constant dense<0.000000e+00> : vector<2x128xf32>
    %121 = tpu.matmul %119, %9, %cst_24 {dimension_numbers = #tpu.dot_dimension_numbers<[1], [0], [0], [1], [0, 0, 1, 1], [], []>} : vector<2x32xf32>, vector<32x128xf32>, vector<2x128xf32> -> vector<2x128xf32>
    %122 = arith.addf %120, %121 : vector<2x128xf32>
    %123 = arith.negf %122 : vector<2x128xf32>
    %124 = math.exp %123 : vector<2x128xf32>
    %cst_25 = arith.constant 1.000000e+00 : f32
    %125 = vector.broadcast %cst_25 : f32 to vector<2x128xf32>
    %126 = arith.addf %125, %124 : vector<2x128xf32>
    %127 = arith.divf %125, %126 : vector<2x128xf32>
    %128 = math.tanh %122 : vector<2x128xf32>
    %129 = vector.extract_strided_slice %127 {offsets = [0, 0], sizes = [2, 32], strides = [1, 1]} : vector<2x128xf32> to vector<2x32xf32>
    %130 = vector.extract_strided_slice %127 {offsets = [0, 32], sizes = [2, 32], strides = [1, 1]} : vector<2x128xf32> to vector<2x32xf32>
    %131 = vector.extract_strided_slice %128 {offsets = [0, 64], sizes = [2, 32], strides = [1, 1]} : vector<2x128xf32> to vector<2x32xf32>
    %132 = vector.extract_strided_slice %127 {offsets = [0, 96], sizes = [2, 32], strides = [1, 1]} : vector<2x128xf32> to vector<2x32xf32>
    %133 = arith.mulf %130, %117 : vector<2x32xf32>
    %134 = arith.mulf %129, %131 : vector<2x32xf32>
    %135 = arith.addf %133, %134 : vector<2x32xf32>
    %136 = math.tanh %135 : vector<2x32xf32>
    %137 = arith.mulf %132, %136 : vector<2x32xf32>
    %138 = vector.extract_strided_slice %7 {offsets = [14, 0], sizes = [2, 128], strides = [1, 1]} : vector<16x128xf32> to vector<2x128xf32>
    %cst_26 = arith.constant dense<0.000000e+00> : vector<2x128xf32>
    %139 = tpu.matmul %137, %9, %cst_26 {dimension_numbers = #tpu.dot_dimension_numbers<[1], [0], [0], [1], [0, 0, 1, 1], [], []>} : vector<2x32xf32>, vector<32x128xf32>, vector<2x128xf32> -> vector<2x128xf32>
    %140 = arith.addf %138, %139 : vector<2x128xf32>
    %141 = arith.negf %140 : vector<2x128xf32>
    %142 = math.exp %141 : vector<2x128xf32>
    %cst_27 = arith.constant 1.000000e+00 : f32
    %143 = vector.broadcast %cst_27 : f32 to vector<2x128xf32>
    %144 = arith.addf %143, %142 : vector<2x128xf32>
    %145 = arith.divf %143, %144 : vector<2x128xf32>
    %146 = math.tanh %140 : vector<2x128xf32>
    %147 = vector.extract_strided_slice %145 {offsets = [0, 0], sizes = [2, 32], strides = [1, 1]} : vector<2x128xf32> to vector<2x32xf32>
    %148 = vector.extract_strided_slice %145 {offsets = [0, 32], sizes = [2, 32], strides = [1, 1]} : vector<2x128xf32> to vector<2x32xf32>
    %149 = vector.extract_strided_slice %146 {offsets = [0, 64], sizes = [2, 32], strides = [1, 1]} : vector<2x128xf32> to vector<2x32xf32>
    %150 = vector.extract_strided_slice %145 {offsets = [0, 96], sizes = [2, 32], strides = [1, 1]} : vector<2x128xf32> to vector<2x32xf32>
    %151 = arith.mulf %148, %135 : vector<2x32xf32>
    %152 = arith.mulf %147, %149 : vector<2x32xf32>
    %153 = arith.addf %151, %152 : vector<2x32xf32>
    %154 = math.tanh %153 : vector<2x32xf32>
    %155 = arith.mulf %150, %154 : vector<2x32xf32>
    %156 = tpu.concatenate %29, %47, %65, %83, %101, %119, %137, %155 in 0 : vector<2x32xf32>, vector<2x32xf32>, vector<2x32xf32>, vector<2x32xf32>, vector<2x32xf32>, vector<2x32xf32>, vector<2x32xf32>, vector<2x32xf32> -> vector<16x32xf32>
    %c1 = arith.constant 1 : index
    %c0_28 = arith.constant 0 : index
    %c0_29 = arith.constant 0 : index
    %157 = vector.load %arg1[%c1, %c0_28, %c0_29] : memref<4x32x128xf32, #tpu.memory_space<vmem>>, vector<1x32x128xf32>
    %158 = vector.shape_cast %157 : vector<1x32x128xf32> to vector<32x128xf32>
    %cst_30 = arith.constant dense<0.000000e+00> : vector<16x128xf32>
    %159 = tpu.matmul %156, %158, %cst_30 {dimension_numbers = #tpu.dot_dimension_numbers<[1], [0], [0], [1], [0, 0, 1, 1], [], []>} : vector<16x32xf32>, vector<32x128xf32>, vector<16x128xf32> -> vector<16x128xf32>
    %c1_31 = arith.constant 1 : index
    %c0_32 = arith.constant 0 : index
    %c0_33 = arith.constant 0 : index
    %160 = vector.load %arg3[%c1_31, %c0_32, %c0_33] : memref<4x1x128xf32, #tpu.memory_space<vmem>>, vector<1x1x128xf32>
    %161 = vector.shape_cast %160 : vector<1x1x128xf32> to vector<1x128xf32>
    %162 = vector.broadcast %161 : vector<1x128xf32> to vector<16x128xf32>
    %163 = arith.addf %159, %162 : vector<16x128xf32>
    %c1_34 = arith.constant 1 : index
    %c0_35 = arith.constant 0 : index
    %c0_36 = arith.constant 0 : index
    %164 = vector.load %arg2[%c1_34, %c0_35, %c0_36] : memref<4x32x128xf32, #tpu.memory_space<vmem>>, vector<1x32x128xf32>
    %165 = vector.shape_cast %164 : vector<1x32x128xf32> to vector<32x128xf32>
    %cst_37 = arith.constant 0.000000e+00 : f32
    %166 = vector.broadcast %cst_37 : f32 to vector<2x32xf32>
    %cst_38 = arith.constant 0.000000e+00 : f32
    %167 = vector.broadcast %cst_38 : f32 to vector<2x32xf32>
    %168 = vector.extract_strided_slice %163 {offsets = [0, 0], sizes = [2, 128], strides = [1, 1]} : vector<16x128xf32> to vector<2x128xf32>
    %cst_39 = arith.constant dense<0.000000e+00> : vector<2x128xf32>
    %169 = tpu.matmul %166, %165, %cst_39 {dimension_numbers = #tpu.dot_dimension_numbers<[1], [0], [0], [1], [0, 0, 1, 1], [], []>} : vector<2x32xf32>, vector<32x128xf32>, vector<2x128xf32> -> vector<2x128xf32>
    %170 = arith.addf %168, %169 : vector<2x128xf32>
    %171 = arith.negf %170 : vector<2x128xf32>
    %172 = math.exp %171 : vector<2x128xf32>
    %cst_40 = arith.constant 1.000000e+00 : f32
    %173 = vector.broadcast %cst_40 : f32 to vector<2x128xf32>
    %174 = arith.addf %173, %172 : vector<2x128xf32>
    %175 = arith.divf %173, %174 : vector<2x128xf32>
    %176 = math.tanh %170 : vector<2x128xf32>
    %177 = vector.extract_strided_slice %175 {offsets = [0, 0], sizes = [2, 32], strides = [1, 1]} : vector<2x128xf32> to vector<2x32xf32>
    %178 = vector.extract_strided_slice %175 {offsets = [0, 32], sizes = [2, 32], strides = [1, 1]} : vector<2x128xf32> to vector<2x32xf32>
    %179 = vector.extract_strided_slice %176 {offsets = [0, 64], sizes = [2, 32], strides = [1, 1]} : vector<2x128xf32> to vector<2x32xf32>
    %180 = vector.extract_strided_slice %175 {offsets = [0, 96], sizes = [2, 32], strides = [1, 1]} : vector<2x128xf32> to vector<2x32xf32>
    %181 = arith.mulf %178, %167 : vector<2x32xf32>
    %182 = arith.mulf %177, %179 : vector<2x32xf32>
    %183 = arith.addf %181, %182 : vector<2x32xf32>
    %184 = math.tanh %183 : vector<2x32xf32>
    %185 = arith.mulf %180, %184 : vector<2x32xf32>
    %186 = vector.extract_strided_slice %163 {offsets = [2, 0], sizes = [2, 128], strides = [1, 1]} : vector<16x128xf32> to vector<2x128xf32>
    %cst_41 = arith.constant dense<0.000000e+00> : vector<2x128xf32>
    %187 = tpu.matmul %185, %165, %cst_41 {dimension_numbers = #tpu.dot_dimension_numbers<[1], [0], [0], [1], [0, 0, 1, 1], [], []>} : vector<2x32xf32>, vector<32x128xf32>, vector<2x128xf32> -> vector<2x128xf32>
    %188 = arith.addf %186, %187 : vector<2x128xf32>
    %189 = arith.negf %188 : vector<2x128xf32>
    %190 = math.exp %189 : vector<2x128xf32>
    %cst_42 = arith.constant 1.000000e+00 : f32
    %191 = vector.broadcast %cst_42 : f32 to vector<2x128xf32>
    %192 = arith.addf %191, %190 : vector<2x128xf32>
    %193 = arith.divf %191, %192 : vector<2x128xf32>
    %194 = math.tanh %188 : vector<2x128xf32>
    %195 = vector.extract_strided_slice %193 {offsets = [0, 0], sizes = [2, 32], strides = [1, 1]} : vector<2x128xf32> to vector<2x32xf32>
    %196 = vector.extract_strided_slice %193 {offsets = [0, 32], sizes = [2, 32], strides = [1, 1]} : vector<2x128xf32> to vector<2x32xf32>
    %197 = vector.extract_strided_slice %194 {offsets = [0, 64], sizes = [2, 32], strides = [1, 1]} : vector<2x128xf32> to vector<2x32xf32>
    %198 = vector.extract_strided_slice %193 {offsets = [0, 96], sizes = [2, 32], strides = [1, 1]} : vector<2x128xf32> to vector<2x32xf32>
    %199 = arith.mulf %196, %183 : vector<2x32xf32>
    %200 = arith.mulf %195, %197 : vector<2x32xf32>
    %201 = arith.addf %199, %200 : vector<2x32xf32>
    %202 = math.tanh %201 : vector<2x32xf32>
    %203 = arith.mulf %198, %202 : vector<2x32xf32>
    %204 = vector.extract_strided_slice %163 {offsets = [4, 0], sizes = [2, 128], strides = [1, 1]} : vector<16x128xf32> to vector<2x128xf32>
    %cst_43 = arith.constant dense<0.000000e+00> : vector<2x128xf32>
    %205 = tpu.matmul %203, %165, %cst_43 {dimension_numbers = #tpu.dot_dimension_numbers<[1], [0], [0], [1], [0, 0, 1, 1], [], []>} : vector<2x32xf32>, vector<32x128xf32>, vector<2x128xf32> -> vector<2x128xf32>
    %206 = arith.addf %204, %205 : vector<2x128xf32>
    %207 = arith.negf %206 : vector<2x128xf32>
    %208 = math.exp %207 : vector<2x128xf32>
    %cst_44 = arith.constant 1.000000e+00 : f32
    %209 = vector.broadcast %cst_44 : f32 to vector<2x128xf32>
    %210 = arith.addf %209, %208 : vector<2x128xf32>
    %211 = arith.divf %209, %210 : vector<2x128xf32>
    %212 = math.tanh %206 : vector<2x128xf32>
    %213 = vector.extract_strided_slice %211 {offsets = [0, 0], sizes = [2, 32], strides = [1, 1]} : vector<2x128xf32> to vector<2x32xf32>
    %214 = vector.extract_strided_slice %211 {offsets = [0, 32], sizes = [2, 32], strides = [1, 1]} : vector<2x128xf32> to vector<2x32xf32>
    %215 = vector.extract_strided_slice %212 {offsets = [0, 64], sizes = [2, 32], strides = [1, 1]} : vector<2x128xf32> to vector<2x32xf32>
    %216 = vector.extract_strided_slice %211 {offsets = [0, 96], sizes = [2, 32], strides = [1, 1]} : vector<2x128xf32> to vector<2x32xf32>
    %217 = arith.mulf %214, %201 : vector<2x32xf32>
    %218 = arith.mulf %213, %215 : vector<2x32xf32>
    %219 = arith.addf %217, %218 : vector<2x32xf32>
    %220 = math.tanh %219 : vector<2x32xf32>
    %221 = arith.mulf %216, %220 : vector<2x32xf32>
    %222 = vector.extract_strided_slice %163 {offsets = [6, 0], sizes = [2, 128], strides = [1, 1]} : vector<16x128xf32> to vector<2x128xf32>
    %cst_45 = arith.constant dense<0.000000e+00> : vector<2x128xf32>
    %223 = tpu.matmul %221, %165, %cst_45 {dimension_numbers = #tpu.dot_dimension_numbers<[1], [0], [0], [1], [0, 0, 1, 1], [], []>} : vector<2x32xf32>, vector<32x128xf32>, vector<2x128xf32> -> vector<2x128xf32>
    %224 = arith.addf %222, %223 : vector<2x128xf32>
    %225 = arith.negf %224 : vector<2x128xf32>
    %226 = math.exp %225 : vector<2x128xf32>
    %cst_46 = arith.constant 1.000000e+00 : f32
    %227 = vector.broadcast %cst_46 : f32 to vector<2x128xf32>
    %228 = arith.addf %227, %226 : vector<2x128xf32>
    %229 = arith.divf %227, %228 : vector<2x128xf32>
    %230 = math.tanh %224 : vector<2x128xf32>
    %231 = vector.extract_strided_slice %229 {offsets = [0, 0], sizes = [2, 32], strides = [1, 1]} : vector<2x128xf32> to vector<2x32xf32>
    %232 = vector.extract_strided_slice %229 {offsets = [0, 32], sizes = [2, 32], strides = [1, 1]} : vector<2x128xf32> to vector<2x32xf32>
    %233 = vector.extract_strided_slice %230 {offsets = [0, 64], sizes = [2, 32], strides = [1, 1]} : vector<2x128xf32> to vector<2x32xf32>
    %234 = vector.extract_strided_slice %229 {offsets = [0, 96], sizes = [2, 32], strides = [1, 1]} : vector<2x128xf32> to vector<2x32xf32>
    %235 = arith.mulf %232, %219 : vector<2x32xf32>
    %236 = arith.mulf %231, %233 : vector<2x32xf32>
    %237 = arith.addf %235, %236 : vector<2x32xf32>
    %238 = math.tanh %237 : vector<2x32xf32>
    %239 = arith.mulf %234, %238 : vector<2x32xf32>
    %240 = vector.extract_strided_slice %163 {offsets = [8, 0], sizes = [2, 128], strides = [1, 1]} : vector<16x128xf32> to vector<2x128xf32>
    %cst_47 = arith.constant dense<0.000000e+00> : vector<2x128xf32>
    %241 = tpu.matmul %239, %165, %cst_47 {dimension_numbers = #tpu.dot_dimension_numbers<[1], [0], [0], [1], [0, 0, 1, 1], [], []>} : vector<2x32xf32>, vector<32x128xf32>, vector<2x128xf32> -> vector<2x128xf32>
    %242 = arith.addf %240, %241 : vector<2x128xf32>
    %243 = arith.negf %242 : vector<2x128xf32>
    %244 = math.exp %243 : vector<2x128xf32>
    %cst_48 = arith.constant 1.000000e+00 : f32
    %245 = vector.broadcast %cst_48 : f32 to vector<2x128xf32>
    %246 = arith.addf %245, %244 : vector<2x128xf32>
    %247 = arith.divf %245, %246 : vector<2x128xf32>
    %248 = math.tanh %242 : vector<2x128xf32>
    %249 = vector.extract_strided_slice %247 {offsets = [0, 0], sizes = [2, 32], strides = [1, 1]} : vector<2x128xf32> to vector<2x32xf32>
    %250 = vector.extract_strided_slice %247 {offsets = [0, 32], sizes = [2, 32], strides = [1, 1]} : vector<2x128xf32> to vector<2x32xf32>
    %251 = vector.extract_strided_slice %248 {offsets = [0, 64], sizes = [2, 32], strides = [1, 1]} : vector<2x128xf32> to vector<2x32xf32>
    %252 = vector.extract_strided_slice %247 {offsets = [0, 96], sizes = [2, 32], strides = [1, 1]} : vector<2x128xf32> to vector<2x32xf32>
    %253 = arith.mulf %250, %237 : vector<2x32xf32>
    %254 = arith.mulf %249, %251 : vector<2x32xf32>
    %255 = arith.addf %253, %254 : vector<2x32xf32>
    %256 = math.tanh %255 : vector<2x32xf32>
    %257 = arith.mulf %252, %256 : vector<2x32xf32>
    %258 = vector.extract_strided_slice %163 {offsets = [10, 0], sizes = [2, 128], strides = [1, 1]} : vector<16x128xf32> to vector<2x128xf32>
    %cst_49 = arith.constant dense<0.000000e+00> : vector<2x128xf32>
    %259 = tpu.matmul %257, %165, %cst_49 {dimension_numbers = #tpu.dot_dimension_numbers<[1], [0], [0], [1], [0, 0, 1, 1], [], []>} : vector<2x32xf32>, vector<32x128xf32>, vector<2x128xf32> -> vector<2x128xf32>
    %260 = arith.addf %258, %259 : vector<2x128xf32>
    %261 = arith.negf %260 : vector<2x128xf32>
    %262 = math.exp %261 : vector<2x128xf32>
    %cst_50 = arith.constant 1.000000e+00 : f32
    %263 = vector.broadcast %cst_50 : f32 to vector<2x128xf32>
    %264 = arith.addf %263, %262 : vector<2x128xf32>
    %265 = arith.divf %263, %264 : vector<2x128xf32>
    %266 = math.tanh %260 : vector<2x128xf32>
    %267 = vector.extract_strided_slice %265 {offsets = [0, 0], sizes = [2, 32], strides = [1, 1]} : vector<2x128xf32> to vector<2x32xf32>
    %268 = vector.extract_strided_slice %265 {offsets = [0, 32], sizes = [2, 32], strides = [1, 1]} : vector<2x128xf32> to vector<2x32xf32>
    %269 = vector.extract_strided_slice %266 {offsets = [0, 64], sizes = [2, 32], strides = [1, 1]} : vector<2x128xf32> to vector<2x32xf32>
    %270 = vector.extract_strided_slice %265 {offsets = [0, 96], sizes = [2, 32], strides = [1, 1]} : vector<2x128xf32> to vector<2x32xf32>
    %271 = arith.mulf %268, %255 : vector<2x32xf32>
    %272 = arith.mulf %267, %269 : vector<2x32xf32>
    %273 = arith.addf %271, %272 : vector<2x32xf32>
    %274 = math.tanh %273 : vector<2x32xf32>
    %275 = arith.mulf %270, %274 : vector<2x32xf32>
    %276 = vector.extract_strided_slice %163 {offsets = [12, 0], sizes = [2, 128], strides = [1, 1]} : vector<16x128xf32> to vector<2x128xf32>
    %cst_51 = arith.constant dense<0.000000e+00> : vector<2x128xf32>
    %277 = tpu.matmul %275, %165, %cst_51 {dimension_numbers = #tpu.dot_dimension_numbers<[1], [0], [0], [1], [0, 0, 1, 1], [], []>} : vector<2x32xf32>, vector<32x128xf32>, vector<2x128xf32> -> vector<2x128xf32>
    %278 = arith.addf %276, %277 : vector<2x128xf32>
    %279 = arith.negf %278 : vector<2x128xf32>
    %280 = math.exp %279 : vector<2x128xf32>
    %cst_52 = arith.constant 1.000000e+00 : f32
    %281 = vector.broadcast %cst_52 : f32 to vector<2x128xf32>
    %282 = arith.addf %281, %280 : vector<2x128xf32>
    %283 = arith.divf %281, %282 : vector<2x128xf32>
    %284 = math.tanh %278 : vector<2x128xf32>
    %285 = vector.extract_strided_slice %283 {offsets = [0, 0], sizes = [2, 32], strides = [1, 1]} : vector<2x128xf32> to vector<2x32xf32>
    %286 = vector.extract_strided_slice %283 {offsets = [0, 32], sizes = [2, 32], strides = [1, 1]} : vector<2x128xf32> to vector<2x32xf32>
    %287 = vector.extract_strided_slice %284 {offsets = [0, 64], sizes = [2, 32], strides = [1, 1]} : vector<2x128xf32> to vector<2x32xf32>
    %288 = vector.extract_strided_slice %283 {offsets = [0, 96], sizes = [2, 32], strides = [1, 1]} : vector<2x128xf32> to vector<2x32xf32>
    %289 = arith.mulf %286, %273 : vector<2x32xf32>
    %290 = arith.mulf %285, %287 : vector<2x32xf32>
    %291 = arith.addf %289, %290 : vector<2x32xf32>
    %292 = math.tanh %291 : vector<2x32xf32>
    %293 = arith.mulf %288, %292 : vector<2x32xf32>
    %294 = vector.extract_strided_slice %163 {offsets = [14, 0], sizes = [2, 128], strides = [1, 1]} : vector<16x128xf32> to vector<2x128xf32>
    %cst_53 = arith.constant dense<0.000000e+00> : vector<2x128xf32>
    %295 = tpu.matmul %293, %165, %cst_53 {dimension_numbers = #tpu.dot_dimension_numbers<[1], [0], [0], [1], [0, 0, 1, 1], [], []>} : vector<2x32xf32>, vector<32x128xf32>, vector<2x128xf32> -> vector<2x128xf32>
    %296 = arith.addf %294, %295 : vector<2x128xf32>
    %297 = arith.negf %296 : vector<2x128xf32>
    %298 = math.exp %297 : vector<2x128xf32>
    %cst_54 = arith.constant 1.000000e+00 : f32
    %299 = vector.broadcast %cst_54 : f32 to vector<2x128xf32>
    %300 = arith.addf %299, %298 : vector<2x128xf32>
    %301 = arith.divf %299, %300 : vector<2x128xf32>
    %302 = math.tanh %296 : vector<2x128xf32>
    %303 = vector.extract_strided_slice %301 {offsets = [0, 0], sizes = [2, 32], strides = [1, 1]} : vector<2x128xf32> to vector<2x32xf32>
    %304 = vector.extract_strided_slice %301 {offsets = [0, 32], sizes = [2, 32], strides = [1, 1]} : vector<2x128xf32> to vector<2x32xf32>
    %305 = vector.extract_strided_slice %302 {offsets = [0, 64], sizes = [2, 32], strides = [1, 1]} : vector<2x128xf32> to vector<2x32xf32>
    %306 = vector.extract_strided_slice %301 {offsets = [0, 96], sizes = [2, 32], strides = [1, 1]} : vector<2x128xf32> to vector<2x32xf32>
    %307 = arith.mulf %304, %291 : vector<2x32xf32>
    %308 = arith.mulf %303, %305 : vector<2x32xf32>
    %309 = arith.addf %307, %308 : vector<2x32xf32>
    %310 = math.tanh %309 : vector<2x32xf32>
    %311 = arith.mulf %306, %310 : vector<2x32xf32>
    %312 = tpu.concatenate %185, %203, %221, %239, %257, %275, %293, %311 in 0 : vector<2x32xf32>, vector<2x32xf32>, vector<2x32xf32>, vector<2x32xf32>, vector<2x32xf32>, vector<2x32xf32>, vector<2x32xf32>, vector<2x32xf32> -> vector<16x32xf32>
    %c2 = arith.constant 2 : index
    %c0_55 = arith.constant 0 : index
    %c0_56 = arith.constant 0 : index
    %313 = vector.load %arg1[%c2, %c0_55, %c0_56] : memref<4x32x128xf32, #tpu.memory_space<vmem>>, vector<1x32x128xf32>
    %314 = vector.shape_cast %313 : vector<1x32x128xf32> to vector<32x128xf32>
    %cst_57 = arith.constant dense<0.000000e+00> : vector<16x128xf32>
    %315 = tpu.matmul %312, %314, %cst_57 {dimension_numbers = #tpu.dot_dimension_numbers<[1], [0], [0], [1], [0, 0, 1, 1], [], []>} : vector<16x32xf32>, vector<32x128xf32>, vector<16x128xf32> -> vector<16x128xf32>
    %c2_58 = arith.constant 2 : index
    %c0_59 = arith.constant 0 : index
    %c0_60 = arith.constant 0 : index
    %316 = vector.load %arg3[%c2_58, %c0_59, %c0_60] : memref<4x1x128xf32, #tpu.memory_space<vmem>>, vector<1x1x128xf32>
    %317 = vector.shape_cast %316 : vector<1x1x128xf32> to vector<1x128xf32>
    %318 = vector.broadcast %317 : vector<1x128xf32> to vector<16x128xf32>
    %319 = arith.addf %315, %318 : vector<16x128xf32>
    %c2_61 = arith.constant 2 : index
    %c0_62 = arith.constant 0 : index
    %c0_63 = arith.constant 0 : index
    %320 = vector.load %arg2[%c2_61, %c0_62, %c0_63] : memref<4x32x128xf32, #tpu.memory_space<vmem>>, vector<1x32x128xf32>
    %321 = vector.shape_cast %320 : vector<1x32x128xf32> to vector<32x128xf32>
    %cst_64 = arith.constant 0.000000e+00 : f32
    %322 = vector.broadcast %cst_64 : f32 to vector<2x32xf32>
    %cst_65 = arith.constant 0.000000e+00 : f32
    %323 = vector.broadcast %cst_65 : f32 to vector<2x32xf32>
    %324 = vector.extract_strided_slice %319 {offsets = [0, 0], sizes = [2, 128], strides = [1, 1]} : vector<16x128xf32> to vector<2x128xf32>
    %cst_66 = arith.constant dense<0.000000e+00> : vector<2x128xf32>
    %325 = tpu.matmul %322, %321, %cst_66 {dimension_numbers = #tpu.dot_dimension_numbers<[1], [0], [0], [1], [0, 0, 1, 1], [], []>} : vector<2x32xf32>, vector<32x128xf32>, vector<2x128xf32> -> vector<2x128xf32>
    %326 = arith.addf %324, %325 : vector<2x128xf32>
    %327 = arith.negf %326 : vector<2x128xf32>
    %328 = math.exp %327 : vector<2x128xf32>
    %cst_67 = arith.constant 1.000000e+00 : f32
    %329 = vector.broadcast %cst_67 : f32 to vector<2x128xf32>
    %330 = arith.addf %329, %328 : vector<2x128xf32>
    %331 = arith.divf %329, %330 : vector<2x128xf32>
    %332 = math.tanh %326 : vector<2x128xf32>
    %333 = vector.extract_strided_slice %331 {offsets = [0, 0], sizes = [2, 32], strides = [1, 1]} : vector<2x128xf32> to vector<2x32xf32>
    %334 = vector.extract_strided_slice %331 {offsets = [0, 32], sizes = [2, 32], strides = [1, 1]} : vector<2x128xf32> to vector<2x32xf32>
    %335 = vector.extract_strided_slice %332 {offsets = [0, 64], sizes = [2, 32], strides = [1, 1]} : vector<2x128xf32> to vector<2x32xf32>
    %336 = vector.extract_strided_slice %331 {offsets = [0, 96], sizes = [2, 32], strides = [1, 1]} : vector<2x128xf32> to vector<2x32xf32>
    %337 = arith.mulf %334, %323 : vector<2x32xf32>
    %338 = arith.mulf %333, %335 : vector<2x32xf32>
    %339 = arith.addf %337, %338 : vector<2x32xf32>
    %340 = math.tanh %339 : vector<2x32xf32>
    %341 = arith.mulf %336, %340 : vector<2x32xf32>
    %342 = vector.extract_strided_slice %319 {offsets = [2, 0], sizes = [2, 128], strides = [1, 1]} : vector<16x128xf32> to vector<2x128xf32>
    %cst_68 = arith.constant dense<0.000000e+00> : vector<2x128xf32>
    %343 = tpu.matmul %341, %321, %cst_68 {dimension_numbers = #tpu.dot_dimension_numbers<[1], [0], [0], [1], [0, 0, 1, 1], [], []>} : vector<2x32xf32>, vector<32x128xf32>, vector<2x128xf32> -> vector<2x128xf32>
    %344 = arith.addf %342, %343 : vector<2x128xf32>
    %345 = arith.negf %344 : vector<2x128xf32>
    %346 = math.exp %345 : vector<2x128xf32>
    %cst_69 = arith.constant 1.000000e+00 : f32
    %347 = vector.broadcast %cst_69 : f32 to vector<2x128xf32>
    %348 = arith.addf %347, %346 : vector<2x128xf32>
    %349 = arith.divf %347, %348 : vector<2x128xf32>
    %350 = math.tanh %344 : vector<2x128xf32>
    %351 = vector.extract_strided_slice %349 {offsets = [0, 0], sizes = [2, 32], strides = [1, 1]} : vector<2x128xf32> to vector<2x32xf32>
    %352 = vector.extract_strided_slice %349 {offsets = [0, 32], sizes = [2, 32], strides = [1, 1]} : vector<2x128xf32> to vector<2x32xf32>
    %353 = vector.extract_strided_slice %350 {offsets = [0, 64], sizes = [2, 32], strides = [1, 1]} : vector<2x128xf32> to vector<2x32xf32>
    %354 = vector.extract_strided_slice %349 {offsets = [0, 96], sizes = [2, 32], strides = [1, 1]} : vector<2x128xf32> to vector<2x32xf32>
    %355 = arith.mulf %352, %339 : vector<2x32xf32>
    %356 = arith.mulf %351, %353 : vector<2x32xf32>
    %357 = arith.addf %355, %356 : vector<2x32xf32>
    %358 = math.tanh %357 : vector<2x32xf32>
    %359 = arith.mulf %354, %358 : vector<2x32xf32>
    %360 = vector.extract_strided_slice %319 {offsets = [4, 0], sizes = [2, 128], strides = [1, 1]} : vector<16x128xf32> to vector<2x128xf32>
    %cst_70 = arith.constant dense<0.000000e+00> : vector<2x128xf32>
    %361 = tpu.matmul %359, %321, %cst_70 {dimension_numbers = #tpu.dot_dimension_numbers<[1], [0], [0], [1], [0, 0, 1, 1], [], []>} : vector<2x32xf32>, vector<32x128xf32>, vector<2x128xf32> -> vector<2x128xf32>
    %362 = arith.addf %360, %361 : vector<2x128xf32>
    %363 = arith.negf %362 : vector<2x128xf32>
    %364 = math.exp %363 : vector<2x128xf32>
    %cst_71 = arith.constant 1.000000e+00 : f32
    %365 = vector.broadcast %cst_71 : f32 to vector<2x128xf32>
    %366 = arith.addf %365, %364 : vector<2x128xf32>
    %367 = arith.divf %365, %366 : vector<2x128xf32>
    %368 = math.tanh %362 : vector<2x128xf32>
    %369 = vector.extract_strided_slice %367 {offsets = [0, 0], sizes = [2, 32], strides = [1, 1]} : vector<2x128xf32> to vector<2x32xf32>
    %370 = vector.extract_strided_slice %367 {offsets = [0, 32], sizes = [2, 32], strides = [1, 1]} : vector<2x128xf32> to vector<2x32xf32>
    %371 = vector.extract_strided_slice %368 {offsets = [0, 64], sizes = [2, 32], strides = [1, 1]} : vector<2x128xf32> to vector<2x32xf32>
    %372 = vector.extract_strided_slice %367 {offsets = [0, 96], sizes = [2, 32], strides = [1, 1]} : vector<2x128xf32> to vector<2x32xf32>
    %373 = arith.mulf %370, %357 : vector<2x32xf32>
    %374 = arith.mulf %369, %371 : vector<2x32xf32>
    %375 = arith.addf %373, %374 : vector<2x32xf32>
    %376 = math.tanh %375 : vector<2x32xf32>
    %377 = arith.mulf %372, %376 : vector<2x32xf32>
    %378 = vector.extract_strided_slice %319 {offsets = [6, 0], sizes = [2, 128], strides = [1, 1]} : vector<16x128xf32> to vector<2x128xf32>
    %cst_72 = arith.constant dense<0.000000e+00> : vector<2x128xf32>
    %379 = tpu.matmul %377, %321, %cst_72 {dimension_numbers = #tpu.dot_dimension_numbers<[1], [0], [0], [1], [0, 0, 1, 1], [], []>} : vector<2x32xf32>, vector<32x128xf32>, vector<2x128xf32> -> vector<2x128xf32>
    %380 = arith.addf %378, %379 : vector<2x128xf32>
    %381 = arith.negf %380 : vector<2x128xf32>
    %382 = math.exp %381 : vector<2x128xf32>
    %cst_73 = arith.constant 1.000000e+00 : f32
    %383 = vector.broadcast %cst_73 : f32 to vector<2x128xf32>
    %384 = arith.addf %383, %382 : vector<2x128xf32>
    %385 = arith.divf %383, %384 : vector<2x128xf32>
    %386 = math.tanh %380 : vector<2x128xf32>
    %387 = vector.extract_strided_slice %385 {offsets = [0, 0], sizes = [2, 32], strides = [1, 1]} : vector<2x128xf32> to vector<2x32xf32>
    %388 = vector.extract_strided_slice %385 {offsets = [0, 32], sizes = [2, 32], strides = [1, 1]} : vector<2x128xf32> to vector<2x32xf32>
    %389 = vector.extract_strided_slice %386 {offsets = [0, 64], sizes = [2, 32], strides = [1, 1]} : vector<2x128xf32> to vector<2x32xf32>
    %390 = vector.extract_strided_slice %385 {offsets = [0, 96], sizes = [2, 32], strides = [1, 1]} : vector<2x128xf32> to vector<2x32xf32>
    %391 = arith.mulf %388, %375 : vector<2x32xf32>
    %392 = arith.mulf %387, %389 : vector<2x32xf32>
    %393 = arith.addf %391, %392 : vector<2x32xf32>
    %394 = math.tanh %393 : vector<2x32xf32>
    %395 = arith.mulf %390, %394 : vector<2x32xf32>
    %396 = vector.extract_strided_slice %319 {offsets = [8, 0], sizes = [2, 128], strides = [1, 1]} : vector<16x128xf32> to vector<2x128xf32>
    %cst_74 = arith.constant dense<0.000000e+00> : vector<2x128xf32>
    %397 = tpu.matmul %395, %321, %cst_74 {dimension_numbers = #tpu.dot_dimension_numbers<[1], [0], [0], [1], [0, 0, 1, 1], [], []>} : vector<2x32xf32>, vector<32x128xf32>, vector<2x128xf32> -> vector<2x128xf32>
    %398 = arith.addf %396, %397 : vector<2x128xf32>
    %399 = arith.negf %398 : vector<2x128xf32>
    %400 = math.exp %399 : vector<2x128xf32>
    %cst_75 = arith.constant 1.000000e+00 : f32
    %401 = vector.broadcast %cst_75 : f32 to vector<2x128xf32>
    %402 = arith.addf %401, %400 : vector<2x128xf32>
    %403 = arith.divf %401, %402 : vector<2x128xf32>
    %404 = math.tanh %398 : vector<2x128xf32>
    %405 = vector.extract_strided_slice %403 {offsets = [0, 0], sizes = [2, 32], strides = [1, 1]} : vector<2x128xf32> to vector<2x32xf32>
    %406 = vector.extract_strided_slice %403 {offsets = [0, 32], sizes = [2, 32], strides = [1, 1]} : vector<2x128xf32> to vector<2x32xf32>
    %407 = vector.extract_strided_slice %404 {offsets = [0, 64], sizes = [2, 32], strides = [1, 1]} : vector<2x128xf32> to vector<2x32xf32>
    %408 = vector.extract_strided_slice %403 {offsets = [0, 96], sizes = [2, 32], strides = [1, 1]} : vector<2x128xf32> to vector<2x32xf32>
    %409 = arith.mulf %406, %393 : vector<2x32xf32>
    %410 = arith.mulf %405, %407 : vector<2x32xf32>
    %411 = arith.addf %409, %410 : vector<2x32xf32>
    %412 = math.tanh %411 : vector<2x32xf32>
    %413 = arith.mulf %408, %412 : vector<2x32xf32>
    %414 = vector.extract_strided_slice %319 {offsets = [10, 0], sizes = [2, 128], strides = [1, 1]} : vector<16x128xf32> to vector<2x128xf32>
    %cst_76 = arith.constant dense<0.000000e+00> : vector<2x128xf32>
    %415 = tpu.matmul %413, %321, %cst_76 {dimension_numbers = #tpu.dot_dimension_numbers<[1], [0], [0], [1], [0, 0, 1, 1], [], []>} : vector<2x32xf32>, vector<32x128xf32>, vector<2x128xf32> -> vector<2x128xf32>
    %416 = arith.addf %414, %415 : vector<2x128xf32>
    %417 = arith.negf %416 : vector<2x128xf32>
    %418 = math.exp %417 : vector<2x128xf32>
    %cst_77 = arith.constant 1.000000e+00 : f32
    %419 = vector.broadcast %cst_77 : f32 to vector<2x128xf32>
    %420 = arith.addf %419, %418 : vector<2x128xf32>
    %421 = arith.divf %419, %420 : vector<2x128xf32>
    %422 = math.tanh %416 : vector<2x128xf32>
    %423 = vector.extract_strided_slice %421 {offsets = [0, 0], sizes = [2, 32], strides = [1, 1]} : vector<2x128xf32> to vector<2x32xf32>
    %424 = vector.extract_strided_slice %421 {offsets = [0, 32], sizes = [2, 32], strides = [1, 1]} : vector<2x128xf32> to vector<2x32xf32>
    %425 = vector.extract_strided_slice %422 {offsets = [0, 64], sizes = [2, 32], strides = [1, 1]} : vector<2x128xf32> to vector<2x32xf32>
    %426 = vector.extract_strided_slice %421 {offsets = [0, 96], sizes = [2, 32], strides = [1, 1]} : vector<2x128xf32> to vector<2x32xf32>
    %427 = arith.mulf %424, %411 : vector<2x32xf32>
    %428 = arith.mulf %423, %425 : vector<2x32xf32>
    %429 = arith.addf %427, %428 : vector<2x32xf32>
    %430 = math.tanh %429 : vector<2x32xf32>
    %431 = arith.mulf %426, %430 : vector<2x32xf32>
    %432 = vector.extract_strided_slice %319 {offsets = [12, 0], sizes = [2, 128], strides = [1, 1]} : vector<16x128xf32> to vector<2x128xf32>
    %cst_78 = arith.constant dense<0.000000e+00> : vector<2x128xf32>
    %433 = tpu.matmul %431, %321, %cst_78 {dimension_numbers = #tpu.dot_dimension_numbers<[1], [0], [0], [1], [0, 0, 1, 1], [], []>} : vector<2x32xf32>, vector<32x128xf32>, vector<2x128xf32> -> vector<2x128xf32>
    %434 = arith.addf %432, %433 : vector<2x128xf32>
    %435 = arith.negf %434 : vector<2x128xf32>
    %436 = math.exp %435 : vector<2x128xf32>
    %cst_79 = arith.constant 1.000000e+00 : f32
    %437 = vector.broadcast %cst_79 : f32 to vector<2x128xf32>
    %438 = arith.addf %437, %436 : vector<2x128xf32>
    %439 = arith.divf %437, %438 : vector<2x128xf32>
    %440 = math.tanh %434 : vector<2x128xf32>
    %441 = vector.extract_strided_slice %439 {offsets = [0, 0], sizes = [2, 32], strides = [1, 1]} : vector<2x128xf32> to vector<2x32xf32>
    %442 = vector.extract_strided_slice %439 {offsets = [0, 32], sizes = [2, 32], strides = [1, 1]} : vector<2x128xf32> to vector<2x32xf32>
    %443 = vector.extract_strided_slice %440 {offsets = [0, 64], sizes = [2, 32], strides = [1, 1]} : vector<2x128xf32> to vector<2x32xf32>
    %444 = vector.extract_strided_slice %439 {offsets = [0, 96], sizes = [2, 32], strides = [1, 1]} : vector<2x128xf32> to vector<2x32xf32>
    %445 = arith.mulf %442, %429 : vector<2x32xf32>
    %446 = arith.mulf %441, %443 : vector<2x32xf32>
    %447 = arith.addf %445, %446 : vector<2x32xf32>
    %448 = math.tanh %447 : vector<2x32xf32>
    %449 = arith.mulf %444, %448 : vector<2x32xf32>
    %450 = vector.extract_strided_slice %319 {offsets = [14, 0], sizes = [2, 128], strides = [1, 1]} : vector<16x128xf32> to vector<2x128xf32>
    %cst_80 = arith.constant dense<0.000000e+00> : vector<2x128xf32>
    %451 = tpu.matmul %449, %321, %cst_80 {dimension_numbers = #tpu.dot_dimension_numbers<[1], [0], [0], [1], [0, 0, 1, 1], [], []>} : vector<2x32xf32>, vector<32x128xf32>, vector<2x128xf32> -> vector<2x128xf32>
    %452 = arith.addf %450, %451 : vector<2x128xf32>
    %453 = arith.negf %452 : vector<2x128xf32>
    %454 = math.exp %453 : vector<2x128xf32>
    %cst_81 = arith.constant 1.000000e+00 : f32
    %455 = vector.broadcast %cst_81 : f32 to vector<2x128xf32>
    %456 = arith.addf %455, %454 : vector<2x128xf32>
    %457 = arith.divf %455, %456 : vector<2x128xf32>
    %458 = math.tanh %452 : vector<2x128xf32>
    %459 = vector.extract_strided_slice %457 {offsets = [0, 0], sizes = [2, 32], strides = [1, 1]} : vector<2x128xf32> to vector<2x32xf32>
    %460 = vector.extract_strided_slice %457 {offsets = [0, 32], sizes = [2, 32], strides = [1, 1]} : vector<2x128xf32> to vector<2x32xf32>
    %461 = vector.extract_strided_slice %458 {offsets = [0, 64], sizes = [2, 32], strides = [1, 1]} : vector<2x128xf32> to vector<2x32xf32>
    %462 = vector.extract_strided_slice %457 {offsets = [0, 96], sizes = [2, 32], strides = [1, 1]} : vector<2x128xf32> to vector<2x32xf32>
    %463 = arith.mulf %460, %447 : vector<2x32xf32>
    %464 = arith.mulf %459, %461 : vector<2x32xf32>
    %465 = arith.addf %463, %464 : vector<2x32xf32>
    %466 = math.tanh %465 : vector<2x32xf32>
    %467 = arith.mulf %462, %466 : vector<2x32xf32>
    %468 = tpu.concatenate %341, %359, %377, %395, %413, %431, %449, %467 in 0 : vector<2x32xf32>, vector<2x32xf32>, vector<2x32xf32>, vector<2x32xf32>, vector<2x32xf32>, vector<2x32xf32>, vector<2x32xf32>, vector<2x32xf32> -> vector<16x32xf32>
    %c3 = arith.constant 3 : index
    %c0_82 = arith.constant 0 : index
    %c0_83 = arith.constant 0 : index
    %469 = vector.load %arg1[%c3, %c0_82, %c0_83] : memref<4x32x128xf32, #tpu.memory_space<vmem>>, vector<1x32x128xf32>
    %470 = vector.shape_cast %469 : vector<1x32x128xf32> to vector<32x128xf32>
    %cst_84 = arith.constant dense<0.000000e+00> : vector<16x128xf32>
    %471 = tpu.matmul %468, %470, %cst_84 {dimension_numbers = #tpu.dot_dimension_numbers<[1], [0], [0], [1], [0, 0, 1, 1], [], []>} : vector<16x32xf32>, vector<32x128xf32>, vector<16x128xf32> -> vector<16x128xf32>
    %c3_85 = arith.constant 3 : index
    %c0_86 = arith.constant 0 : index
    %c0_87 = arith.constant 0 : index
    %472 = vector.load %arg3[%c3_85, %c0_86, %c0_87] : memref<4x1x128xf32, #tpu.memory_space<vmem>>, vector<1x1x128xf32>
    %473 = vector.shape_cast %472 : vector<1x1x128xf32> to vector<1x128xf32>
    %474 = vector.broadcast %473 : vector<1x128xf32> to vector<16x128xf32>
    %475 = arith.addf %471, %474 : vector<16x128xf32>
    %c3_88 = arith.constant 3 : index
    %c0_89 = arith.constant 0 : index
    %c0_90 = arith.constant 0 : index
    %476 = vector.load %arg2[%c3_88, %c0_89, %c0_90] : memref<4x32x128xf32, #tpu.memory_space<vmem>>, vector<1x32x128xf32>
    %477 = vector.shape_cast %476 : vector<1x32x128xf32> to vector<32x128xf32>
    %cst_91 = arith.constant 0.000000e+00 : f32
    %478 = vector.broadcast %cst_91 : f32 to vector<2x32xf32>
    %cst_92 = arith.constant 0.000000e+00 : f32
    %479 = vector.broadcast %cst_92 : f32 to vector<2x32xf32>
    %480 = vector.extract_strided_slice %475 {offsets = [0, 0], sizes = [2, 128], strides = [1, 1]} : vector<16x128xf32> to vector<2x128xf32>
    %cst_93 = arith.constant dense<0.000000e+00> : vector<2x128xf32>
    %481 = tpu.matmul %478, %477, %cst_93 {dimension_numbers = #tpu.dot_dimension_numbers<[1], [0], [0], [1], [0, 0, 1, 1], [], []>} : vector<2x32xf32>, vector<32x128xf32>, vector<2x128xf32> -> vector<2x128xf32>
    %482 = arith.addf %480, %481 : vector<2x128xf32>
    %483 = arith.negf %482 : vector<2x128xf32>
    %484 = math.exp %483 : vector<2x128xf32>
    %cst_94 = arith.constant 1.000000e+00 : f32
    %485 = vector.broadcast %cst_94 : f32 to vector<2x128xf32>
    %486 = arith.addf %485, %484 : vector<2x128xf32>
    %487 = arith.divf %485, %486 : vector<2x128xf32>
    %488 = math.tanh %482 : vector<2x128xf32>
    %489 = vector.extract_strided_slice %487 {offsets = [0, 0], sizes = [2, 32], strides = [1, 1]} : vector<2x128xf32> to vector<2x32xf32>
    %490 = vector.extract_strided_slice %487 {offsets = [0, 32], sizes = [2, 32], strides = [1, 1]} : vector<2x128xf32> to vector<2x32xf32>
    %491 = vector.extract_strided_slice %488 {offsets = [0, 64], sizes = [2, 32], strides = [1, 1]} : vector<2x128xf32> to vector<2x32xf32>
    %492 = vector.extract_strided_slice %487 {offsets = [0, 96], sizes = [2, 32], strides = [1, 1]} : vector<2x128xf32> to vector<2x32xf32>
    %493 = arith.mulf %490, %479 : vector<2x32xf32>
    %494 = arith.mulf %489, %491 : vector<2x32xf32>
    %495 = arith.addf %493, %494 : vector<2x32xf32>
    %496 = math.tanh %495 : vector<2x32xf32>
    %497 = arith.mulf %492, %496 : vector<2x32xf32>
    %498 = vector.extract_strided_slice %475 {offsets = [2, 0], sizes = [2, 128], strides = [1, 1]} : vector<16x128xf32> to vector<2x128xf32>
    %cst_95 = arith.constant dense<0.000000e+00> : vector<2x128xf32>
    %499 = tpu.matmul %497, %477, %cst_95 {dimension_numbers = #tpu.dot_dimension_numbers<[1], [0], [0], [1], [0, 0, 1, 1], [], []>} : vector<2x32xf32>, vector<32x128xf32>, vector<2x128xf32> -> vector<2x128xf32>
    %500 = arith.addf %498, %499 : vector<2x128xf32>
    %501 = arith.negf %500 : vector<2x128xf32>
    %502 = math.exp %501 : vector<2x128xf32>
    %cst_96 = arith.constant 1.000000e+00 : f32
    %503 = vector.broadcast %cst_96 : f32 to vector<2x128xf32>
    %504 = arith.addf %503, %502 : vector<2x128xf32>
    %505 = arith.divf %503, %504 : vector<2x128xf32>
    %506 = math.tanh %500 : vector<2x128xf32>
    %507 = vector.extract_strided_slice %505 {offsets = [0, 0], sizes = [2, 32], strides = [1, 1]} : vector<2x128xf32> to vector<2x32xf32>
    %508 = vector.extract_strided_slice %505 {offsets = [0, 32], sizes = [2, 32], strides = [1, 1]} : vector<2x128xf32> to vector<2x32xf32>
    %509 = vector.extract_strided_slice %506 {offsets = [0, 64], sizes = [2, 32], strides = [1, 1]} : vector<2x128xf32> to vector<2x32xf32>
    %510 = vector.extract_strided_slice %505 {offsets = [0, 96], sizes = [2, 32], strides = [1, 1]} : vector<2x128xf32> to vector<2x32xf32>
    %511 = arith.mulf %508, %495 : vector<2x32xf32>
    %512 = arith.mulf %507, %509 : vector<2x32xf32>
    %513 = arith.addf %511, %512 : vector<2x32xf32>
    %514 = math.tanh %513 : vector<2x32xf32>
    %515 = arith.mulf %510, %514 : vector<2x32xf32>
    %516 = vector.extract_strided_slice %475 {offsets = [4, 0], sizes = [2, 128], strides = [1, 1]} : vector<16x128xf32> to vector<2x128xf32>
    %cst_97 = arith.constant dense<0.000000e+00> : vector<2x128xf32>
    %517 = tpu.matmul %515, %477, %cst_97 {dimension_numbers = #tpu.dot_dimension_numbers<[1], [0], [0], [1], [0, 0, 1, 1], [], []>} : vector<2x32xf32>, vector<32x128xf32>, vector<2x128xf32> -> vector<2x128xf32>
    %518 = arith.addf %516, %517 : vector<2x128xf32>
    %519 = arith.negf %518 : vector<2x128xf32>
    %520 = math.exp %519 : vector<2x128xf32>
    %cst_98 = arith.constant 1.000000e+00 : f32
    %521 = vector.broadcast %cst_98 : f32 to vector<2x128xf32>
    %522 = arith.addf %521, %520 : vector<2x128xf32>
    %523 = arith.divf %521, %522 : vector<2x128xf32>
    %524 = math.tanh %518 : vector<2x128xf32>
    %525 = vector.extract_strided_slice %523 {offsets = [0, 0], sizes = [2, 32], strides = [1, 1]} : vector<2x128xf32> to vector<2x32xf32>
    %526 = vector.extract_strided_slice %523 {offsets = [0, 32], sizes = [2, 32], strides = [1, 1]} : vector<2x128xf32> to vector<2x32xf32>
    %527 = vector.extract_strided_slice %524 {offsets = [0, 64], sizes = [2, 32], strides = [1, 1]} : vector<2x128xf32> to vector<2x32xf32>
    %528 = vector.extract_strided_slice %523 {offsets = [0, 96], sizes = [2, 32], strides = [1, 1]} : vector<2x128xf32> to vector<2x32xf32>
    %529 = arith.mulf %526, %513 : vector<2x32xf32>
    %530 = arith.mulf %525, %527 : vector<2x32xf32>
    %531 = arith.addf %529, %530 : vector<2x32xf32>
    %532 = math.tanh %531 : vector<2x32xf32>
    %533 = arith.mulf %528, %532 : vector<2x32xf32>
    %534 = vector.extract_strided_slice %475 {offsets = [6, 0], sizes = [2, 128], strides = [1, 1]} : vector<16x128xf32> to vector<2x128xf32>
    %cst_99 = arith.constant dense<0.000000e+00> : vector<2x128xf32>
    %535 = tpu.matmul %533, %477, %cst_99 {dimension_numbers = #tpu.dot_dimension_numbers<[1], [0], [0], [1], [0, 0, 1, 1], [], []>} : vector<2x32xf32>, vector<32x128xf32>, vector<2x128xf32> -> vector<2x128xf32>
    %536 = arith.addf %534, %535 : vector<2x128xf32>
    %537 = arith.negf %536 : vector<2x128xf32>
    %538 = math.exp %537 : vector<2x128xf32>
    %cst_100 = arith.constant 1.000000e+00 : f32
    %539 = vector.broadcast %cst_100 : f32 to vector<2x128xf32>
    %540 = arith.addf %539, %538 : vector<2x128xf32>
    %541 = arith.divf %539, %540 : vector<2x128xf32>
    %542 = math.tanh %536 : vector<2x128xf32>
    %543 = vector.extract_strided_slice %541 {offsets = [0, 0], sizes = [2, 32], strides = [1, 1]} : vector<2x128xf32> to vector<2x32xf32>
    %544 = vector.extract_strided_slice %541 {offsets = [0, 32], sizes = [2, 32], strides = [1, 1]} : vector<2x128xf32> to vector<2x32xf32>
    %545 = vector.extract_strided_slice %542 {offsets = [0, 64], sizes = [2, 32], strides = [1, 1]} : vector<2x128xf32> to vector<2x32xf32>
    %546 = vector.extract_strided_slice %541 {offsets = [0, 96], sizes = [2, 32], strides = [1, 1]} : vector<2x128xf32> to vector<2x32xf32>
    %547 = arith.mulf %544, %531 : vector<2x32xf32>
    %548 = arith.mulf %543, %545 : vector<2x32xf32>
    %549 = arith.addf %547, %548 : vector<2x32xf32>
    %550 = math.tanh %549 : vector<2x32xf32>
    %551 = arith.mulf %546, %550 : vector<2x32xf32>
    %552 = vector.extract_strided_slice %475 {offsets = [8, 0], sizes = [2, 128], strides = [1, 1]} : vector<16x128xf32> to vector<2x128xf32>
    %cst_101 = arith.constant dense<0.000000e+00> : vector<2x128xf32>
    %553 = tpu.matmul %551, %477, %cst_101 {dimension_numbers = #tpu.dot_dimension_numbers<[1], [0], [0], [1], [0, 0, 1, 1], [], []>} : vector<2x32xf32>, vector<32x128xf32>, vector<2x128xf32> -> vector<2x128xf32>
    %554 = arith.addf %552, %553 : vector<2x128xf32>
    %555 = arith.negf %554 : vector<2x128xf32>
    %556 = math.exp %555 : vector<2x128xf32>
    %cst_102 = arith.constant 1.000000e+00 : f32
    %557 = vector.broadcast %cst_102 : f32 to vector<2x128xf32>
    %558 = arith.addf %557, %556 : vector<2x128xf32>
    %559 = arith.divf %557, %558 : vector<2x128xf32>
    %560 = math.tanh %554 : vector<2x128xf32>
    %561 = vector.extract_strided_slice %559 {offsets = [0, 0], sizes = [2, 32], strides = [1, 1]} : vector<2x128xf32> to vector<2x32xf32>
    %562 = vector.extract_strided_slice %559 {offsets = [0, 32], sizes = [2, 32], strides = [1, 1]} : vector<2x128xf32> to vector<2x32xf32>
    %563 = vector.extract_strided_slice %560 {offsets = [0, 64], sizes = [2, 32], strides = [1, 1]} : vector<2x128xf32> to vector<2x32xf32>
    %564 = vector.extract_strided_slice %559 {offsets = [0, 96], sizes = [2, 32], strides = [1, 1]} : vector<2x128xf32> to vector<2x32xf32>
    %565 = arith.mulf %562, %549 : vector<2x32xf32>
    %566 = arith.mulf %561, %563 : vector<2x32xf32>
    %567 = arith.addf %565, %566 : vector<2x32xf32>
    %568 = math.tanh %567 : vector<2x32xf32>
    %569 = arith.mulf %564, %568 : vector<2x32xf32>
    %570 = vector.extract_strided_slice %475 {offsets = [10, 0], sizes = [2, 128], strides = [1, 1]} : vector<16x128xf32> to vector<2x128xf32>
    %cst_103 = arith.constant dense<0.000000e+00> : vector<2x128xf32>
    %571 = tpu.matmul %569, %477, %cst_103 {dimension_numbers = #tpu.dot_dimension_numbers<[1], [0], [0], [1], [0, 0, 1, 1], [], []>} : vector<2x32xf32>, vector<32x128xf32>, vector<2x128xf32> -> vector<2x128xf32>
    %572 = arith.addf %570, %571 : vector<2x128xf32>
    %573 = arith.negf %572 : vector<2x128xf32>
    %574 = math.exp %573 : vector<2x128xf32>
    %cst_104 = arith.constant 1.000000e+00 : f32
    %575 = vector.broadcast %cst_104 : f32 to vector<2x128xf32>
    %576 = arith.addf %575, %574 : vector<2x128xf32>
    %577 = arith.divf %575, %576 : vector<2x128xf32>
    %578 = math.tanh %572 : vector<2x128xf32>
    %579 = vector.extract_strided_slice %577 {offsets = [0, 0], sizes = [2, 32], strides = [1, 1]} : vector<2x128xf32> to vector<2x32xf32>
    %580 = vector.extract_strided_slice %577 {offsets = [0, 32], sizes = [2, 32], strides = [1, 1]} : vector<2x128xf32> to vector<2x32xf32>
    %581 = vector.extract_strided_slice %578 {offsets = [0, 64], sizes = [2, 32], strides = [1, 1]} : vector<2x128xf32> to vector<2x32xf32>
    %582 = vector.extract_strided_slice %577 {offsets = [0, 96], sizes = [2, 32], strides = [1, 1]} : vector<2x128xf32> to vector<2x32xf32>
    %583 = arith.mulf %580, %567 : vector<2x32xf32>
    %584 = arith.mulf %579, %581 : vector<2x32xf32>
    %585 = arith.addf %583, %584 : vector<2x32xf32>
    %586 = math.tanh %585 : vector<2x32xf32>
    %587 = arith.mulf %582, %586 : vector<2x32xf32>
    %588 = vector.extract_strided_slice %475 {offsets = [12, 0], sizes = [2, 128], strides = [1, 1]} : vector<16x128xf32> to vector<2x128xf32>
    %cst_105 = arith.constant dense<0.000000e+00> : vector<2x128xf32>
    %589 = tpu.matmul %587, %477, %cst_105 {dimension_numbers = #tpu.dot_dimension_numbers<[1], [0], [0], [1], [0, 0, 1, 1], [], []>} : vector<2x32xf32>, vector<32x128xf32>, vector<2x128xf32> -> vector<2x128xf32>
    %590 = arith.addf %588, %589 : vector<2x128xf32>
    %591 = arith.negf %590 : vector<2x128xf32>
    %592 = math.exp %591 : vector<2x128xf32>
    %cst_106 = arith.constant 1.000000e+00 : f32
    %593 = vector.broadcast %cst_106 : f32 to vector<2x128xf32>
    %594 = arith.addf %593, %592 : vector<2x128xf32>
    %595 = arith.divf %593, %594 : vector<2x128xf32>
    %596 = math.tanh %590 : vector<2x128xf32>
    %597 = vector.extract_strided_slice %595 {offsets = [0, 0], sizes = [2, 32], strides = [1, 1]} : vector<2x128xf32> to vector<2x32xf32>
    %598 = vector.extract_strided_slice %595 {offsets = [0, 32], sizes = [2, 32], strides = [1, 1]} : vector<2x128xf32> to vector<2x32xf32>
    %599 = vector.extract_strided_slice %596 {offsets = [0, 64], sizes = [2, 32], strides = [1, 1]} : vector<2x128xf32> to vector<2x32xf32>
    %600 = vector.extract_strided_slice %595 {offsets = [0, 96], sizes = [2, 32], strides = [1, 1]} : vector<2x128xf32> to vector<2x32xf32>
    %601 = arith.mulf %598, %585 : vector<2x32xf32>
    %602 = arith.mulf %597, %599 : vector<2x32xf32>
    %603 = arith.addf %601, %602 : vector<2x32xf32>
    %604 = math.tanh %603 : vector<2x32xf32>
    %605 = arith.mulf %600, %604 : vector<2x32xf32>
    %606 = vector.extract_strided_slice %475 {offsets = [14, 0], sizes = [2, 128], strides = [1, 1]} : vector<16x128xf32> to vector<2x128xf32>
    %cst_107 = arith.constant dense<0.000000e+00> : vector<2x128xf32>
    %607 = tpu.matmul %605, %477, %cst_107 {dimension_numbers = #tpu.dot_dimension_numbers<[1], [0], [0], [1], [0, 0, 1, 1], [], []>} : vector<2x32xf32>, vector<32x128xf32>, vector<2x128xf32> -> vector<2x128xf32>
    %608 = arith.addf %606, %607 : vector<2x128xf32>
    %609 = arith.negf %608 : vector<2x128xf32>
    %610 = math.exp %609 : vector<2x128xf32>
    %cst_108 = arith.constant 1.000000e+00 : f32
    %611 = vector.broadcast %cst_108 : f32 to vector<2x128xf32>
    %612 = arith.addf %611, %610 : vector<2x128xf32>
    %613 = arith.divf %611, %612 : vector<2x128xf32>
    %614 = math.tanh %608 : vector<2x128xf32>
    %615 = vector.extract_strided_slice %613 {offsets = [0, 0], sizes = [2, 32], strides = [1, 1]} : vector<2x128xf32> to vector<2x32xf32>
    %616 = vector.extract_strided_slice %613 {offsets = [0, 32], sizes = [2, 32], strides = [1, 1]} : vector<2x128xf32> to vector<2x32xf32>
    %617 = vector.extract_strided_slice %614 {offsets = [0, 64], sizes = [2, 32], strides = [1, 1]} : vector<2x128xf32> to vector<2x32xf32>
    %618 = vector.extract_strided_slice %613 {offsets = [0, 96], sizes = [2, 32], strides = [1, 1]} : vector<2x128xf32> to vector<2x32xf32>
    %619 = arith.mulf %616, %603 : vector<2x32xf32>
    %620 = arith.mulf %615, %617 : vector<2x32xf32>
    %621 = arith.addf %619, %620 : vector<2x32xf32>
    %622 = math.tanh %621 : vector<2x32xf32>
    %623 = arith.mulf %618, %622 : vector<2x32xf32>
    %c0_109 = arith.constant 0 : index
    %c0_110 = arith.constant 0 : index
    %624 = vector.load %arg4[%c0_109, %c0_110] : memref<32x8xf32, #tpu.memory_space<vmem>>, vector<32x8xf32>
    %cst_111 = arith.constant dense<0.000000e+00> : vector<2x8xf32>
    %625 = tpu.matmul %623, %624, %cst_111 {dimension_numbers = #tpu.dot_dimension_numbers<[1], [0], [0], [1], [0, 0, 1, 1], [], []>} : vector<2x32xf32>, vector<32x8xf32>, vector<2x8xf32> -> vector<2x8xf32>
    %c0_112 = arith.constant 0 : index
    %c0_113 = arith.constant 0 : index
    %626 = vector.load %arg5[%c0_112, %c0_113] : memref<1x8xf32, #tpu.memory_space<vmem>>, vector<1x8xf32>
    %627 = vector.broadcast %626 : vector<1x8xf32> to vector<2x8xf32>
    %628 = arith.addf %625, %627 : vector<2x8xf32>
    %c0_114 = arith.constant 0 : index
    %c0_115 = arith.constant 0 : index
    %629 = vector.load %arg6[%c0_114, %c0_115] : memref<2x8xf32, #tpu.memory_space<vmem>>, vector<2x8xf32>
    tpu.vector_store %arg6[%c0_114, %c0_115], %628 {strides = array<i32>} : memref<2x8xf32, #tpu.memory_space<vmem>>, vector<2x8xf32>,
    return
  }
}

</mosaic_0001>

<bundles_post_ra>
// kernel: tpu_custom_call.1
= control target key start
LH: loop header
LB: loop body
LE: loop exit
PB: predicated region body
PF: predicated region fallthrough
CT: control target
= control target key end

     0   :  { %11 = vsyncpa [#allocation3], 0  ;;  %s3487_s0 = inlined_call_operand.vmem [shape: f32[16,32], index: 0, kind: input, shape index: {}]   ;;  %s3488_s1 = inlined_call_operand.hbm [shape: f32[4,32,128], index: 1, kind: input, shape index: {}]   ;;  %s3489_s2 = inlined_call_operand.hbm [shape: f32[4,32,128], index: 2, kind: input, shape index: {}]   ;;  %s3490_s3 = inlined_call_operand.vmem [shape: f32[4,1,128], index: 3, kind: input, shape index: {}]   ;;  %s3491_s4 = inlined_call_operand.vmem [shape: f32[32,8], index: 4, kind: input, shape index: {}]   ;;  %s3492_s5 = inlined_call_operand.vmem [shape: f32[1,8], index: 5, kind: input, shape index: {}]   ;;  %s3493_s6 = inlined_call_operand.hbm [shape: f32[2,8], index: 6, kind: output, shape index: {}]  }
   0x1   :  { %12 = vsyncpa [#allocation6], 0 }
   0x2   :  { %13 = vsyncpa [#allocation4], 0  ;;  %s20_s23 = sshll.u32 %s3488_s1, 4  ;;  %s2913_s24 = smov [#allocation2]   ;;  %s21_s23 = int_to_ptr.hbm [resolvable:$true] %s20_s23 }
   0x3   :  { %s22_s25 = sshll.u32 %s2913_s24, 4  ;;  %s33_s28 = sshll.u32 %s3489_s2, 4  ;;  %s23_s25 = int_to_ptr.vmem [resolvable:$true] %s22_s25  ;;  %s34_s28 = int_to_ptr.hbm [resolvable:$true] %s33_s28 }
   0x4   :  { %s2914_s29 = smov 128   ;;  %s2915_s30 = smov 8  }
   0x5   :  { %28 = dma.hbm_to_vmem [thread:$0]  %s21_s23, 2048, %s23_s25, [#allocation3], %s2914_s29, %s2914_s29, %s2915_s30  }
   0x6   :  { %s2916_s7 = smov [#allocation5]  }
   0x7   :  { %s35_s8 = sshll.u32 %s2916_s7, 4  ;;  %s36_s8 = int_to_ptr.vmem [resolvable:$true] %s35_s8 }
   0x8   :  { %41 = dma.hbm_to_vmem [thread:$0]  %s34_s28, 2048, %s36_s8, [#allocation6], %s2914_s29, %s2914_s29, %s2915_s30  }
   0x9   :  { %2907 = dma.done.wait [#allocation3], 2048  }
   0xa   :  { %2908 = vsyncadd [#allocation3], 4294965248 }
   0xb   :  { %2909 = dma.done.wait [#allocation6], 2048  }
   0xc   :  { %2910 = vsyncadd [#allocation6], 4294965248  ;;  %v61_v0 = vld [vmem:[#allocation2 + $0x18] sm:$0xff]  ;;  %v60_v1 = vld [vmem:[#allocation2 + $0x10] sm:$0xff]  ;;  %vm66_vm0 = vcmask 261120   ;;  %v2917_v9 = vmov 0.0  }
   0xd   :  { %v99_v2 = vld [vmem:[#allocation5 + $0x18] sm:$0xff]  ;;  %85 = vmatpush.msra.mxu0 %v61_v0  ;;  %v98_v3 = vld [vmem:[#allocation5 + $0x10] sm:$0xff]  ;;  %v59_v4 = vld [vmem:[#allocation2 + $0x8] sm:$0xff]  ;;  %s2918_s11 = smov 64   ;;  %s2919_s12 = smov 32   ;;  %vm646_vm13 = vcmask 1041408  }
   0xe   :  { %115 = vmatpush.msra.mxu1 %v99_v2  ;;  %v58_v5 = vld [vmem:[#allocation2] sm:$0xff]  ;;  %v97_v6 = vld [vmem:[#allocation5 + $0x8] sm:$0xff]  ;;  %178 = vmatpush.msra.mxu2 %v99_v2  ;;  %vm648_vm14 = vcmask 1043456   ;;  %s2920_s29 = smov [#allocation7]  }
   0xf   :  { %248 = vmatpush.msra.mxu3 %v99_v2  ;;  %86 = vmatpush.msra.mxu0 %v60_v1  ;;  %v96_v7 = vld [vmem:[#allocation5] sm:$0xff]  ;;  %s2481_s30 = sshll.u32 %s2920_s29, 4  ;;  %s2482_s30 = int_to_ptr.vmem [resolvable:$true] %s2481_s30 }
  0x10   :  { %116 = vmatpush.msra.mxu1 %v98_v3  ;;  %179 = vmatpush.msra.mxu2 %v98_v3  ;;  %v56_v8 = vld [vmem:[%s3487_s0] sm:$0xff] }
  0x11   :  { %249 = vmatpush.msra.mxu3 %v98_v3  ;;  %87 = vmatpush.msra.mxu0 %v59_v4  ;;  %v2970_v10 = vld [vmem:[%s3490_s3] ss:$0 sm:$0xff] }
  0x12   :  { %117 = vmatpush.msra.mxu1 %v97_v6  ;;  %180 = vmatpush.msra.mxu2 %v97_v6 }
  0x13   :  { %250 = vmatpush.msra.mxu3 %v97_v6  ;;  %88 = vmatpush.msra.mxu0 %v58_v5 }
  0x14   :  { %118 = vmatpush.msra.mxu1 %v96_v7  ;;  %2494 = vmatmul.msk.f32.vlgmr.msra.gmra.mxu0 %vm66_vm0, %v56_v8 }
  0x15   :  { %119 = vmatmul.f32.vlgmr.msra.gmra.mxu1 %v2917_v9  ;;  %181 = vmatpush.msra.mxu2 %v96_v7 }
  0x16   :  { %251 = vmatpush.msra.mxu3 %v96_v7  ;;  %318 = vmatpush.msrb.mxu1 %v99_v2 }
  0x17   :  { %388 = vmatpush.msrb.mxu2 %v99_v2  ;;  %524 = vmatpush.msrb.mxu0 %v99_v2 }
  0x18   :  { %454 = vmatpush.msrb.mxu3 %v99_v2  ;;  %319 = vmatpush.msrb.mxu1 %v98_v3 }
  0x19   :  { %389 = vmatpush.msrb.mxu2 %v98_v3  ;;  %525 = vmatpush.msrb.mxu0 %v98_v3 }
  0x1a   :  { %455 = vmatpush.msrb.mxu3 %v98_v3  ;;  %320 = vmatpush.msrb.mxu1 %v97_v6 }
  0x1b   :  { %390 = vmatpush.msrb.mxu2 %v97_v6  ;;  %526 = vmatpush.msrb.mxu0 %v97_v6 }
  0x1c   :  { %456 = vmatpush.msrb.mxu3 %v97_v6  ;;  %321 = vmatpush.msrb.mxu1 %v96_v7 }
  0x1d   :  { %391 = vmatpush.msrb.mxu2 %v96_v7  ;;  %527 = vmatpush.msrb.mxu0 %v96_v7 }
  0x1e   :  { %457 = vmatpush.msrb.mxu3 %v96_v7  ;;  %594 = vmatpush.msra.mxu1 %v99_v2 }
  0x20   :  { %595 = vmatpush.msra.mxu1 %v98_v3 }
  0x22   :  { %596 = vmatpush.msra.mxu1 %v97_v6 }
  0x24   :  { %597 = vmatpush.msra.mxu1 %v96_v7 }
  0x91   :  { %v90_v11 = vpop.f32.mrf.mxu0 }
  0x92   :  { %v120_v12 = vpop.f32.mrf.mxu1  ;;  %v2973_v13 = vadd.f32 %v2970_v10, %v90_v11 }
  0x94   :  { %v123_v14 = vadd.f32 %v120_v12, %v2973_v13 }
  0x96   :  { %2579 = vtanh.f32 %v123_v14  ;;  %v2496_v16 = vmul.f32 -1.442695, %v123_v14 }
  0x98   :  { %2581 = vpow2.f32 %v2496_v16 }
  0x9c   :  { %v2580_v15 = vpop.eup %2579 }
  0x9d   :  { %146 = vrot.lane.b32.xlu0 %v2580_v15, %s2918_s11 }
  0x9e   :  { %v2582_v17 = vpop.eup %2581 }
  0x9f   :  { %v127_v18 = vadd.f32 1.0, %v2582_v17 }
  0xa1   :  { %2583 = vrcp.f32 %v127_v18  ;;  %v139_v24 = vand.u32 2147483648, %v127_v18  ;;  %vm133_vm2 = vweird.f32 %v127_v18  ;;  %v137_v25 = vand.u32 2147483647, %v127_v18 }
  0xa3   :  { %v140_v27 = vor.u32 1.1754944e-38, %v139_v24  ;;  %vm138_vm4 = vcmp.eq.f32.partialorder %v137_v25, 8.507059e+37 }
  0xa7   :  { %v2584_v19 = vpop.eup %2583 }
  0xa8   :  { %v129_v20 = vmul.f32 %v2584_v19, %v127_v18  ;;  %vm134_vm1 = vweird.f32 %v2584_v19 }
  0xa9   :  { %vm135_vm3 = vmor %vm133_vm2, %vm134_vm1 }
  0xaa   :  { %v130_v21 = vsub.f32 1.0, %v129_v20 }
  0xac   :  { %v131_v22 = vmul.f32 %v2584_v19, %v130_v21 }
  0xae   :  { %v132_v23 = vadd.f32 %v2584_v19, %v131_v22 }
  0xb0   :  { %v136_v26 = vsel %vm135_vm3, %v2584_v19, %v132_v23 }
  0xb1   :  { %v141_v29 = vsel %vm138_vm4, %v140_v27, %v136_v26  ;;  %vm650_vm4 = vcmask 1045504  }
  0xb2   :  { %v144_v31 = vmul.f32 0.0, %v141_v29 }
 0x10f   :  { %v147_v28 = vpop.permute.xlu0 %146 }
 0x110   :  { %v149_v30 = vmul.f32 %v147_v28, %v141_v29 }
 0x112   :  { %151 = vrot.lane.b32.xlu0 %v149_v30, %s2919_s12 }
 0x184   :  { %v152_v32 = vpop.permute.xlu0 %151 }
 0x185   :  { %v154_v33 = vadd.f32 %v152_v32, %v144_v31 }
 0x187   :  { %2585 = vtanh.f32 %v154_v33  ;;  %v211_v57 = vrot.slane %v154_v33, 6 }
 0x18d   :  { %v2586_v34 = vpop.eup %2585 }
 0x18e   :  { %157 = vrot.lane.b32.xlu1 %v2586_v34, %s2918_s11 }
 0x200   :  { %v158_v35 = vpop.permute.xlu1 %157 }
 0x201   :  { %v2979_v36 = vmul.f32 %v158_v35, %v141_v29 }
 0x203   :  { %162 = vrot.lane.b32.xlu1 %v2979_v36, %s2919_s12 }
 0x275   :  { %v163_v37 = vpop.permute.xlu1 %162 }
 0x276   :  { %2497 = vmatmul.msk.f32.vlgmr.msra.gmra.mxu2 %vm66_vm0, %v163_v37 }
 0x2f9   :  { %v183_v38 = vpop.f32.mrf.mxu2 }
 0x2fa   :  { %v187_v39 = vrot.slane %v183_v38, 6 }
 0x2fc   :  { %v189_v40 = vadd.f32 %v187_v39, %v2973_v13 }
 0x2fe   :  { %2587 = vtanh.f32 %v189_v40  ;;  %v2498_v42 = vmul.f32 -1.442695, %v189_v40 }
 0x300   :  { %2589 = vpow2.f32 %v2498_v42 }
 0x304   :  { %v2588_v41 = vpop.eup %2587 }
 0x305   :  { %215 = vrot.lane.b32.xlu2 %v2588_v41, %s2918_s11 }
 0x306   :  { %v2590_v43 = vpop.eup %2589 }
 0x307   :  { %v193_v44 = vadd.f32 1.0, %v2590_v43 }
 0x309   :  { %2591 = vrcp.f32 %v193_v44  ;;  %v205_v50 = vand.u32 2147483648, %v193_v44  ;;  %vm199_vm6 = vweird.f32 %v193_v44  ;;  %v203_v51 = vand.u32 2147483647, %v193_v44 }
 0x30b   :  { %v206_v53 = vor.u32 1.1754944e-38, %v205_v50  ;;  %vm204_vm8 = vcmp.eq.f32.partialorder %v203_v51, 8.507059e+37 }
 0x30f   :  { %v2592_v45 = vpop.eup %2591 }
 0x310   :  { %v195_v46 = vmul.f32 %v2592_v45, %v193_v44  ;;  %vm200_vm5 = vweird.f32 %v2592_v45 }
 0x311   :  { %vm201_vm7 = vmor %vm199_vm6, %vm200_vm5 }
 0x312   :  { %v196_v47 = vsub.f32 1.0, %v195_v46 }
 0x314   :  { %v197_v48 = vmul.f32 %v2592_v45, %v196_v47 }
 0x316   :  { %v198_v49 = vadd.f32 %v2592_v45, %v197_v48 }
 0x318   :  { %v202_v52 = vsel %vm201_vm7, %v2592_v45, %v198_v49 }
 0x319   :  { %v207_v55 = vsel %vm204_vm8, %v206_v53, %v202_v52 }
 0x31a   :  { %v213_v58 = vmul.f32 %v211_v57, %v207_v55 }
 0x35f   :  { %v216_v54 = vpop.permute.xlu2 %215 }
 0x360   :  { %v218_v56 = vmul.f32 %v216_v54, %v207_v55 }
 0x362   :  { %220 = vrot.lane.b32.xlu2 %v218_v56, %s2919_s12 }
 0x3bc   :  { %v221_v59 = vpop.permute.xlu2 %220 }
 0x3bd   :  { %v223_v60 = vadd.f32 %v221_v59, %v213_v58 }
 0x3bf   :  { %2593 = vtanh.f32 %v223_v60  ;;  %v281_v24 = vrot.slane %v223_v60, 6 }
 0x3c5   :  { %v2594_v61 = vpop.eup %2593 }
 0x3c6   :  { %226 = vrot.lane.b32.xlu0 %v2594_v61, %s2918_s11 }
 0x438   :  { %v227_v62 = vpop.permute.xlu0 %226 }
 0x439   :  { %v229_v63 = vmul.f32 %v227_v62, %v207_v55  ;;  %v57_v62 = vld [vmem:[%s3487_s0 + $0x8] sm:$0xff] }
 0x43a   :  { %2495 = vmatmul.msk.f32.gmra.mxu0 %vm66_vm0, %v57_v62 }
 0x43b   :  { %v231_v0 = vrot.slane %v229_v63, 2  ;;  %v647_v31 = vsel %vm646_vm13, %v2979_v36, %v229_v63 }
 0x43d   :  { %232 = vrot.lane.b32.xlu1 %v231_v0, %s2919_s12 }
 0x4af   :  { %v233_v1 = vpop.permute.xlu1 %232 }
 0x4b0   :  { %2499 = vmatmul.msk.f32.vlgmr.msra.gmra.mxu3 %vm66_vm0, %v233_v1 }
 0x4b7   :  { %v93_v0 = vpop.f32.mrf.mxu0 }
 0x4b8   :  { %v3011_v1 = vadd.f32 %v2970_v10, %v93_v0 }
 0x533   :  { %v253_v2 = vpop.f32.mrf.mxu3 }
 0x534   :  { %v257_v3 = vrot.slane %v253_v2, 4 }
 0x536   :  { %v259_v4 = vadd.f32 %v257_v3, %v2973_v13 }
 0x538   :  { %2595 = vtanh.f32 %v259_v4  ;;  %v2500_v6 = vmul.f32 -1.442695, %v259_v4 }
 0x53a   :  { %2597 = vpow2.f32 %v2500_v6 }
 0x53e   :  { %v2596_v5 = vpop.eup %2595 }
 0x53f   :  { %285 = vrot.lane.b32.xlu2 %v2596_v5, %s2918_s11 }
 0x540   :  { %v2598_v7 = vpop.eup %2597 }
 0x541   :  { %v263_v8 = vadd.f32 1.0, %v2598_v7 }
 0x543   :  { %2599 = vrcp.f32 %v263_v8  ;;  %v275_v17 = vand.u32 2147483648, %v263_v8  ;;  %vm269_vm10 = vweird.f32 %v263_v8  ;;  %v273_v18 = vand.u32 2147483647, %v263_v8 }
 0x545   :  { %v276_v20 = vor.u32 1.1754944e-38, %v275_v17  ;;  %vm274_vm12 = vcmp.eq.f32.partialorder %v273_v18, 8.507059e+37 }
 0x549   :  { %v2600_v11 = vpop.eup %2599 }
 0x54a   :  { %v265_v12 = vmul.f32 %v2600_v11, %v263_v8  ;;  %vm270_vm9 = vweird.f32 %v2600_v11 }
 0x54b   :  { %vm271_vm11 = vmor %vm269_vm10, %vm270_vm9 }
 0x54c   :  { %v266_v14 = vsub.f32 1.0, %v265_v12 }
 0x54e   :  { %v267_v15 = vmul.f32 %v2600_v11, %v266_v14 }
 0x550   :  { %v268_v16 = vadd.f32 %v2600_v11, %v267_v15 }
 0x552   :  { %v272_v19 = vsel %vm271_vm11, %v2600_v11, %v268_v16 }
 0x553   :  { %v277_v22 = vsel %vm274_vm12, %v276_v20, %v272_v19 }
 0x554   :  { %v283_v25 = vmul.f32 %v281_v24, %v277_v22  ;;  %v657_v24 = vld [vmem:[#allocation2 + $0x28] sm:$0xff] }
 0x599   :  { %v286_v21 = vpop.permute.xlu2 %285 }
 0x59a   :  { %v288_v23 = vmul.f32 %v286_v21, %v277_v22 }
 0x59c   :  { %290 = vrot.lane.b32.xlu0 %v288_v23, %s2919_s12  ;;  %v658_v23 = vld [vmem:[#allocation2 + $0x30] sm:$0xff] }
 0x60e   :  { %v291_v26 = vpop.permute.xlu0 %290 }
 0x60f   :  { %v293_v27 = vadd.f32 %v291_v26, %v283_v25  ;;  %v656_v25 = vld [vmem:[#allocation2 + $0x20] sm:$0xff] }
 0x611   :  { %2601 = vtanh.f32 %v293_v27  ;;  %v351_v53 = vrot.slane %v293_v27, 6 }
 0x617   :  { %v2602_v28 = vpop.eup %2601 }
 0x618   :  { %296 = vrot.lane.b32.xlu1 %v2602_v28, %s2918_s11 }
 0x68a   :  { %v297_v29 = vpop.permute.xlu1 %296 }
 0x68b   :  { %v299_v30 = vmul.f32 %v297_v29, %v277_v22  ;;  %v659_v22 = vld [vmem:[#allocation2 + $0x38] sm:$0xff] }
 0x68c   :  { %687 = vmatpush.msra.mxu2 %v659_v22 }
 0x68d   :  { %v301_v32 = vrot.slane %v299_v30, 4  ;;  %v649_v33 = vsel %vm648_vm14, %v647_v31, %v299_v30 }
 0x68e   :  { %688 = vmatpush.msra.mxu2 %v658_v23 }
 0x68f   :  { %302 = vrot.lane.b32.xlu2 %v301_v32, %s2919_s12 }
 0x690   :  { %689 = vmatpush.msra.mxu2 %v657_v24 }
 0x692   :  { %690 = vmatpush.msra.mxu2 %v656_v25 }
 0x6e9   :  { %v303_v34 = vpop.permute.xlu2 %302 }
 0x6ea   :  { %2501 = vmatmul.msk.f32.vlgmr.msrb.gmra.mxu1 %vm66_vm0, %v303_v34  ;;  %v3026_v34 = vld [vmem:[#allocation5 + $0x38] sm:$0xff] }
 0x6eb   :  { %715 = vmatpush.msra.mxu3 %v3026_v34  ;;  %778 = vmatpush.msra.mxu0 %v3026_v34 }
 0x6ec   :  { %848 = vmatpush.msrb.mxu1 %v3026_v34 }
 0x767   :  { %v323_v35 = vpop.f32.mrf.mxu1 }
 0x768   :  { %v327_v37 = vrot.slane %v323_v35, 2  ;;  %v3028_v35 = vld [vmem:[#allocation5 + $0x30] sm:$0xff] }
 0x769   :  { %716 = vmatpush.msra.mxu3 %v3028_v35  ;;  %779 = vmatpush.msra.mxu0 %v3028_v35 }
 0x76a   :  { %v329_v38 = vadd.f32 %v327_v37, %v2973_v13  ;;  %v3032_v37 = vld [vmem:[#allocation5 + $0x28] sm:$0xff]  ;;  %849 = vmatpush.msrb.mxu1 %v3028_v35 }
 0x76b   :  { %717 = vmatpush.msra.mxu3 %v3032_v37  ;;  %780 = vmatpush.msra.mxu0 %v3032_v37 }
 0x76c   :  { %2603 = vtanh.f32 %v329_v38  ;;  %v2502_v40 = vmul.f32 -1.442695, %v329_v38  ;;  %v3038_v38 = vld [vmem:[#allocation5 + $0x20] sm:$0xff]  ;;  %850 = vmatpush.msrb.mxu1 %v3032_v37 }
 0x76d   :  { %718 = vmatpush.msra.mxu3 %v3038_v38  ;;  %781 = vmatpush.msra.mxu0 %v3038_v38 }
 0x76e   :  { %2605 = vpow2.f32 %v2502_v40  ;;  %851 = vmatpush.msrb.mxu1 %v3038_v38 }
 0x772   :  { %v2604_v39 = vpop.eup %2603 }
 0x773   :  { %355 = vrot.lane.b32.xlu0 %v2604_v39, %s2918_s11 }
 0x774   :  { %v2606_v41 = vpop.eup %2605 }
 0x775   :  { %v333_v36 = vadd.f32 1.0, %v2606_v41 }
 0x777   :  { %2607 = vrcp.f32 %v333_v36  ;;  %v345_v47 = vand.u32 2147483648, %v333_v36  ;;  %vm339_vm1 = vweird.f32 %v333_v36  ;;  %v343_v48 = vand.u32 2147483647, %v333_v36 }
 0x779   :  { %v346_v49 = vor.u32 1.1754944e-38, %v345_v47  ;;  %vm344_vm3 = vcmp.eq.f32.partialorder %v343_v48, 8.507059e+37 }
 0x77d   :  { %v2608_v42 = vpop.eup %2607 }
 0x77e   :  { %v335_v43 = vmul.f32 %v2608_v42, %v333_v36  ;;  %vm340_vm15 = vweird.f32 %v2608_v42  ;;  %v3063_v36 = vld [vmem:[%s3490_s3 + $0x1] ss:$0 sm:$0xff] }
 0x77f   :  { %vm341_vm2 = vmor %vm339_vm1, %vm340_vm15 }
 0x780   :  { %v336_v44 = vsub.f32 1.0, %v335_v43 }
 0x782   :  { %v337_v45 = vmul.f32 %v2608_v42, %v336_v44 }
 0x784   :  { %v338_v46 = vadd.f32 %v2608_v42, %v337_v45 }
 0x786   :  { %v342_v13 = vsel %vm341_vm2, %v2608_v42, %v338_v46 }
 0x787   :  { %v347_v51 = vsel %vm344_vm3, %v346_v49, %v342_v13 }
 0x788   :  { %v353_v54 = vmul.f32 %v351_v53, %v347_v51 }
 0x7e5   :  { %v356_v50 = vpop.permute.xlu0 %355 }
 0x7e6   :  { %v358_v52 = vmul.f32 %v356_v50, %v347_v51 }
 0x7e8   :  { %360 = vrot.lane.b32.xlu1 %v358_v52, %s2919_s12 }
 0x85a   :  { %v361_v55 = vpop.permute.xlu1 %360 }
 0x85b   :  { %v363_v56 = vadd.f32 %v361_v55, %v353_v54 }
 0x85d   :  { %2609 = vtanh.f32 %v363_v56  ;;  %v418_v26 = vrot.slane %v363_v56, 6 }
 0x863   :  { %v2610_v57 = vpop.eup %2609 }
 0x864   :  { %366 = vrot.lane.b32.xlu2 %v2610_v57, %s2918_s11 }
 0x8be   :  { %v367_v58 = vpop.permute.xlu2 %366 }
 0x8bf   :  { %v369_v59 = vmul.f32 %v367_v58, %v347_v51 }
 0x8c1   :  { %v371_v60 = vrot.slane %v369_v59, 6  ;;  %v651_v61 = vsel %vm650_vm4, %v649_v33, %v369_v59 }
 0x8c3   :  { %372 = vrot.lane.b32.xlu0 %v371_v60, %s2919_s12 }
 0x935   :  { %v373_v63 = vpop.permute.xlu0 %372 }
 0x936   :  { %2503 = vmatmul.msk.f32.vlgmr.msrb.gmra.mxu2 %vm66_vm0, %v373_v63 }
 0x937   :  { %1124 = vmatpush.msrb.mxu2 %v3026_v34 }
 0x939   :  { %1125 = vmatpush.msrb.mxu2 %v3028_v35 }
 0x93b   :  { %1126 = vmatpush.msrb.mxu2 %v3032_v37 }
 0x93d   :  { %1127 = vmatpush.msrb.mxu2 %v3038_v38 }
 0x9b9   :  { %v393_v2 = vpop.f32.mrf.mxu2 }
 0x9ba   :  { %v396_v3 = vadd.f32 %v393_v2, %v3011_v1 }
 0x9bc   :  { %2611 = vtanh.f32 %v396_v3  ;;  %v2504_v5 = vmul.f32 -1.442695, %v396_v3 }
 0x9be   :  { %2613 = vpow2.f32 %v2504_v5 }
 0x9c2   :  { %v2612_v4 = vpop.eup %2611 }
 0x9c3   :  { %422 = vrot.lane.b32.xlu1 %v2612_v4, %s2918_s11 }
 0x9c4   :  { %v2614_v6 = vpop.eup %2613 }
 0x9c5   :  { %v400_v7 = vadd.f32 1.0, %v2614_v6 }
 0x9c7   :  { %2615 = vrcp.f32 %v400_v7  ;;  %v412_v10 = vand.u32 2147483648, %v400_v7  ;;  %vm406_vm6 = vweird.f32 %v400_v7  ;;  %v410_v16 = vand.u32 2147483647, %v400_v7 }
 0x9c9   :  { %v413_v18 = vor.u32 1.1754944e-38, %v412_v10  ;;  %vm411_vm8 = vcmp.eq.f32.partialorder %v410_v16, 8.507059e+37 }
 0x9cd   :  { %v2616_v8 = vpop.eup %2615 }
 0x9ce   :  { %v402_v11 = vmul.f32 %v2616_v8, %v400_v7  ;;  %vm407_vm5 = vweird.f32 %v2616_v8 }
 0x9cf   :  { %vm408_vm7 = vmor %vm406_vm6, %vm407_vm5 }
 0x9d0   :  { %v403_v12 = vsub.f32 1.0, %v402_v11 }
 0x9d2   :  { %v404_v14 = vmul.f32 %v2616_v8, %v403_v12 }
 0x9d4   :  { %v405_v15 = vadd.f32 %v2616_v8, %v404_v14 }
 0x9d6   :  { %v409_v17 = vsel %vm408_vm7, %v2616_v8, %v405_v15 }
 0x9d7   :  { %v414_v20 = vsel %vm411_vm8, %v413_v18, %v409_v17 }
 0x9d8   :  { %v420_v27 = vmul.f32 %v418_v26, %v414_v20 }
 0xa35   :  { %v423_v19 = vpop.permute.xlu1 %422 }
 0xa36   :  { %v425_v21 = vmul.f32 %v423_v19, %v414_v20 }
 0xa38   :  { %427 = vrot.lane.b32.xlu2 %v425_v21, %s2919_s12 }
 0xa40   :  { %667 = vrot.lane.b32.xlu2 %v651_v61, %s2919_s12 }
 0xa92   :  { %v428_v28 = vpop.permute.xlu2 %427 }
 0xa93   :  { %v3017_v29 = vadd.f32 %v428_v28, %v420_v27 }
 0xa95   :  { %2617 = vtanh.f32 %v3017_v29  ;;  %v487_v17 = vrot.slane %v3017_v29, 6 }
 0xa9a   :  { %v668_v30 = vpop.permute.xlu2 %667 }
 0xa9b   :  { %v2618_v31 = vpop.eup %2617  ;;  %2512 = vmatmul.msk.f32.vlgmr.msra.gmra.mxu2 %vm66_vm0, %v668_v30 }
 0xa9c   :  { %433 = vrot.lane.b32.xlu0 %v2618_v31, %s2918_s11 }
 0xb0e   :  { %v434_v32 = vpop.permute.xlu0 %433 }
 0xb0f   :  { %v3022_v33 = vmul.f32 %v434_v32, %v414_v20 }
 0xb11   :  { %438 = vrot.lane.b32.xlu1 %v3022_v33, %s2919_s12 }
 0xb1e   :  { %v692_v43 = vpop.f32.mrf.mxu2 }
 0xb1f   :  { %v3067_v44 = vadd.f32 %v3063_v36, %v692_v43 }
 0xb83   :  { %v439_v39 = vpop.permute.xlu1 %438 }
 0xb84   :  { %2505 = vmatmul.msk.f32.vlgmr.msrb.gmra.mxu3 %vm66_vm0, %v439_v39 }
 0xb85   :  { %918 = vmatpush.msrb.mxu3 %v3026_v34 }
 0xb87   :  { %919 = vmatpush.msrb.mxu3 %v3028_v35 }
 0xb89   :  { %920 = vmatpush.msrb.mxu3 %v3032_v37 }
 0xb8b   :  { %921 = vmatpush.msrb.mxu3 %v3038_v38 }
 0xb8c   :  { %719 = vmatmul.f32.vlgmr.msra.gmra.mxu3 %v2917_v9 }
 0xb8d   :  { %1194 = vmatpush.msra.mxu3 %v3026_v34 }
 0xb8f   :  { %1195 = vmatpush.msra.mxu3 %v3028_v35 }
 0xb91   :  { %1196 = vmatpush.msra.mxu3 %v3032_v37 }
 0xb93   :  { %1197 = vmatpush.msra.mxu3 %v3038_v38 }
 0xc07   :  { %v459_v40 = vpop.f32.mrf.mxu3 }
 0xc08   :  { %v463_v41 = vrot.slane %v459_v40, 6 }
 0xc0a   :  { %v465_v42 = vadd.f32 %v463_v41, %v3011_v1 }
 0xc0c   :  { %2619 = vtanh.f32 %v465_v42  ;;  %v2506_v13 = vmul.f32 -1.442695, %v465_v42 }
 0xc0f   :  { %v720_v45 = vpop.f32.mrf.mxu3 }
 0xc10   :  { %v723_v46 = vadd.f32 %v720_v45, %v3067_v44 }
 0xc12   :  { %v2620_v47 = vpop.eup %2619  ;;  %2621 = vtanh.f32 %v723_v46  ;;  %v2514_v49 = vmul.f32 -1.442695, %v723_v46 }
 0xc13   :  { %491 = vrot.lane.b32.xlu0 %v2620_v47, %s2918_s11  ;;  %2623 = vpow2.f32 %v2506_v13 }
 0xc14   :  { %2625 = vpow2.f32 %v2514_v49 }
 0xc18   :  { %v2622_v48 = vpop.eup %2621 }
 0xc19   :  { %746 = vrot.lane.b32.xlu1 %v2622_v48, %s2918_s11  ;;  %v2624_v50 = vpop.eup %2623 }
 0xc1a   :  { %v469_v51 = vadd.f32 1.0, %v2624_v50  ;;  %v2626_v52 = vpop.eup %2625 }
 0xc1b   :  { %v727_v53 = vadd.f32 1.0, %v2626_v52 }
 0xc1c   :  { %2627 = vrcp.f32 %v469_v51  ;;  %v481_v62 = vand.u32 2147483648, %v469_v51  ;;  %vm475_vm10 = vweird.f32 %v469_v51  ;;  %v479_v63 = vand.u32 2147483647, %v469_v51 }
 0xc1d   :  { %2629 = vrcp.f32 %v727_v53  ;;  %v739_v7 = vand.u32 2147483648, %v727_v53  ;;  %vm733_vm1 = vweird.f32 %v727_v53  ;;  %v737_v11 = vand.u32 2147483647, %v727_v53 }
 0xc1e   :  { %v482_v3 = vor.u32 1.1754944e-38, %v481_v62  ;;  %vm480_vm12 = vcmp.eq.f32.partialorder %v479_v63, 8.507059e+37 }
 0xc1f   :  { %v740_v14 = vor.u32 1.1754944e-38, %v739_v7  ;;  %vm738_vm3 = vcmp.eq.f32.partialorder %v737_v11, 8.507059e+37 }
 0xc22   :  { %v2628_v54 = vpop.eup %2627 }
 0xc23   :  { %v471_v55 = vmul.f32 %v2628_v54, %v469_v51  ;;  %v2630_v56 = vpop.eup %2629  ;;  %vm476_vm9 = vweird.f32 %v2628_v54 }
 0xc24   :  { %v729_v58 = vmul.f32 %v2630_v56, %v727_v53  ;;  %vm477_vm11 = vmor %vm475_vm10, %vm476_vm9  ;;  %vm734_vm15 = vweird.f32 %v2630_v56 }
 0xc25   :  { %v472_v57 = vsub.f32 1.0, %v471_v55  ;;  %vm735_vm2 = vmor %vm733_vm1, %vm734_vm15 }
 0xc26   :  { %v730_v60 = vsub.f32 1.0, %v729_v58 }
 0xc27   :  { %v473_v59 = vmul.f32 %v2628_v54, %v472_v57 }
 0xc28   :  { %v731_v0 = vmul.f32 %v2630_v56, %v730_v60 }
 0xc29   :  { %v474_v61 = vadd.f32 %v2628_v54, %v473_v59 }
 0xc2a   :  { %v732_v4 = vadd.f32 %v2630_v56, %v731_v0 }
 0xc2b   :  { %v478_v2 = vsel %vm477_vm11, %v2628_v54, %v474_v61 }
 0xc2c   :  { %v483_v6 = vsel %vm480_vm12, %v482_v3, %v478_v2  ;;  %v736_v12 = vsel %vm735_vm2, %v2630_v56, %v732_v4 }
 0xc2d   :  { %v741_v10 = vsel %vm738_vm3, %v740_v14, %v736_v12  ;;  %v489_v18 = vmul.f32 %v487_v17, %v483_v6 }
 0xc2e   :  { %v744_v22 = vmul.f32 0.0, %v741_v10 }
 0xc85   :  { %v492_v5 = vpop.permute.xlu0 %491 }
 0xc86   :  { %v494_v8 = vmul.f32 %v492_v5, %v483_v6 }
 0xc88   :  { %496 = vrot.lane.b32.xlu2 %v494_v8, %s2919_s12 }
 0xc8b   :  { %v747_v15 = vpop.permute.xlu1 %746 }
 0xc8c   :  { %v749_v16 = vmul.f32 %v747_v15, %v741_v10 }
 0xc8e   :  { %751 = vrot.lane.b32.xlu0 %v749_v16, %s2919_s12 }
 0xce2   :  { %v497_v19 = vpop.permute.xlu2 %496 }
 0xce3   :  { %v3075_v20 = vadd.f32 %v497_v19, %v489_v18 }
 0xce5   :  { %2631 = vtanh.f32 %v3075_v20  ;;  %v557_v16 = vrot.slane %v3075_v20, 6 }
 0xceb   :  { %v2632_v21 = vpop.eup %2631 }
 0xcec   :  { %502 = vrot.lane.b32.xlu1 %v2632_v21, %s2918_s11 }
 0xd00   :  { %v752_v23 = vpop.permute.xlu0 %751 }
 0xd01   :  { %v3079_v24 = vadd.f32 %v752_v23, %v744_v22 }
 0xd03   :  { %2633 = vtanh.f32 %v3079_v24  ;;  %v811_v21 = vrot.slane %v3079_v24, 6 }
 0xd09   :  { %v2634_v25 = vpop.eup %2633 }
 0xd0a   :  { %757 = vrot.lane.b32.xlu2 %v2634_v25, %s2918_s11 }
 0xd5e   :  { %v503_v26 = vpop.permute.xlu1 %502 }
 0xd5f   :  { %v3083_v27 = vmul.f32 %v503_v26, %v483_v6 }
 0xd61   :  { %v507_v28 = vrot.slane %v3083_v27, 2 }
 0xd63   :  { %508 = vrot.lane.b32.xlu0 %v507_v28, %s2919_s12 }
 0xd64   :  { %v758_v29 = vpop.permute.xlu2 %757 }
 0xd65   :  { %v3087_v30 = vmul.f32 %v758_v29, %v741_v10 }
 0xd67   :  { %762 = vrot.lane.b32.xlu1 %v3087_v30, %s2919_s12 }
 0xdd5   :  { %v509_v31 = vpop.permute.xlu0 %508 }
 0xdd6   :  { %2507 = vmatmul.msk.f32.vlgmr.msrb.gmra.mxu0 %vm66_vm0, %v509_v31  ;;  %v652_v31 = vsel %vm646_vm13, %v3022_v33, %v3083_v27 }
 0xdd7   :  { %988 = vmatpush.msrb.mxu0 %v3026_v34 }
 0xdd9   :  { %989 = vmatpush.msrb.mxu0 %v3028_v35  ;;  %v763_v32 = vpop.permute.xlu1 %762 }
 0xddb   :  { %990 = vmatpush.msrb.mxu0 %v3032_v37 }
 0xddd   :  { %991 = vmatpush.msrb.mxu0 %v3038_v38 }
 0xdde   :  { %2515 = vmatmul.msk.f32.vlgmr.msra.gmra.mxu0 %vm66_vm0, %v763_v32 }
 0xe53   :  { %v529_v39 = vpop.f32.mrf.mxu0 }
 0xe54   :  { %v533_v40 = vrot.slane %v529_v39, 4 }
 0xe56   :  { %v535_v41 = vadd.f32 %v533_v40, %v3011_v1 }
 0xe58   :  { %2635 = vtanh.f32 %v535_v41  ;;  %v2508_v48 = vmul.f32 -1.442695, %v535_v41 }
 0xe5b   :  { %v783_v42 = vpop.f32.mrf.mxu0 }
 0xe5c   :  { %v787_v43 = vrot.slane %v783_v42, 6 }
 0xe5e   :  { %v2636_v45 = vpop.eup %2635  ;;  %v789_v46 = vadd.f32 %v787_v43, %v3067_v44 }
 0xe5f   :  { %561 = vrot.lane.b32.xlu2 %v2636_v45, %s2918_s11 }
 0xe60   :  { %2637 = vtanh.f32 %v789_v46  ;;  %v2516_v53 = vmul.f32 -1.442695, %v789_v46 }
 0xe61   :  { %2639 = vpow2.f32 %v2508_v48 }
 0xe66   :  { %v2638_v47 = vpop.eup %2637 }
 0xe67   :  { %815 = vrot.lane.b32.xlu0 %v2638_v47, %s2918_s11  ;;  %v2640_v13 = vpop.eup %2639 }
 0xe68   :  { %v539_v49 = vadd.f32 1.0, %v2640_v13 }
 0xe6a   :  { %2641 = vrcp.f32 %v539_v49  ;;  %v551_v56 = vand.u32 2147483648, %v539_v49  ;;  %vm545_vm6 = vweird.f32 %v539_v49  ;;  %v549_v57 = vand.u32 2147483647, %v539_v49 }
 0xe6b   :  { %2643 = vpow2.f32 %v2516_v53 }
 0xe6c   :  { %v552_v60 = vor.u32 1.1754944e-38, %v551_v56  ;;  %vm550_vm8 = vcmp.eq.f32.partialorder %v549_v57, 8.507059e+37 }
 0xe70   :  { %v2642_v50 = vpop.eup %2641 }
 0xe71   :  { %v541_v51 = vmul.f32 %v2642_v50, %v539_v49  ;;  %vm546_vm5 = vweird.f32 %v2642_v50  ;;  %v2644_v58 = vpop.eup %2643 }
 0xe72   :  { %vm547_vm7 = vmor %vm545_vm6, %vm546_vm5  ;;  %v793_v61 = vadd.f32 1.0, %v2644_v58 }
 0xe73   :  { %v542_v52 = vsub.f32 1.0, %v541_v51 }
 0xe74   :  { %2645 = vrcp.f32 %v793_v61  ;;  %v805_v7 = vand.u32 2147483648, %v793_v61  ;;  %vm799_vm10 = vweird.f32 %v793_v61  ;;  %v803_v8 = vand.u32 2147483647, %v793_v61 }
 0xe75   :  { %v543_v54 = vmul.f32 %v2642_v50, %v542_v52 }
 0xe76   :  { %v806_v12 = vor.u32 1.1754944e-38, %v805_v7  ;;  %vm804_vm12 = vcmp.eq.f32.partialorder %v803_v8, 8.507059e+37 }
 0xe77   :  { %v544_v55 = vadd.f32 %v2642_v50, %v543_v54 }
 0xe79   :  { %v548_v59 = vsel %vm547_vm7, %v2642_v50, %v544_v55 }
 0xe7a   :  { %v553_v63 = vsel %vm550_vm8, %v552_v60, %v548_v59  ;;  %v2646_v2 = vpop.eup %2645 }
 0xe7b   :  { %v795_v3 = vmul.f32 %v2646_v2, %v793_v61  ;;  %vm800_vm9 = vweird.f32 %v2646_v2  ;;  %v559_v17 = vmul.f32 %v557_v16, %v553_v63 }
 0xe7c   :  { %vm801_vm11 = vmor %vm799_vm10, %vm800_vm9 }
 0xe7d   :  { %v796_v4 = vsub.f32 1.0, %v795_v3 }
 0xe7f   :  { %v797_v5 = vmul.f32 %v2646_v2, %v796_v4 }
 0xe81   :  { %v798_v6 = vadd.f32 %v2646_v2, %v797_v5 }
 0xe83   :  { %v802_v11 = vsel %vm801_vm11, %v2646_v2, %v798_v6 }
 0xe84   :  { %v807_v15 = vsel %vm804_vm12, %v806_v12, %v802_v11 }
 0xe85   :  { %v813_v22 = vmul.f32 %v811_v21, %v807_v15 }
 0xeb9   :  { %v562_v62 = vpop.permute.xlu2 %561 }
 0xeba   :  { %v564_v0 = vmul.f32 %v562_v62, %v553_v63 }
 0xebc   :  { %566 = vrot.lane.b32.xlu1 %v564_v0, %s2919_s12 }
 0xed9   :  { %v816_v14 = vpop.permute.xlu0 %815 }
 0xeda   :  { %v818_v10 = vmul.f32 %v816_v14, %v807_v15 }
 0xedc   :  { %820 = vrot.lane.b32.xlu2 %v818_v10, %s2919_s12 }
 0xf2e   :  { %v567_v18 = vpop.permute.xlu1 %566 }
 0xf2f   :  { %v3104_v19 = vadd.f32 %v567_v18, %v559_v17 }
 0xf31   :  { %2647 = vtanh.f32 %v3104_v19 }
 0xf36   :  { %v821_v23 = vpop.permute.xlu2 %820 }
 0xf37   :  { %v2648_v25 = vpop.eup %2647  ;;  %v823_v26 = vadd.f32 %v821_v23, %v813_v22 }
 0xf38   :  { %572 = vrot.lane.b32.xlu0 %v2648_v25, %s2918_s11 }
 0xf39   :  { %2649 = vtanh.f32 %v823_v26  ;;  %v881_v61 = vrot.slane %v823_v26, 6 }
 0xf3f   :  { %v2650_v28 = vpop.eup %2649 }
 0xf40   :  { %826 = vrot.lane.b32.xlu1 %v2650_v28, %s2918_s11 }
 0xfaa   :  { %v573_v29 = vpop.permute.xlu0 %572 }
 0xfab   :  { %v575_v20 = vmul.f32 %v573_v29, %v553_v63 }
 0xfad   :  { %v577_v32 = vrot.slane %v575_v20, 4  ;;  %v3114_v39 = vsel %vm648_vm14, %v652_v31, %v575_v20  ;;  %v627_v31 = vrot.slane %v3104_v19, 6 }
 0xfaf   :  { %578 = vrot.lane.b32.xlu2 %v577_v32, %s2919_s12 }
 0xfb2   :  { %v827_v24 = vpop.permute.xlu1 %826 }
 0xfb3   :  { %v3117_v40 = vmul.f32 %v827_v24, %v807_v15 }
 0xfb5   :  { %v831_v41 = vrot.slane %v3117_v40, 2  ;;  %v1246_v14 = vsel %vm646_vm13, %v3087_v30, %v3117_v40 }
 0xfb7   :  { %832 = vrot.lane.b32.xlu0 %v831_v41, %s2919_s12 }
0x1009   :  { %v579_v42 = vpop.permute.xlu2 %578 }
0x100a   :  { %2509 = vmatmul.msk.f32.vlgmr.msra.gmra.mxu1 %vm66_vm0, %v579_v42 }
0x100b   :  { %1054 = vmatpush.msra.mxu1 %v3026_v34 }
0x100d   :  { %1055 = vmatpush.msra.mxu1 %v3028_v35 }
0x100f   :  { %1056 = vmatpush.msra.mxu1 %v3032_v37 }
0x1011   :  { %1057 = vmatpush.msra.mxu1 %v3038_v38 }
0x1029   :  { %v833_v33 = vpop.permute.xlu0 %832 }
0x102a   :  { %2517 = vmatmul.msk.f32.vlgmr.msrb.gmra.mxu1 %vm66_vm0, %v833_v33 }
0x1087   :  { %v599_v27 = vpop.f32.mrf.mxu1 }
0x1088   :  { %v603_v53 = vrot.slane %v599_v27, 2 }
0x108a   :  { %v605_v56 = vadd.f32 %v603_v53, %v3011_v1 }
0x108c   :  { %v2510_v1 = vmul.f32 -1.442695, %v605_v56 }
0x10a7   :  { %v853_v43 = vpop.f32.mrf.mxu1 }
0x10a8   :  { %v857_v45 = vrot.slane %v853_v43, 4 }
0x10aa   :  { %v859_v46 = vadd.f32 %v857_v45, %v3067_v44 }
0x10ac   :  { %2651 = vtanh.f32 %v859_v46  ;;  %v2518_v48 = vmul.f32 -1.442695, %v859_v46 }
0x10ae   :  { %2653 = vpow2.f32 %v2518_v48 }
0x10b2   :  { %v2652_v47 = vpop.eup %2651 }
0x10b3   :  { %885 = vrot.lane.b32.xlu1 %v2652_v47, %s2918_s11 }
0x10b4   :  { %v2654_v34 = vpop.eup %2653 }
0x10b5   :  { %v863_v35 = vadd.f32 1.0, %v2654_v34 }
0x10b7   :  { %2655 = vrcp.f32 %v863_v35  ;;  %v875_v51 = vand.u32 2147483648, %v863_v35  ;;  %vm869_vm1 = vweird.f32 %v863_v35  ;;  %v873_v52 = vand.u32 2147483647, %v863_v35 }
0x10b8   :  { %2657 = vtanh.f32 %v605_v56 }
0x10b9   :  { %v876_v55 = vor.u32 1.1754944e-38, %v875_v51  ;;  %vm874_vm3 = vcmp.eq.f32.partialorder %v873_v52, 8.507059e+37 }
0x10bd   :  { %v2656_v37 = vpop.eup %2655 }
0x10be   :  { %v865_v13 = vmul.f32 %v2656_v37, %v863_v35  ;;  %vm870_vm15 = vweird.f32 %v2656_v37  ;;  %v2658_v60 = vpop.eup %2657 }
0x10bf   :  { %vm871_vm2 = vmor %vm869_vm1, %vm870_vm15 }
0x10c0   :  { %v866_v38 = vsub.f32 1.0, %v865_v13 }
0x10c2   :  { %v867_v49 = vmul.f32 %v2656_v37, %v866_v38 }
0x10c4   :  { %v868_v50 = vadd.f32 %v2656_v37, %v867_v49 }
0x10c6   :  { %v872_v54 = vsel %vm871_vm2, %v2656_v37, %v868_v50 }
0x10c7   :  { %v877_v58 = vsel %vm874_vm3, %v876_v55, %v872_v54 }
0x10c8   :  { %v883_v62 = vmul.f32 %v881_v61, %v877_v58 }
0x1125   :  { %v886_v57 = vpop.permute.xlu1 %885 }
0x1126   :  { %v888_v59 = vmul.f32 %v886_v57, %v877_v58 }
0x1128   :  { %890 = vrot.lane.b32.xlu2 %v888_v59, %s2919_s12 }
0x1130   :  { %631 = vrot.lane.b32.xlu2 %v2658_v60, %s2918_s11 }
0x1182   :  { %v891_v63 = vpop.permute.xlu2 %890 }
0x1183   :  { %v3132_v0 = vadd.f32 %v891_v63, %v883_v62 }
0x1185   :  { %2659 = vtanh.f32 %v3132_v0  ;;  %v951_v53 = vrot.slane %v3132_v0, 6 }
0x1186   :  { %2661 = vpow2.f32 %v2510_v1 }
0x118a   :  { %v632_v23 = vpop.permute.xlu2 %631 }
0x118b   :  { %v2660_v2 = vpop.eup %2659 }
0x118c   :  { %896 = vrot.lane.b32.xlu0 %v2660_v2, %s2918_s11  ;;  %v2662_v3 = vpop.eup %2661 }
0x118d   :  { %v609_v4 = vadd.f32 1.0, %v2662_v3 }
0x118f   :  { %2663 = vrcp.f32 %v609_v4  ;;  %v621_v17 = vand.u32 2147483648, %v609_v4  ;;  %vm615_vm6 = vweird.f32 %v609_v4  ;;  %v619_v18 = vand.u32 2147483647, %v609_v4 }
0x1191   :  { %v622_v22 = vor.u32 1.1754944e-38, %v621_v17  ;;  %vm620_vm8 = vcmp.eq.f32.partialorder %v619_v18, 8.507059e+37 }
0x1195   :  { %v2664_v5 = vpop.eup %2663 }
0x1196   :  { %v611_v6 = vmul.f32 %v2664_v5, %v609_v4  ;;  %vm616_vm5 = vweird.f32 %v2664_v5 }
0x1197   :  { %vm617_vm7 = vmor %vm615_vm6, %vm616_vm5 }
0x1198   :  { %v612_v7 = vsub.f32 1.0, %v611_v6 }
0x119a   :  { %v613_v8 = vmul.f32 %v2664_v5, %v612_v7 }
0x119c   :  { %v614_v15 = vadd.f32 %v2664_v5, %v613_v8 }
0x119e   :  { %v618_v21 = vsel %vm617_vm7, %v2664_v5, %v614_v15 }
0x119f   :  { %v623_v25 = vsel %vm620_vm8, %v622_v22, %v618_v21  ;;  %v1256_v22 = vld [vmem:[#allocation2 + $0x58] sm:$0xff] }
0x11a0   :  { %v634_v26 = vmul.f32 %v632_v23, %v623_v25  ;;  %v629_v24 = vmul.f32 %v627_v31, %v623_v25  ;;  %1284 = vmatpush.msra.mxu0 %v1256_v22  ;;  %v1255_v23 = vld [vmem:[#allocation2 + $0x50] sm:$0xff] }
0x11a2   :  { %1285 = vmatpush.msra.mxu0 %v1255_v23 }
0x11fe   :  { %v897_v11 = vpop.permute.xlu0 %896 }
0x11ff   :  { %v899_v12 = vmul.f32 %v897_v11, %v877_v58 }
0x1201   :  { %v901_v10 = vrot.slane %v899_v12, 4  ;;  %v3140_v16 = vsel %vm648_vm14, %v1246_v14, %v899_v12 }
0x1203   :  { %902 = vrot.lane.b32.xlu1 %v901_v10, %s2919_s12 }
0x120b   :  { %636 = vrot.lane.b32.xlu1 %v634_v26, %s2919_s12  ;;  %v1253_v26 = vld [vmem:[#allocation2 + $0x40] sm:$0xff] }
0x1275   :  { %v903_v30 = vpop.permute.xlu1 %902 }
0x1276   :  { %2519 = vmatmul.msk.f32.vlgmr.msrb.gmra.mxu3 %vm66_vm0, %v903_v30 }
0x127d   :  { %v637_v32 = vpop.permute.xlu1 %636 }
0x127e   :  { %v639_v40 = vadd.f32 %v637_v32, %v629_v24 }
0x12f9   :  { %v923_v28 = vpop.f32.mrf.mxu3 }
0x12fa   :  { %v927_v29 = vrot.slane %v923_v28, 2 }
0x12fc   :  { %v929_v20 = vadd.f32 %v927_v29, %v3067_v44 }
0x12fe   :  { %2665 = vtanh.f32 %v929_v20  ;;  %v2520_v33 = vmul.f32 -1.442695, %v929_v20 }
0x12ff   :  { %2667 = vtanh.f32 %v639_v40 }
0x1300   :  { %2669 = vpow2.f32 %v2520_v33  ;;  %v3182_v33 = vld [vmem:[#allocation5 + $0x48] sm:$0xff] }
0x1304   :  { %v2666_v41 = vpop.eup %2665 }
0x1305   :  { %955 = vrot.lane.b32.xlu0 %v2666_v41, %s2918_s11  ;;  %v2668_v42 = vpop.eup %2667  ;;  %v3176_v41 = vld [vmem:[#allocation5 + $0x58] sm:$0xff] }
0x1306   :  { %v2670_v27 = vpop.eup %2669  ;;  %1312 = vmatpush.msrb.mxu1 %v3176_v41  ;;  %1375 = vmatpush.msra.mxu2 %v3176_v41 }
0x1307   :  { %v933_v43 = vadd.f32 1.0, %v2670_v27  ;;  %1445 = vmatpush.msrb.mxu3 %v3176_v41  ;;  %v3188_v27 = vld [vmem:[#allocation5 + $0x40] sm:$0xff] }
0x1309   :  { %2671 = vrcp.f32 %v933_v43  ;;  %v945_v48 = vand.u32 2147483648, %v933_v43  ;;  %vm939_vm10 = vweird.f32 %v933_v43  ;;  %v943_v34 = vand.u32 2147483647, %v933_v43 }
0x130b   :  { %v946_v37 = vor.u32 1.1754944e-38, %v945_v48  ;;  %vm944_vm12 = vcmp.eq.f32.partialorder %v943_v34, 8.507059e+37 }
0x130d   :  { %642 = vrot.lane.b32.xlu0 %v2668_v42, %s2918_s11  ;;  %v3178_v42 = vld [vmem:[#allocation5 + $0x50] sm:$0xff] }
0x130e   :  { %1313 = vmatpush.msrb.mxu1 %v3178_v42  ;;  %1376 = vmatpush.msra.mxu2 %v3178_v42 }
0x130f   :  { %v2672_v45 = vpop.eup %2671  ;;  %1446 = vmatpush.msrb.mxu3 %v3178_v42 }
0x1310   :  { %v935_v44 = vmul.f32 %v2672_v45, %v933_v43  ;;  %vm940_vm9 = vweird.f32 %v2672_v45  ;;  %1314 = vmatpush.msrb.mxu1 %v3182_v33  ;;  %1377 = vmatpush.msra.mxu2 %v3182_v33 }
0x1311   :  { %vm941_vm11 = vmor %vm939_vm10, %vm940_vm9  ;;  %1447 = vmatpush.msrb.mxu3 %v3182_v33 }
0x1312   :  { %v936_v46 = vsub.f32 1.0, %v935_v44  ;;  %1315 = vmatpush.msrb.mxu1 %v3188_v27  ;;  %1378 = vmatpush.msra.mxu2 %v3188_v27 }
0x1313   :  { %1448 = vmatpush.msrb.mxu3 %v3188_v27 }
0x1314   :  { %v937_v19 = vmul.f32 %v2672_v45, %v936_v46  ;;  %v3213_v46 = vld [vmem:[%s3490_s3 + $0x2] ss:$0 sm:$0xff] }
0x1316   :  { %v938_v47 = vadd.f32 %v2672_v45, %v937_v19 }
0x1318   :  { %v942_v35 = vsel %vm941_vm11, %v2672_v45, %v938_v47 }
0x1319   :  { %v947_v38 = vsel %vm944_vm12, %v946_v37, %v942_v35 }
0x131a   :  { %v953_v54 = vmul.f32 %v951_v53, %v947_v38 }
0x1377   :  { %v956_v13 = vpop.permute.xlu0 %955 }
0x1378   :  { %v958_v49 = vmul.f32 %v956_v13, %v947_v38 }
0x137a   :  { %960 = vrot.lane.b32.xlu2 %v958_v49, %s2919_s12 }
0x137f   :  { %v643_v50 = vpop.permute.xlu0 %642 }
0x1380   :  { %v645_v51 = vmul.f32 %v643_v50, %v623_v25  ;;  %v1254_v25 = vld [vmem:[#allocation2 + $0x48] sm:$0xff] }
0x1381   :  { %1286 = vmatpush.msra.mxu0 %v1254_v25 }
0x1382   :  { %v654_v52 = vsel %vm650_vm4, %v3114_v39, %v645_v51 }
0x1383   :  { %669 = vrot.lane.b32.xlu2 %v654_v52, %s2919_s12  ;;  %1287 = vmatpush.msra.mxu0 %v1253_v26 }
0x13d4   :  { %v961_v55 = vpop.permute.xlu2 %960 }
0x13d5   :  { %v963_v56 = vadd.f32 %v961_v55, %v953_v54 }
0x13d7   :  { %2673 = vtanh.f32 %v963_v56  ;;  %v1018_v30 = vrot.slane %v963_v56, 6 }
0x13dd   :  { %v2674_v57 = vpop.eup %2673  ;;  %v670_v58 = vpop.permute.xlu2 %669 }
0x13de   :  { %966 = vrot.lane.b32.xlu1 %v2674_v57, %s2918_s11  ;;  %2513 = vmatmul.msk.f32.gmra.mxu2 %vm66_vm0, %v670_v58 }
0x1450   :  { %v967_v59 = vpop.permute.xlu1 %966 }
0x1451   :  { %v969_v60 = vmul.f32 %v967_v59, %v947_v38 }
0x1453   :  { %v971_v61 = vrot.slane %v969_v60, 6  ;;  %v1248_v39 = vsel %vm650_vm4, %v3140_v16, %v969_v60 }
0x1455   :  { %972 = vrot.lane.b32.xlu0 %v971_v61, %s2919_s12 }
0x1461   :  { %v695_v63 = vpop.f32.mrf.mxu2 }
0x1462   :  { %v3161_v0 = vadd.f32 %v3063_v36, %v695_v63 }
0x14c7   :  { %v973_v62 = vpop.permute.xlu0 %972 }
0x14c8   :  { %2521 = vmatmul.msk.f32.vlgmr.msrb.gmra.mxu0 %vm66_vm0, %v973_v62 }
0x14c9   :  { %1721 = vmatpush.msrb.mxu0 %v3176_v41 }
0x14cb   :  { %1722 = vmatpush.msrb.mxu0 %v3178_v42 }
0x14cd   :  { %1723 = vmatpush.msrb.mxu0 %v3182_v33 }
0x14cf   :  { %1724 = vmatpush.msrb.mxu0 %v3188_v27 }
0x1545   :  { %v993_v2 = vpop.f32.mrf.mxu0 }
0x1546   :  { %v996_v1 = vadd.f32 %v993_v2, %v3161_v0 }
0x1548   :  { %2675 = vtanh.f32 %v996_v1  ;;  %v2522_v4 = vmul.f32 -1.442695, %v996_v1 }
0x154a   :  { %2677 = vpow2.f32 %v2522_v4 }
0x154e   :  { %v2676_v3 = vpop.eup %2675 }
0x154f   :  { %1022 = vrot.lane.b32.xlu1 %v2676_v3, %s2918_s11 }
0x1550   :  { %v2678_v5 = vpop.eup %2677 }
0x1551   :  { %v1000_v6 = vadd.f32 1.0, %v2678_v5 }
0x1553   :  { %2679 = vrcp.f32 %v1000_v6  ;;  %v1012_v36 = vand.u32 2147483648, %v1000_v6  ;;  %vm1006_vm1 = vweird.f32 %v1000_v6  ;;  %v1010_v15 = vand.u32 2147483647, %v1000_v6 }
0x1555   :  { %v1013_v16 = vor.u32 1.1754944e-38, %v1012_v36  ;;  %vm1011_vm3 = vcmp.eq.f32.partialorder %v1010_v15, 8.507059e+37 }
0x1559   :  { %v2680_v7 = vpop.eup %2679 }
0x155a   :  { %v1002_v8 = vmul.f32 %v2680_v7, %v1000_v6  ;;  %vm1007_vm15 = vweird.f32 %v2680_v7 }
0x155b   :  { %vm1008_vm2 = vmor %vm1006_vm1, %vm1007_vm15 }
0x155c   :  { %v1003_v11 = vsub.f32 1.0, %v1002_v8 }
0x155e   :  { %v1004_v12 = vmul.f32 %v2680_v7, %v1003_v11 }
0x1560   :  { %v1005_v14 = vadd.f32 %v2680_v7, %v1004_v12 }
0x1562   :  { %v1009_v10 = vsel %vm1008_vm2, %v2680_v7, %v1005_v14 }
0x1563   :  { %v1014_v18 = vsel %vm1011_vm3, %v1013_v16, %v1009_v10 }
0x1564   :  { %v1020_v28 = vmul.f32 %v1018_v30, %v1014_v18 }
0x15c1   :  { %v1023_v17 = vpop.permute.xlu1 %1022 }
0x15c2   :  { %v1025_v21 = vmul.f32 %v1023_v17, %v1014_v18 }
0x15c4   :  { %1027 = vrot.lane.b32.xlu2 %v1025_v21, %s2919_s12 }
0x15cc   :  { %1264 = vrot.lane.b32.xlu2 %v1248_v39, %s2919_s12 }
0x161e   :  { %v1028_v29 = vpop.permute.xlu2 %1027 }
0x161f   :  { %v3167_v20 = vadd.f32 %v1028_v29, %v1020_v28 }
0x1621   :  { %2681 = vtanh.f32 %v3167_v20  ;;  %v1087_v10 = vrot.slane %v3167_v20, 6 }
0x1626   :  { %v1265_v31 = vpop.permute.xlu2 %1264 }
0x1627   :  { %v2682_v32 = vpop.eup %2681  ;;  %2530 = vmatmul.msk.f32.vlgmr.msra.gmra.mxu0 %vm66_vm0, %v1265_v31 }
0x1628   :  { %1033 = vrot.lane.b32.xlu0 %v2682_v32, %s2918_s11 }
0x169a   :  { %v1034_v24 = vpop.permute.xlu0 %1033 }
0x169b   :  { %v3172_v40 = vmul.f32 %v1034_v24, %v1014_v18 }
0x169d   :  { %1038 = vrot.lane.b32.xlu1 %v3172_v40, %s2919_s12 }
0x16a4   :  { %v1289_v47 = vpop.f32.mrf.mxu0 }
0x16a5   :  { %v3217_v48 = vadd.f32 %v3213_v46, %v1289_v47 }
0x170f   :  { %v1039_v43 = vpop.permute.xlu1 %1038 }
0x1710   :  { %2523 = vmatmul.msk.f32.vlgmr.msra.gmra.mxu1 %vm66_vm0, %v1039_v43 }
0x1711   :  { %1515 = vmatpush.msra.mxu1 %v3176_v41 }
0x1713   :  { %1516 = vmatpush.msra.mxu1 %v3178_v42 }
0x1715   :  { %1517 = vmatpush.msra.mxu1 %v3182_v33 }
0x1717   :  { %1518 = vmatpush.msra.mxu1 %v3188_v27 }
0x1718   :  { %1316 = vmatmul.f32.vlgmr.msrb.gmra.mxu1 %v2917_v9 }
0x1719   :  { %1791 = vmatpush.msrb.mxu1 %v3176_v41 }
0x171b   :  { %1792 = vmatpush.msrb.mxu1 %v3178_v42 }
0x171d   :  { %1793 = vmatpush.msrb.mxu1 %v3182_v33 }
0x171f   :  { %1794 = vmatpush.msrb.mxu1 %v3188_v27 }
0x178d   :  { %v1059_v45 = vpop.f32.mrf.mxu1 }
0x178e   :  { %v1063_v44 = vrot.slane %v1059_v45, 6 }
0x1790   :  { %v1065_v19 = vadd.f32 %v1063_v44, %v3161_v0 }
0x1792   :  { %2683 = vtanh.f32 %v1065_v19  ;;  %v2524_v38 = vmul.f32 -1.442695, %v1065_v19 }
0x1795   :  { %v1317_v34 = vpop.f32.mrf.mxu1 }
0x1796   :  { %v1320_v35 = vadd.f32 %v1317_v34, %v3217_v48 }
0x1798   :  { %v2684_v37 = vpop.eup %2683  ;;  %2685 = vtanh.f32 %v1320_v35  ;;  %v2532_v49 = vmul.f32 -1.442695, %v1320_v35 }
0x1799   :  { %1091 = vrot.lane.b32.xlu0 %v2684_v37, %s2918_s11  ;;  %2687 = vpow2.f32 %v2524_v38 }
0x179a   :  { %2689 = vpow2.f32 %v2532_v49 }
0x179e   :  { %v2686_v13 = vpop.eup %2685 }
0x179f   :  { %1343 = vrot.lane.b32.xlu1 %v2686_v13, %s2918_s11  ;;  %v2688_v50 = vpop.eup %2687 }
0x17a0   :  { %v1069_v51 = vadd.f32 1.0, %v2688_v50  ;;  %v2690_v52 = vpop.eup %2689 }
0x17a1   :  { %v1324_v53 = vadd.f32 1.0, %v2690_v52 }
0x17a2   :  { %2691 = vrcp.f32 %v1069_v51  ;;  %v1081_v39 = vand.u32 2147483648, %v1069_v51  ;;  %vm1075_vm6 = vweird.f32 %v1069_v51  ;;  %v1079_v62 = vand.u32 2147483647, %v1069_v51 }
0x17a3   :  { %2693 = vrcp.f32 %v1324_v53  ;;  %v1336_v6 = vand.u32 2147483648, %v1324_v53  ;;  %vm1330_vm10 = vweird.f32 %v1324_v53  ;;  %v1334_v8 = vand.u32 2147483647, %v1324_v53 }
0x17a4   :  { %v1082_v1 = vor.u32 1.1754944e-38, %v1081_v39  ;;  %vm1080_vm8 = vcmp.eq.f32.partialorder %v1079_v62, 8.507059e+37 }
0x17a5   :  { %v1337_v12 = vor.u32 1.1754944e-38, %v1336_v6  ;;  %vm1335_vm12 = vcmp.eq.f32.partialorder %v1334_v8, 8.507059e+37 }
0x17a8   :  { %v2692_v54 = vpop.eup %2691 }
0x17a9   :  { %v1071_v55 = vmul.f32 %v2692_v54, %v1069_v51  ;;  %v2694_v56 = vpop.eup %2693  ;;  %vm1076_vm5 = vweird.f32 %v2692_v54 }
0x17aa   :  { %v1326_v58 = vmul.f32 %v2694_v56, %v1324_v53  ;;  %vm1077_vm7 = vmor %vm1075_vm6, %vm1076_vm5  ;;  %vm1331_vm9 = vweird.f32 %v2694_v56 }
0x17ab   :  { %v1072_v57 = vsub.f32 1.0, %v1071_v55  ;;  %vm1332_vm11 = vmor %vm1330_vm10, %vm1331_vm9 }
0x17ac   :  { %v1327_v60 = vsub.f32 1.0, %v1326_v58 }
0x17ad   :  { %v1073_v59 = vmul.f32 %v2692_v54, %v1072_v57 }
0x17ae   :  { %v1328_v63 = vmul.f32 %v2694_v56, %v1327_v60 }
0x17af   :  { %v1074_v61 = vadd.f32 %v2692_v54, %v1073_v59 }
0x17b0   :  { %v1329_v3 = vadd.f32 %v2694_v56, %v1328_v63 }
0x17b1   :  { %v1078_v2 = vsel %vm1077_vm7, %v2692_v54, %v1074_v61 }
0x17b2   :  { %v1083_v5 = vsel %vm1080_vm8, %v1082_v1, %v1078_v2  ;;  %v1333_v11 = vsel %vm1332_vm11, %v2694_v56, %v1329_v3 }
0x17b3   :  { %v1338_v36 = vsel %vm1335_vm12, %v1337_v12, %v1333_v11  ;;  %v1089_v16 = vmul.f32 %v1087_v10, %v1083_v5 }
0x17b4   :  { %v1341_v22 = vmul.f32 0.0, %v1338_v36 }
0x180b   :  { %v1092_v4 = vpop.permute.xlu0 %1091 }
0x180c   :  { %v1094_v7 = vmul.f32 %v1092_v4, %v1083_v5 }
0x180e   :  { %1096 = vrot.lane.b32.xlu2 %v1094_v7, %s2919_s12 }
0x1811   :  { %v1344_v14 = vpop.permute.xlu1 %1343 }
0x1812   :  { %v1346_v15 = vmul.f32 %v1344_v14, %v1338_v36 }
0x1814   :  { %1348 = vrot.lane.b32.xlu0 %v1346_v15, %s2919_s12 }
0x1868   :  { %v1097_v17 = vpop.permute.xlu2 %1096 }
0x1869   :  { %v3225_v18 = vadd.f32 %v1097_v17, %v1089_v16 }
0x186b   :  { %2695 = vtanh.f32 %v3225_v18  ;;  %v1157_v15 = vrot.slane %v3225_v18, 6 }
0x1871   :  { %v2696_v21 = vpop.eup %2695 }
0x1872   :  { %1102 = vrot.lane.b32.xlu1 %v2696_v21, %s2918_s11 }
0x1886   :  { %v1349_v23 = vpop.permute.xlu0 %1348 }
0x1887   :  { %v3229_v25 = vadd.f32 %v1349_v23, %v1341_v22 }
0x1889   :  { %2697 = vtanh.f32 %v3229_v25  ;;  %v1408_v21 = vrot.slane %v3229_v25, 6 }
0x188f   :  { %v2698_v26 = vpop.eup %2697 }
0x1890   :  { %1354 = vrot.lane.b32.xlu2 %v2698_v26, %s2918_s11 }
0x18e4   :  { %v1103_v30 = vpop.permute.xlu1 %1102 }
0x18e5   :  { %v3233_v28 = vmul.f32 %v1103_v30, %v1083_v5 }
0x18e7   :  { %v1107_v29 = vrot.slane %v3233_v28, 2 }
0x18e9   :  { %1108 = vrot.lane.b32.xlu0 %v1107_v29, %s2919_s12 }
0x18ea   :  { %v1355_v20 = vpop.permute.xlu2 %1354 }
0x18eb   :  { %v3237_v31 = vmul.f32 %v1355_v20, %v1338_v36 }
0x18ed   :  { %1359 = vrot.lane.b32.xlu1 %v3237_v31, %s2919_s12 }
0x195b   :  { %v1109_v32 = vpop.permute.xlu0 %1108 }
0x195c   :  { %2525 = vmatmul.msk.f32.vlgmr.msrb.gmra.mxu2 %vm66_vm0, %v1109_v32  ;;  %v1249_v32 = vsel %vm646_vm13, %v3172_v40, %v3233_v28 }
0x195d   :  { %1585 = vmatpush.msrb.mxu2 %v3176_v41 }
0x195f   :  { %1586 = vmatpush.msrb.mxu2 %v3178_v42  ;;  %v1360_v24 = vpop.permute.xlu1 %1359 }
0x1961   :  { %1587 = vmatpush.msrb.mxu2 %v3182_v33 }
0x1963   :  { %1588 = vmatpush.msrb.mxu2 %v3188_v27 }
0x1964   :  { %2533 = vmatmul.msk.f32.vlgmr.msra.gmra.mxu2 %vm66_vm0, %v1360_v24 }
0x19df   :  { %v1129_v43 = vpop.f32.mrf.mxu2 }
0x19e0   :  { %v1133_v45 = vrot.slane %v1129_v43, 4 }
0x19e2   :  { %v1135_v44 = vadd.f32 %v1133_v45, %v3161_v0 }
0x19e4   :  { %2699 = vtanh.f32 %v1135_v44  ;;  %v2526_v13 = vmul.f32 -1.442695, %v1135_v44 }
0x19e7   :  { %v1380_v19 = vpop.f32.mrf.mxu2 }
0x19e8   :  { %v1384_v47 = vrot.slane %v1380_v19, 6 }
0x19ea   :  { %v2700_v34 = vpop.eup %2699  ;;  %v1386_v35 = vadd.f32 %v1384_v47, %v3217_v48 }
0x19eb   :  { %1161 = vrot.lane.b32.xlu2 %v2700_v34, %s2918_s11 }
0x19ec   :  { %2701 = vtanh.f32 %v1386_v35  ;;  %v2534_v53 = vmul.f32 -1.442695, %v1386_v35 }
0x19ed   :  { %2703 = vpow2.f32 %v2526_v13 }
0x19f2   :  { %v2702_v37 = vpop.eup %2701 }
0x19f3   :  { %1412 = vrot.lane.b32.xlu0 %v2702_v37, %s2918_s11  ;;  %v2704_v38 = vpop.eup %2703 }
0x19f4   :  { %v1139_v49 = vadd.f32 1.0, %v2704_v38 }
0x19f6   :  { %2705 = vrcp.f32 %v1139_v49  ;;  %v1151_v56 = vand.u32 2147483648, %v1139_v49  ;;  %vm1145_vm1 = vweird.f32 %v1139_v49  ;;  %v1149_v57 = vand.u32 2147483647, %v1139_v49 }
0x19f7   :  { %2707 = vpow2.f32 %v2534_v53 }
0x19f8   :  { %v1152_v60 = vor.u32 1.1754944e-38, %v1151_v56  ;;  %vm1150_vm3 = vcmp.eq.f32.partialorder %v1149_v57, 8.507059e+37 }
0x19fc   :  { %v2706_v50 = vpop.eup %2705 }
0x19fd   :  { %v1141_v51 = vmul.f32 %v2706_v50, %v1139_v49  ;;  %vm1146_vm15 = vweird.f32 %v2706_v50  ;;  %v2708_v58 = vpop.eup %2707 }
0x19fe   :  { %vm1147_vm2 = vmor %vm1145_vm1, %vm1146_vm15  ;;  %v1390_v61 = vadd.f32 1.0, %v2708_v58 }
0x19ff   :  { %v1142_v52 = vsub.f32 1.0, %v1141_v51 }
0x1a00   :  { %2709 = vrcp.f32 %v1390_v61  ;;  %v1402_v6 = vand.u32 2147483648, %v1390_v61  ;;  %vm1396_vm6 = vweird.f32 %v1390_v61  ;;  %v1400_v7 = vand.u32 2147483647, %v1390_v61 }
0x1a01   :  { %v1143_v54 = vmul.f32 %v2706_v50, %v1142_v52 }
0x1a02   :  { %v1403_v11 = vor.u32 1.1754944e-38, %v1402_v6  ;;  %vm1401_vm8 = vcmp.eq.f32.partialorder %v1400_v7, 8.507059e+37 }
0x1a03   :  { %v1144_v55 = vadd.f32 %v2706_v50, %v1143_v54 }
0x1a05   :  { %v1148_v59 = vsel %vm1147_vm2, %v2706_v50, %v1144_v55 }
0x1a06   :  { %v1153_v62 = vsel %vm1150_vm3, %v1152_v60, %v1148_v59  ;;  %v2710_v2 = vpop.eup %2709 }
0x1a07   :  { %v1392_v1 = vmul.f32 %v2710_v2, %v1390_v61  ;;  %vm1397_vm5 = vweird.f32 %v2710_v2  ;;  %v1159_v10 = vmul.f32 %v1157_v15, %v1153_v62 }
0x1a08   :  { %vm1398_vm7 = vmor %vm1396_vm6, %vm1397_vm5 }
0x1a09   :  { %v1393_v3 = vsub.f32 1.0, %v1392_v1 }
0x1a0b   :  { %v1394_v4 = vmul.f32 %v2710_v2, %v1393_v3 }
0x1a0d   :  { %v1395_v5 = vadd.f32 %v2710_v2, %v1394_v4 }
0x1a0f   :  { %v1399_v8 = vsel %vm1398_vm7, %v2710_v2, %v1395_v5 }
0x1a10   :  { %v1404_v14 = vsel %vm1401_vm8, %v1403_v11, %v1399_v8 }
0x1a11   :  { %v1410_v22 = vmul.f32 %v1408_v21, %v1404_v14 }
0x1a45   :  { %v1162_v39 = vpop.permute.xlu2 %1161 }
0x1a46   :  { %v1164_v63 = vmul.f32 %v1162_v39, %v1153_v62 }
0x1a48   :  { %1166 = vrot.lane.b32.xlu1 %v1164_v63, %s2919_s12 }
0x1a65   :  { %v1413_v12 = vpop.permute.xlu0 %1412 }
0x1a66   :  { %v1415_v36 = vmul.f32 %v1413_v12, %v1404_v14 }
0x1a68   :  { %1417 = vrot.lane.b32.xlu2 %v1415_v36, %s2919_s12 }
0x1aba   :  { %v1167_v16 = vpop.permute.xlu1 %1166 }
0x1abb   :  { %v3254_v17 = vadd.f32 %v1167_v16, %v1159_v10 }
0x1abd   :  { %2711 = vtanh.f32 %v3254_v17 }
0x1ac2   :  { %v1418_v23 = vpop.permute.xlu2 %1417 }
0x1ac3   :  { %v2712_v26 = vpop.eup %2711  ;;  %v1420_v30 = vadd.f32 %v1418_v23, %v1410_v22 }
0x1ac4   :  { %1172 = vrot.lane.b32.xlu0 %v2712_v26, %s2918_s11 }
0x1ac5   :  { %2713 = vtanh.f32 %v1420_v30  ;;  %v1478_v58 = vrot.slane %v1420_v30, 6 }
0x1acb   :  { %v2714_v29 = vpop.eup %2713 }
0x1acc   :  { %1423 = vrot.lane.b32.xlu1 %v2714_v29, %s2918_s11 }
0x1b36   :  { %v1173_v20 = vpop.permute.xlu0 %1172 }
0x1b37   :  { %v1175_v18 = vmul.f32 %v1173_v20, %v1153_v62 }
0x1b39   :  { %v1177_v24 = vrot.slane %v1175_v18, 4  ;;  %v3264_v43 = vsel %vm648_vm14, %v1249_v32, %v1175_v18 }
0x1b3b   :  { %1178 = vrot.lane.b32.xlu2 %v1177_v24, %s2919_s12 }
0x1b3e   :  { %v1424_v25 = vpop.permute.xlu1 %1423 }
0x1b3f   :  { %v1426_v45 = vmul.f32 %v1424_v25, %v1404_v14 }
0x1b41   :  { %v1428_v44 = vrot.slane %v1426_v45, 2  ;;  %v1843_v4 = vsel %vm646_vm13, %v3237_v31, %v1426_v45 }
0x1b43   :  { %1429 = vrot.lane.b32.xlu0 %v1428_v44, %s2919_s12 }
0x1b95   :  { %v1179_v19 = vpop.permute.xlu2 %1178 }
0x1b96   :  { %2527 = vmatmul.msk.f32.vlgmr.msra.gmra.mxu3 %vm66_vm0, %v1179_v19 }
0x1b97   :  { %1651 = vmatpush.msra.mxu3 %v3176_v41 }
0x1b99   :  { %1652 = vmatpush.msra.mxu3 %v3178_v42 }
0x1b9b   :  { %1653 = vmatpush.msra.mxu3 %v3182_v33 }
0x1b9d   :  { %1654 = vmatpush.msra.mxu3 %v3188_v27 }
0x1bb5   :  { %v1430_v40 = vpop.permute.xlu0 %1429 }
0x1bb6   :  { %2535 = vmatmul.msk.f32.vlgmr.msrb.gmra.mxu3 %vm66_vm0, %v1430_v40 }
0x1c19   :  { %v1199_v28 = vpop.f32.mrf.mxu3 }
0x1c1a   :  { %v1203_v39 = vrot.slane %v1199_v28, 2 }
0x1c1c   :  { %v1205_v62 = vadd.f32 %v1203_v39, %v3161_v0 }
0x1c1e   :  { %v2528_v0 = vmul.f32 -1.442695, %v1205_v62 }
0x1c39   :  { %v1450_v47 = vpop.f32.mrf.mxu3 }
0x1c3a   :  { %v1454_v34 = vrot.slane %v1450_v47, 4 }
0x1c3c   :  { %v1456_v35 = vadd.f32 %v1454_v34, %v3217_v48 }
0x1c3e   :  { %2715 = vtanh.f32 %v1456_v35  ;;  %v2536_v13 = vmul.f32 -1.442695, %v1456_v35 }
0x1c40   :  { %2717 = vpow2.f32 %v2536_v13 }
0x1c44   :  { %v2716_v37 = vpop.eup %2715 }
0x1c45   :  { %1482 = vrot.lane.b32.xlu1 %v2716_v37, %s2918_s11 }
0x1c46   :  { %v2718_v41 = vpop.eup %2717 }
0x1c47   :  { %v1460_v42 = vadd.f32 1.0, %v2718_v41 }
0x1c49   :  { %2719 = vrcp.f32 %v1460_v42  ;;  %v1472_v51 = vand.u32 2147483648, %v1460_v42  ;;  %vm1466_vm10 = vweird.f32 %v1460_v42  ;;  %v1470_v52 = vand.u32 2147483647, %v1460_v42 }
0x1c4b   :  { %v1473_v54 = vor.u32 1.1754944e-38, %v1472_v51  ;;  %vm1471_vm12 = vcmp.eq.f32.partialorder %v1470_v52, 8.507059e+37 }
0x1c4f   :  { %v2720_v33 = vpop.eup %2719 }
0x1c50   :  { %v1462_v38 = vmul.f32 %v2720_v33, %v1460_v42  ;;  %vm1467_vm9 = vweird.f32 %v2720_v33 }
0x1c51   :  { %vm1468_vm11 = vmor %vm1466_vm10, %vm1467_vm9 }
0x1c52   :  { %v1463_v27 = vsub.f32 1.0, %v1462_v38 }
0x1c54   :  { %v1464_v49 = vmul.f32 %v2720_v33, %v1463_v27 }
0x1c56   :  { %v1465_v50 = vadd.f32 %v2720_v33, %v1464_v49 }
0x1c58   :  { %v1469_v53 = vsel %vm1468_vm11, %v2720_v33, %v1465_v50  ;;  %v1227_v33 = vrot.slane %v3254_v17, 6 }
0x1c59   :  { %v1474_v56 = vsel %vm1471_vm12, %v1473_v54, %v1469_v53 }
0x1c5a   :  { %v1480_v59 = vmul.f32 %v1478_v58, %v1474_v56 }
0x1cb7   :  { %v1483_v55 = vpop.permute.xlu1 %1482 }
0x1cb8   :  { %v1485_v57 = vmul.f32 %v1483_v55, %v1474_v56 }
0x1cba   :  { %1487 = vrot.lane.b32.xlu2 %v1485_v57, %s2919_s12 }
0x1d14   :  { %v1488_v60 = vpop.permute.xlu2 %1487 }
0x1d15   :  { %v3277_v61 = vadd.f32 %v1488_v60, %v1480_v59 }
0x1d17   :  { %2721 = vtanh.f32 %v3277_v61  ;;  %v1548_v51 = vrot.slane %v3277_v61, 6 }
0x1d18   :  { %2723 = vtanh.f32 %v1205_v62 }
0x1d19   :  { %2725 = vpow2.f32 %v2528_v0 }
0x1d1d   :  { %v2722_v63 = vpop.eup %2721 }
0x1d1e   :  { %1493 = vrot.lane.b32.xlu0 %v2722_v63, %s2918_s11  ;;  %v2724_v2 = vpop.eup %2723 }
0x1d1f   :  { %v2726_v8 = vpop.eup %2725 }
0x1d20   :  { %v1209_v11 = vadd.f32 1.0, %v2726_v8 }
0x1d22   :  { %2727 = vrcp.f32 %v1209_v11  ;;  %v1221_v23 = vand.u32 2147483648, %v1209_v11  ;;  %vm1215_vm1 = vweird.f32 %v1209_v11  ;;  %v1219_v26 = vand.u32 2147483647, %v1209_v11 }
0x1d24   :  { %v1222_v29 = vor.u32 1.1754944e-38, %v1221_v23  ;;  %vm1220_vm3 = vcmp.eq.f32.partialorder %v1219_v26, 8.507059e+37  ;;  %v1851_v23 = vld [vmem:[#allocation2 + $0x68] sm:$0xff]  ;;  %v1850_v26 = vld [vmem:[#allocation2 + $0x60] sm:$0xff] }
0x1d26   :  { %1231 = vrot.lane.b32.xlu0 %v2724_v2, %s2918_s11 }
0x1d28   :  { %v2728_v12 = vpop.eup %2727 }
0x1d29   :  { %v1211_v14 = vmul.f32 %v2728_v12, %v1209_v11  ;;  %vm1216_vm15 = vweird.f32 %v2728_v12 }
0x1d2a   :  { %vm1217_vm2 = vmor %vm1215_vm1, %vm1216_vm15 }
0x1d2b   :  { %v1212_v10 = vsub.f32 1.0, %v1211_v14 }
0x1d2d   :  { %v1213_v16 = vmul.f32 %v2728_v12, %v1212_v10 }
0x1d2f   :  { %v1214_v21 = vadd.f32 %v2728_v12, %v1213_v16 }
0x1d31   :  { %v1218_v30 = vsel %vm1217_vm2, %v2728_v12, %v1214_v21  ;;  %v1853_v21 = vld [vmem:[#allocation2 + $0x78] sm:$0xff] }
0x1d32   :  { %v1223_v18 = vsel %vm1220_vm3, %v1222_v29, %v1218_v30  ;;  %1881 = vmatpush.msra.mxu2 %v1853_v21 }
0x1d33   :  { %v1229_v38 = vmul.f32 %v1227_v33, %v1223_v18 }
0x1d90   :  { %v1494_v1 = vpop.permute.xlu0 %1493 }
0x1d91   :  { %v1496_v3 = vmul.f32 %v1494_v1, %v1474_v56 }
0x1d93   :  { %v1498_v5 = vrot.slane %v1496_v3, 4  ;;  %v3286_v6 = vsel %vm648_vm14, %v1843_v4, %v1496_v3 }
0x1d95   :  { %1499 = vrot.lane.b32.xlu1 %v1498_v5, %s2919_s12 }
0x1d98   :  { %v1232_v20 = vpop.permute.xlu0 %1231 }
0x1d99   :  { %v1234_v32 = vmul.f32 %v1232_v20, %v1223_v18 }
0x1e07   :  { %v1500_v7 = vpop.permute.xlu1 %1499 }
0x1e08   :  { %2537 = vmatmul.msk.f32.vlgmr.msra.gmra.mxu1 %vm66_vm0, %v1500_v7 }
0x1e85   :  { %v1520_v36 = vpop.f32.mrf.mxu1 }
0x1e86   :  { %v1524_v15 = vrot.slane %v1520_v36, 2 }
0x1e88   :  { %v1526_v31 = vadd.f32 %v1524_v15, %v3217_v48 }
0x1e8a   :  { %2729 = vtanh.f32 %v1526_v31  ;;  %v2538_v48 = vmul.f32 -1.442695, %v1526_v31 }
0x1e8c   :  { %2731 = vpow2.f32 %v2538_v48 }
0x1e90   :  { %v2730_v22 = vpop.eup %2729 }
0x1e91   :  { %1552 = vrot.lane.b32.xlu2 %v2730_v22, %s2918_s11  ;;  %v1852_v22 = vld [vmem:[#allocation2 + $0x70] sm:$0xff] }
0x1e92   :  { %v2732_v24 = vpop.eup %2731  ;;  %1882 = vmatpush.msra.mxu2 %v1852_v22 }
0x1e93   :  { %v1530_v25 = vadd.f32 1.0, %v2732_v24 }
0x1e94   :  { %1883 = vmatpush.msra.mxu2 %v1851_v23 }
0x1e95   :  { %2733 = vrcp.f32 %v1530_v25  ;;  %v1542_v47 = vand.u32 2147483648, %v1530_v25  ;;  %vm1536_vm6 = vweird.f32 %v1530_v25  ;;  %v1540_v34 = vand.u32 2147483647, %v1530_v25 }
0x1e96   :  { %1884 = vmatpush.msra.mxu2 %v1850_v26 }
0x1e97   :  { %v1543_v37 = vor.u32 1.1754944e-38, %v1542_v47  ;;  %vm1541_vm8 = vcmp.eq.f32.partialorder %v1540_v34, 8.507059e+37 }
0x1e99   :  { %1236 = vrot.lane.b32.xlu2 %v1234_v32, %s2919_s12 }
0x1e9b   :  { %v2734_v45 = vpop.eup %2733 }
0x1e9c   :  { %v1532_v44 = vmul.f32 %v2734_v45, %v1530_v25  ;;  %vm1537_vm5 = vweird.f32 %v2734_v45 }
0x1e9d   :  { %vm1538_vm7 = vmor %vm1536_vm6, %vm1537_vm5 }
0x1e9e   :  { %v1533_v19 = vsub.f32 1.0, %v1532_v44  ;;  %v3324_v44 = vld [vmem:[#allocation5 + $0x70] sm:$0xff] }
0x1ea0   :  { %v1534_v40 = vmul.f32 %v2734_v45, %v1533_v19  ;;  %v3328_v19 = vld [vmem:[#allocation5 + $0x68] sm:$0xff] }
0x1ea2   :  { %v1535_v28 = vadd.f32 %v2734_v45, %v1534_v40  ;;  %v3334_v40 = vld [vmem:[#allocation5 + $0x60] sm:$0xff] }
0x1ea4   :  { %v1539_v35 = vsel %vm1538_vm7, %v2734_v45, %v1535_v28  ;;  %v3322_v45 = vld [vmem:[#allocation5 + $0x78] sm:$0xff] }
0x1ea5   :  { %v1544_v41 = vsel %vm1541_vm8, %v1543_v37, %v1539_v35  ;;  %1909 = vmatpush.msrb.mxu3 %v3322_v45  ;;  %1972 = vmatpush.msra.mxu0 %v3322_v45  ;;  %v3359_v35 = vld [vmem:[%s3490_s3 + $0x3] ss:$0 sm:$0xff] }
0x1ea6   :  { %v1550_v52 = vmul.f32 %v1548_v51, %v1544_v41  ;;  %2042 = vmatpush.msra.mxu1 %v3322_v45 }
0x1ea7   :  { %1910 = vmatpush.msrb.mxu3 %v3324_v44  ;;  %1973 = vmatpush.msra.mxu0 %v3324_v44 }
0x1ea8   :  { %2043 = vmatpush.msra.mxu1 %v3324_v44 }
0x1ea9   :  { %1911 = vmatpush.msrb.mxu3 %v3328_v19  ;;  %1974 = vmatpush.msra.mxu0 %v3328_v19 }
0x1eaa   :  { %2044 = vmatpush.msra.mxu1 %v3328_v19 }
0x1eab   :  { %1912 = vmatpush.msrb.mxu3 %v3334_v40  ;;  %1975 = vmatpush.msra.mxu0 %v3334_v40 }
0x1eac   :  { %2045 = vmatpush.msra.mxu1 %v3334_v40 }
0x1eeb   :  { %v1553_v13 = vpop.permute.xlu2 %1552 }
0x1eec   :  { %v1555_v42 = vmul.f32 %v1553_v13, %v1544_v41 }
0x1eee   :  { %1557 = vrot.lane.b32.xlu1 %v1555_v42, %s2919_s12 }
0x1ef3   :  { %v1237_v27 = vpop.permute.xlu2 %1236 }
0x1ef4   :  { %v1239_v49 = vadd.f32 %v1237_v27, %v1229_v38 }
0x1ef6   :  { %2735 = vtanh.f32 %v1239_v49 }
0x1efc   :  { %v2736_v50 = vpop.eup %2735 }
0x1efd   :  { %1242 = vrot.lane.b32.xlu1 %v2736_v50, %s2918_s11 }
0x1f60   :  { %v1558_v53 = vpop.permute.xlu1 %1557 }
0x1f61   :  { %v1560_v54 = vadd.f32 %v1558_v53, %v1550_v52 }
0x1f63   :  { %2737 = vtanh.f32 %v1560_v54  ;;  %v1615_v30 = vrot.slane %v1560_v54, 6 }
0x1f69   :  { %v2738_v55 = vpop.eup %2737 }
0x1f6a   :  { %1563 = vrot.lane.b32.xlu0 %v2738_v55, %s2918_s11 }
0x1f6f   :  { %v1243_v56 = vpop.permute.xlu1 %1242 }
0x1f70   :  { %v1245_v57 = vmul.f32 %v1243_v56, %v1223_v18 }
0x1f72   :  { %v1251_v17 = vsel %vm650_vm4, %v3264_v43, %v1245_v57 }
0x1f73   :  { %1266 = vrot.lane.b32.xlu0 %v1251_v17, %s2919_s12 }
0x1fdc   :  { %v1564_v58 = vpop.permute.xlu0 %1563 }
0x1fdd   :  { %v1566_v59 = vmul.f32 %v1564_v58, %v1544_v41 }
0x1fdf   :  { %v1568_v60 = vrot.slane %v1566_v59, 6  ;;  %v1845_v61 = vsel %vm650_vm4, %v3286_v6, %v1566_v59 }
0x1fe1   :  { %1569 = vrot.lane.b32.xlu2 %v1568_v60, %s2919_s12 }
0x1fe5   :  { %v1267_v39 = vpop.permute.xlu0 %1266 }
0x1fe6   :  { %2531 = vmatmul.msk.f32.gmra.mxu0 %vm66_vm0, %v1267_v39 }
0x203b   :  { %v1570_v62 = vpop.permute.xlu2 %1569 }
0x203c   :  { %2539 = vmatmul.msk.f32.vlgmr.msrb.gmra.mxu2 %vm66_vm0, %v1570_v62 }
0x203d   :  { %2318 = vmatpush.msrb.mxu2 %v3322_v45 }
0x203f   :  { %2319 = vmatpush.msrb.mxu2 %v3324_v44 }
0x2041   :  { %2320 = vmatpush.msrb.mxu2 %v3328_v19 }
0x2043   :  { %2321 = vmatpush.msrb.mxu2 %v3334_v40 }
0x2063   :  { %v1292_v63 = vpop.f32.mrf.mxu0 }
0x2064   :  { %v3307_v2 = vadd.f32 %v3213_v46, %v1292_v63 }
0x20bf   :  { %v1590_v43 = vpop.f32.mrf.mxu2 }
0x20c0   :  { %v1593_v1 = vadd.f32 %v1590_v43, %v3307_v2 }
0x20c2   :  { %2739 = vtanh.f32 %v1593_v1  ;;  %v2540_v4 = vmul.f32 -1.442695, %v1593_v1 }
0x20c4   :  { %2741 = vpow2.f32 %v2540_v4 }
0x20c8   :  { %v2740_v3 = vpop.eup %2739 }
0x20c9   :  { %1619 = vrot.lane.b32.xlu1 %v2740_v3, %s2918_s11 }
0x20ca   :  { %v2742_v5 = vpop.eup %2741 }
0x20cb   :  { %v1597_v6 = vadd.f32 1.0, %v2742_v5 }
0x20cd   :  { %2743 = vrcp.f32 %v1597_v6  ;;  %v1609_v46 = vand.u32 2147483648, %v1597_v6  ;;  %vm1603_vm10 = vweird.f32 %v1597_v6  ;;  %v1607_v14 = vand.u32 2147483647, %v1597_v6 }
0x20cf   :  { %v1610_v15 = vor.u32 1.1754944e-38, %v1609_v46  ;;  %vm1608_vm12 = vcmp.eq.f32.partialorder %v1607_v14, 8.507059e+37 }
0x20d3   :  { %v2744_v7 = vpop.eup %2743 }
0x20d4   :  { %v1599_v0 = vmul.f32 %v2744_v7, %v1597_v6  ;;  %vm1604_vm9 = vweird.f32 %v2744_v7 }
0x20d5   :  { %vm1605_vm11 = vmor %vm1603_vm10, %vm1604_vm9 }
0x20d6   :  { %v1600_v8 = vsub.f32 1.0, %v1599_v0 }
0x20d8   :  { %v1601_v11 = vmul.f32 %v2744_v7, %v1600_v8 }
0x20da   :  { %v1602_v12 = vadd.f32 %v2744_v7, %v1601_v11 }
0x20dc   :  { %v1606_v36 = vsel %vm1605_vm11, %v2744_v7, %v1602_v12 }
0x20dd   :  { %v1611_v31 = vsel %vm1608_vm12, %v1610_v15, %v1606_v36 }
0x20de   :  { %v1617_v29 = vmul.f32 %v1615_v30, %v1611_v31 }
0x213b   :  { %v1620_v10 = vpop.permute.xlu1 %1619 }
0x213c   :  { %v1622_v16 = vmul.f32 %v1620_v10, %v1611_v31 }
0x213e   :  { %1624 = vrot.lane.b32.xlu2 %v1622_v16, %s2919_s12 }
0x2146   :  { %1861 = vrot.lane.b32.xlu2 %v1845_v61, %s2919_s12 }
0x2198   :  { %v1625_v20 = vpop.permute.xlu2 %1624 }
0x2199   :  { %v3313_v18 = vadd.f32 %v1625_v20, %v1617_v29 }
0x219b   :  { %2745 = vtanh.f32 %v3313_v18  ;;  %v1684_v14 = vrot.slane %v3313_v18, 6 }
0x21a0   :  { %v1862_v32 = vpop.permute.xlu2 %1861 }
0x21a1   :  { %v2746_v48 = vpop.eup %2745  ;;  %2548 = vmatmul.msk.f32.vlgmr.msra.gmra.mxu2 %vm66_vm0, %v1862_v32 }
0x21a2   :  { %1630 = vrot.lane.b32.xlu0 %v2746_v48, %s2918_s11 }
0x2214   :  { %v1631_v24 = vpop.permute.xlu0 %1630 }
0x2215   :  { %v3318_v25 = vmul.f32 %v1631_v24, %v1611_v31 }
0x2217   :  { %1635 = vrot.lane.b32.xlu1 %v3318_v25, %s2919_s12 }
0x2224   :  { %v1886_v13 = vpop.f32.mrf.mxu2 }
0x2289   :  { %v1636_v28 = vpop.permute.xlu1 %1635 }
0x228a   :  { %2541 = vmatmul.msk.f32.vlgmr.msra.gmra.mxu3 %vm66_vm0, %v1636_v28 }
0x228b   :  { %2112 = vmatpush.msra.mxu3 %v3322_v45 }
0x228d   :  { %2113 = vmatpush.msra.mxu3 %v3324_v44 }
0x228f   :  { %2114 = vmatpush.msra.mxu3 %v3328_v19 }
0x2291   :  { %2115 = vmatpush.msra.mxu3 %v3334_v40 }
0x2292   :  { %1913 = vmatmul.f32.vlgmr.msrb.gmra.mxu3 %v2917_v9  ;;  %v3363_v9 = vadd.f32 %v3359_v35, %v1886_v13 }
0x2293   :  { %2388 = vmatpush.msrb.mxu3 %v3322_v45 }
0x2295   :  { %2389 = vmatpush.msrb.mxu3 %v3324_v44 }
0x2297   :  { %2390 = vmatpush.msrb.mxu3 %v3328_v19 }
0x2299   :  { %2391 = vmatpush.msrb.mxu3 %v3334_v40 }
0x230d   :  { %v1656_v47 = vpop.f32.mrf.mxu3 }
0x230e   :  { %v1660_v34 = vrot.slane %v1656_v47, 6 }
0x2310   :  { %v1662_v37 = vadd.f32 %v1660_v34, %v3307_v2 }
0x2312   :  { %2747 = vtanh.f32 %v1662_v37  ;;  %v2542_v27 = vmul.f32 -1.442695, %v1662_v37 }
0x2315   :  { %v1914_v41 = vpop.f32.mrf.mxu3 }
0x2316   :  { %v1917_v42 = vadd.f32 %v1914_v41, %v3363_v9 }
0x2318   :  { %v2748_v33 = vpop.eup %2747  ;;  %2749 = vtanh.f32 %v1917_v42  ;;  %v2550_v49 = vmul.f32 -1.442695, %v1917_v42 }
0x2319   :  { %1688 = vrot.lane.b32.xlu0 %v2748_v33, %s2918_s11  ;;  %2751 = vpow2.f32 %v2542_v27 }
0x231a   :  { %2753 = vpow2.f32 %v2550_v49 }
0x231e   :  { %v2750_v38 = vpop.eup %2749 }
0x231f   :  { %1940 = vrot.lane.b32.xlu1 %v2750_v38, %s2918_s11  ;;  %v2752_v50 = vpop.eup %2751 }
0x2320   :  { %v1666_v51 = vadd.f32 1.0, %v2752_v50  ;;  %v2754_v52 = vpop.eup %2753 }
0x2321   :  { %v1921_v53 = vadd.f32 1.0, %v2754_v52 }
0x2322   :  { %2755 = vrcp.f32 %v1666_v51  ;;  %v1678_v61 = vand.u32 2147483648, %v1666_v51  ;;  %vm1672_vm1 = vweird.f32 %v1666_v51  ;;  %v1676_v39 = vand.u32 2147483647, %v1666_v51 }
0x2323   :  { %2757 = vrcp.f32 %v1921_v53  ;;  %v1933_v5 = vand.u32 2147483648, %v1921_v53  ;;  %vm1927_vm6 = vweird.f32 %v1921_v53  ;;  %v1931_v7 = vand.u32 2147483647, %v1921_v53 }
0x2324   :  { %v1679_v43 = vor.u32 1.1754944e-38, %v1678_v61  ;;  %vm1677_vm3 = vcmp.eq.f32.partialorder %v1676_v39, 8.507059e+37 }
0x2325   :  { %v1934_v8 = vor.u32 1.1754944e-38, %v1933_v5  ;;  %vm1932_vm8 = vcmp.eq.f32.partialorder %v1931_v7, 8.507059e+37 }
0x2328   :  { %v2756_v54 = vpop.eup %2755 }
0x2329   :  { %v1668_v55 = vmul.f32 %v2756_v54, %v1666_v51  ;;  %v2758_v56 = vpop.eup %2757  ;;  %vm1673_vm15 = vweird.f32 %v2756_v54 }
0x232a   :  { %v1923_v17 = vmul.f32 %v2758_v56, %v1921_v53  ;;  %vm1674_vm2 = vmor %vm1672_vm1, %vm1673_vm15  ;;  %vm1928_vm5 = vweird.f32 %v2758_v56 }
0x232b   :  { %v1669_v57 = vsub.f32 1.0, %v1668_v55  ;;  %vm1929_vm7 = vmor %vm1927_vm6, %vm1928_vm5 }
0x232c   :  { %v1924_v59 = vsub.f32 1.0, %v1923_v17 }
0x232d   :  { %v1670_v58 = vmul.f32 %v2756_v54, %v1669_v57 }
0x232e   :  { %v1925_v62 = vmul.f32 %v2758_v56, %v1924_v59 }
0x232f   :  { %v1671_v60 = vadd.f32 %v2756_v54, %v1670_v58 }
0x2330   :  { %v1926_v1 = vadd.f32 %v2758_v56, %v1925_v62 }
0x2331   :  { %v1675_v63 = vsel %vm1674_vm2, %v2756_v54, %v1671_v60 }
0x2332   :  { %v1680_v4 = vsel %vm1677_vm3, %v1679_v43, %v1675_v63  ;;  %v1930_v0 = vsel %vm1929_vm7, %v2758_v56, %v1926_v1 }
0x2333   :  { %v1935_v12 = vsel %vm1932_vm8, %v1934_v8, %v1930_v0  ;;  %v1686_v36 = vmul.f32 %v1684_v14, %v1680_v4 }
0x2334   :  { %v1938_v16 = vmul.f32 0.0, %v1935_v12 }
0x238b   :  { %v1689_v3 = vpop.permute.xlu0 %1688 }
0x238c   :  { %v1691_v6 = vmul.f32 %v1689_v3, %v1680_v4 }
0x238e   :  { %1693 = vrot.lane.b32.xlu2 %v1691_v6, %s2919_s12 }
0x2391   :  { %v1941_v11 = vpop.permute.xlu1 %1940 }
0x2392   :  { %v1943_v46 = vmul.f32 %v1941_v11, %v1935_v12 }
0x2394   :  { %1945 = vrot.lane.b32.xlu0 %v1943_v46, %s2919_s12 }
0x23e8   :  { %v1694_v15 = vpop.permute.xlu2 %1693 }
0x23e9   :  { %v3371_v10 = vadd.f32 %v1694_v15, %v1686_v36 }
0x23eb   :  { %2759 = vtanh.f32 %v3371_v10 }
0x23f1   :  { %v2760_v31 = vpop.eup %2759 }
0x23f2   :  { %1699 = vrot.lane.b32.xlu1 %v2760_v31, %s2918_s11 }
0x2406   :  { %v1946_v21 = vpop.permute.xlu0 %1945 }
0x2407   :  { %v3375_v22 = vadd.f32 %v1946_v21, %v1938_v16 }
0x2409   :  { %2761 = vtanh.f32 %v3375_v22  ;;  %v2005_v15 = vrot.slane %v3375_v22, 6 }
0x240f   :  { %v2762_v23 = vpop.eup %2761 }
0x2410   :  { %1951 = vrot.lane.b32.xlu2 %v2762_v23, %s2918_s11 }
0x2464   :  { %v1700_v26 = vpop.permute.xlu1 %1699 }
0x2465   :  { %v3379_v30 = vmul.f32 %v1700_v26, %v1680_v4 }
0x2467   :  { %v1704_v29 = vrot.slane %v3379_v30, 2 }
0x2469   :  { %1705 = vrot.lane.b32.xlu0 %v1704_v29, %s2919_s12 }
0x246a   :  { %v1952_v20 = vpop.permute.xlu2 %1951 }
0x246b   :  { %v1954_v18 = vmul.f32 %v1952_v20, %v1935_v12  ;;  %v1754_v12 = vrot.slane %v3371_v10, 6  ;;  %v1846_v20 = vsel %vm646_vm13, %v3318_v25, %v3379_v30 }
0x246d   :  { %1956 = vrot.lane.b32.xlu1 %v1954_v18, %s2919_s12 }
0x24db   :  { %v1706_v32 = vpop.permute.xlu0 %1705 }
0x24dc   :  { %2543 = vmatmul.msk.f32.vlgmr.msrb.gmra.mxu0 %vm66_vm0, %v1706_v32 }
0x24dd   :  { %2182 = vmatpush.msrb.mxu0 %v3322_v45 }
0x24df   :  { %2183 = vmatpush.msrb.mxu0 %v3324_v44  ;;  %v1957_v48 = vpop.permute.xlu1 %1956 }
0x24e1   :  { %2184 = vmatpush.msrb.mxu0 %v3328_v19 }
0x24e3   :  { %2185 = vmatpush.msrb.mxu0 %v3334_v40 }
0x24e4   :  { %2551 = vmatmul.msk.f32.vlgmr.msra.gmra.mxu0 %vm66_vm0, %v1957_v48 }
0x2559   :  { %v1726_v24 = vpop.f32.mrf.mxu0 }
0x255a   :  { %v1730_v28 = vrot.slane %v1726_v24, 4 }
0x255c   :  { %v1732_v47 = vadd.f32 %v1730_v28, %v3307_v2 }
0x255e   :  { %2763 = vtanh.f32 %v1732_v47  ;;  %v2544_v33 = vmul.f32 -1.442695, %v1732_v47 }
0x2561   :  { %v1977_v34 = vpop.f32.mrf.mxu0 }
0x2562   :  { %v1981_v37 = vrot.slane %v1977_v34, 6 }
0x2564   :  { %v2764_v13 = vpop.eup %2763  ;;  %v1983_v41 = vadd.f32 %v1981_v37, %v3363_v9 }
0x2565   :  { %1758 = vrot.lane.b32.xlu2 %v2764_v13, %s2918_s11 }
0x2566   :  { %2765 = vtanh.f32 %v1983_v41  ;;  %v2552_v52 = vmul.f32 -1.442695, %v1983_v41 }
0x2567   :  { %2767 = vpow2.f32 %v2544_v33 }
0x256c   :  { %v2766_v42 = vpop.eup %2765 }
0x256d   :  { %2009 = vrot.lane.b32.xlu0 %v2766_v42, %s2918_s11  ;;  %v2768_v38 = vpop.eup %2767 }
0x256e   :  { %v1736_v27 = vadd.f32 1.0, %v2768_v38 }
0x2570   :  { %2769 = vrcp.f32 %v1736_v27  ;;  %v1748_v55 = vand.u32 2147483648, %v1736_v27  ;;  %vm1742_vm10 = vweird.f32 %v1736_v27  ;;  %v1746_v56 = vand.u32 2147483647, %v1736_v27 }
0x2571   :  { %2771 = vpow2.f32 %v2552_v52 }
0x2572   :  { %v1749_v58 = vor.u32 1.1754944e-38, %v1748_v55  ;;  %vm1747_vm12 = vcmp.eq.f32.partialorder %v1746_v56, 8.507059e+37 }
0x2576   :  { %v2770_v49 = vpop.eup %2769 }
0x2577   :  { %v1738_v50 = vmul.f32 %v2770_v49, %v1736_v27  ;;  %vm1743_vm9 = vweird.f32 %v2770_v49  ;;  %v2772_v57 = vpop.eup %2771 }
0x2578   :  { %vm1744_vm11 = vmor %vm1742_vm10, %vm1743_vm9  ;;  %v1987_v59 = vadd.f32 1.0, %v2772_v57 }
0x2579   :  { %v1739_v51 = vsub.f32 1.0, %v1738_v50 }
0x257a   :  { %2773 = vrcp.f32 %v1987_v59  ;;  %v1999_v4 = vand.u32 2147483648, %v1987_v59  ;;  %vm1993_vm1 = vweird.f32 %v1987_v59  ;;  %v1997_v5 = vand.u32 2147483647, %v1987_v59 }
0x257b   :  { %v1740_v53 = vmul.f32 %v2770_v49, %v1739_v51 }
0x257c   :  { %v2000_v7 = vor.u32 1.1754944e-38, %v1999_v4  ;;  %vm1998_vm3 = vcmp.eq.f32.partialorder %v1997_v5, 8.507059e+37 }
0x257d   :  { %v1741_v54 = vadd.f32 %v2770_v49, %v1740_v53 }
0x257f   :  { %v1745_v17 = vsel %vm1744_vm11, %v2770_v49, %v1741_v54 }
0x2580   :  { %v1750_v61 = vsel %vm1747_vm12, %v1749_v58, %v1745_v17  ;;  %v2774_v62 = vpop.eup %2773 }
0x2581   :  { %v1989_v63 = vmul.f32 %v2774_v62, %v1987_v59  ;;  %vm1994_vm15 = vweird.f32 %v2774_v62  ;;  %v1756_v46 = vmul.f32 %v1754_v12, %v1750_v61 }
0x2582   :  { %vm1995_vm2 = vmor %vm1993_vm1, %vm1994_vm15 }
0x2583   :  { %v1990_v43 = vsub.f32 1.0, %v1989_v63 }
0x2585   :  { %v1991_v1 = vmul.f32 %v2774_v62, %v1990_v43 }
0x2587   :  { %v1992_v3 = vadd.f32 %v2774_v62, %v1991_v1 }
0x2589   :  { %v1996_v6 = vsel %vm1995_vm2, %v2774_v62, %v1992_v3 }
0x258a   :  { %v2001_v8 = vsel %vm1998_vm3, %v2000_v7, %v1996_v6 }
0x258b   :  { %v2007_v31 = vmul.f32 %v2005_v15, %v2001_v8 }
0x25bf   :  { %v1759_v60 = vpop.permute.xlu2 %1758 }
0x25c0   :  { %v1761_v39 = vmul.f32 %v1759_v60, %v1750_v61 }
0x25c2   :  { %1763 = vrot.lane.b32.xlu1 %v1761_v39, %s2919_s12 }
0x25df   :  { %v2010_v0 = vpop.permute.xlu0 %2009 }
0x25e0   :  { %v2012_v11 = vmul.f32 %v2010_v0, %v2001_v8 }
0x25e2   :  { %2014 = vrot.lane.b32.xlu2 %v2012_v11, %s2919_s12 }
0x2634   :  { %v1764_v14 = vpop.permute.xlu1 %1763 }
0x2635   :  { %v3397_v36 = vadd.f32 %v1764_v14, %v1756_v46 }
0x2637   :  { %2775 = vtanh.f32 %v3397_v36 }
0x263c   :  { %v2015_v16 = vpop.permute.xlu2 %2014 }
0x263d   :  { %v2776_v21 = vpop.eup %2775  ;;  %v2017_v23 = vadd.f32 %v2015_v16, %v2007_v31 }
0x263e   :  { %1769 = vrot.lane.b32.xlu0 %v2776_v21, %s2918_s11 }
0x263f   :  { %2777 = vtanh.f32 %v2017_v23  ;;  %v2075_v17 = vrot.slane %v2017_v23, 6 }
0x2645   :  { %v2778_v26 = vpop.eup %2777 }
0x2646   :  { %2020 = vrot.lane.b32.xlu1 %v2778_v26, %s2918_s11  ;;  %v1824_v26 = vrot.slane %v3397_v36, 6 }
0x26b0   :  { %v1770_v29 = vpop.permute.xlu0 %1769 }
0x26b1   :  { %v1772_v10 = vmul.f32 %v1770_v29, %v1750_v61 }
0x26b3   :  { %v1774_v18 = vrot.slane %v1772_v10, 4  ;;  %v3407_v32 = vsel %vm648_vm14, %v1846_v20, %v1772_v10 }
0x26b5   :  { %1775 = vrot.lane.b32.xlu2 %v1774_v18, %s2919_s12 }
0x26b8   :  { %v2021_v22 = vpop.permute.xlu1 %2020 }
0x26b9   :  { %v2023_v48 = vmul.f32 %v2021_v22, %v2001_v8 }
0x26bb   :  { %v2025_v24 = vrot.slane %v2023_v48, 2 }
0x26bd   :  { %2026 = vrot.lane.b32.xlu0 %v2025_v24, %s2919_s12 }
0x270f   :  { %v1776_v28 = vpop.permute.xlu2 %1775 }
0x2710   :  { %2545 = vmatmul.msk.f32.vlgmr.msrb.gmra.mxu1 %vm66_vm0, %v1776_v28 }
0x2711   :  { %2248 = vmatpush.msrb.mxu1 %v3322_v45 }
0x2713   :  { %2249 = vmatpush.msrb.mxu1 %v3324_v44 }
0x2715   :  { %2250 = vmatpush.msrb.mxu1 %v3328_v19 }
0x2717   :  { %2251 = vmatpush.msrb.mxu1 %v3334_v40 }
0x272f   :  { %v2027_v25 = vpop.permute.xlu0 %2026 }
0x2730   :  { %2553 = vmatmul.msk.f32.vlgmr.msra.gmra.mxu1 %vm66_vm0, %v2027_v25 }
0x278d   :  { %v1796_v30 = vpop.f32.mrf.mxu1 }
0x278e   :  { %v1800_v50 = vrot.slane %v1796_v30, 2 }
0x2790   :  { %v1802_v53 = vadd.f32 %v1800_v50, %v3307_v2 }
0x2792   :  { %v2546_v2 = vmul.f32 -1.442695, %v1802_v53 }
0x27ad   :  { %v2047_v47 = vpop.f32.mrf.mxu1 }
0x27ae   :  { %v2051_v34 = vrot.slane %v2047_v47, 4 }
0x27b0   :  { %v2053_v37 = vadd.f32 %v2051_v34, %v3363_v9 }
0x27b2   :  { %2779 = vtanh.f32 %v2053_v37  ;;  %v2554_v41 = vmul.f32 -1.442695, %v2053_v37 }
0x27b4   :  { %2781 = vpow2.f32 %v2554_v41 }
0x27b8   :  { %v2780_v13 = vpop.eup %2779 }
0x27b9   :  { %2079 = vrot.lane.b32.xlu1 %v2780_v13, %s2918_s11 }
0x27ba   :  { %v2782_v45 = vpop.eup %2781 }
0x27bb   :  { %v2057_v44 = vadd.f32 1.0, %v2782_v45 }
0x27bd   :  { %2783 = vrcp.f32 %v2057_v44  ;;  %v2069_v27 = vand.u32 2147483648, %v2057_v44  ;;  %vm2063_vm14 = vweird.f32 %v2057_v44  ;;  %v2067_v49 = vand.u32 2147483647, %v2057_v44 }
0x27be   :  { %2785 = vtanh.f32 %v1802_v53 }
0x27bf   :  { %v2070_v52 = vor.u32 1.1754944e-38, %v2069_v27  ;;  %vm2068_vm6 = vcmp.eq.f32.partialorder %v2067_v49, 8.507059e+37 }
0x27c3   :  { %v2784_v19 = vpop.eup %2783 }
0x27c4   :  { %v2059_v42 = vmul.f32 %v2784_v19, %v2057_v44  ;;  %vm2064_vm13 = vweird.f32 %v2784_v19  ;;  %v2786_v57 = vpop.eup %2785 }
0x27c5   :  { %vm2065_vm5 = vmor %vm2063_vm14, %vm2064_vm13 }
0x27c6   :  { %v2060_v40 = vsub.f32 1.0, %v2059_v42 }
0x27c8   :  { %v2061_v33 = vmul.f32 %v2784_v19, %v2060_v40 }
0x27ca   :  { %v2062_v38 = vadd.f32 %v2784_v19, %v2061_v33 }
0x27cc   :  { %v2066_v51 = vsel %vm2065_vm5, %v2784_v19, %v2062_v38 }
0x27cd   :  { %v2071_v55 = vsel %vm2068_vm6, %v2070_v52, %v2066_v51 }
0x27ce   :  { %v2077_v58 = vmul.f32 %v2075_v17, %v2071_v55 }
0x282b   :  { %v2080_v54 = vpop.permute.xlu1 %2079 }
0x282c   :  { %v2082_v56 = vmul.f32 %v2080_v54, %v2071_v55 }
0x282e   :  { %2084 = vrot.lane.b32.xlu2 %v2082_v56, %s2919_s12 }
0x2836   :  { %1828 = vrot.lane.b32.xlu2 %v2786_v57, %s2918_s11 }
0x2888   :  { %v2085_v59 = vpop.permute.xlu2 %2084 }
0x2889   :  { %v3422_v60 = vadd.f32 %v2085_v59, %v2077_v58 }
0x288b   :  { %2787 = vtanh.f32 %v3422_v60  ;;  %v2145_v38 = vrot.slane %v3422_v60, 6 }
0x288c   :  { %2789 = vpow2.f32 %v2546_v2 }
0x2890   :  { %v1829_v46 = vpop.permute.xlu2 %1828 }
0x2891   :  { %v2788_v61 = vpop.eup %2787 }
0x2892   :  { %2090 = vrot.lane.b32.xlu0 %v2788_v61, %s2918_s11  ;;  %v2790_v39 = vpop.eup %2789 }
0x2893   :  { %v1806_v62 = vadd.f32 1.0, %v2790_v39 }
0x2895   :  { %2791 = vrcp.f32 %v1806_v62  ;;  %v1818_v0 = vand.u32 2147483648, %v1806_v62  ;;  %vm1812_vm8 = vweird.f32 %v1806_v62  ;;  %v1816_v8 = vand.u32 2147483647, %v1806_v62 }
0x2897   :  { %v1819_v12 = vor.u32 1.1754944e-38, %v1818_v0  ;;  %vm1817_vm10 = vcmp.eq.f32.partialorder %v1816_v8, 8.507059e+37 }
0x289b   :  { %v2792_v63 = vpop.eup %2791 }
0x289c   :  { %v1808_v43 = vmul.f32 %v2792_v63, %v1806_v62  ;;  %vm1813_vm7 = vweird.f32 %v2792_v63 }
0x289d   :  { %vm1814_vm9 = vmor %vm1812_vm8, %vm1813_vm7 }
0x289e   :  { %v1809_v1 = vsub.f32 1.0, %v1808_v43 }
0x28a0   :  { %v1810_v3 = vmul.f32 %v2792_v63, %v1809_v1 }
0x28a2   :  { %v1811_v6 = vadd.f32 %v2792_v63, %v1810_v3 }
0x28a4   :  { %v1815_v11 = vsel %vm1814_vm9, %v2792_v63, %v1811_v6 }
0x28a5   :  { %v1820_v14 = vsel %vm1817_vm10, %v1819_v12, %v1815_v11 }
0x28a6   :  { %v1831_v15 = vmul.f32 %v1829_v46, %v1820_v14  ;;  %v1826_v10 = vmul.f32 %v1824_v26, %v1820_v14 }
0x2904   :  { %v2091_v4 = vpop.permute.xlu0 %2090 }
0x2905   :  { %v2093_v5 = vmul.f32 %v2091_v4, %v2071_v55 }
0x2907   :  { %v2095_v7 = vrot.slane %v2093_v5, 4 }
0x2909   :  { %2096 = vrot.lane.b32.xlu1 %v2095_v7, %s2919_s12 }
0x2911   :  { %1833 = vrot.lane.b32.xlu1 %v1831_v15, %s2919_s12 }
0x297b   :  { %v2097_v31 = vpop.permute.xlu1 %2096 }
0x297c   :  { %2555 = vmatmul.msk.f32.vlgmr.msra.gmra.mxu3 %vm66_vm0, %v2097_v31 }
0x2983   :  { %v1834_v29 = vpop.permute.xlu1 %1833 }
0x2984   :  { %v1836_v20 = vadd.f32 %v1834_v29, %v1826_v10 }
0x29ff   :  { %v2117_v16 = vpop.f32.mrf.mxu3 }
0x2a00   :  { %v2121_v21 = vrot.slane %v2117_v16, 2 }
0x2a02   :  { %v2123_v23 = vadd.f32 %v2121_v21, %v3363_v9 }
0x2a04   :  { %2793 = vtanh.f32 %v2123_v23  ;;  %v2556_v48 = vmul.f32 -1.442695, %v2123_v23 }
0x2a05   :  { %2795 = vtanh.f32 %v1836_v20 }
0x2a06   :  { %2797 = vpow2.f32 %v2556_v48 }
0x2a0a   :  { %v2794_v18 = vpop.eup %2793 }
0x2a0b   :  { %2149 = vrot.lane.b32.xlu0 %v2794_v18, %s2918_s11  ;;  %v2796_v22 = vpop.eup %2795 }
0x2a0c   :  { %v2798_v24 = vpop.eup %2797 }
0x2a0d   :  { %v2127_v28 = vadd.f32 1.0, %v2798_v24 }
0x2a0f   :  { %2799 = vrcp.f32 %v2127_v28  ;;  %v2139_v34 = vand.u32 2147483648, %v2127_v28  ;;  %vm2133_vm12 = vweird.f32 %v2127_v28  ;;  %v2137_v37 = vand.u32 2147483647, %v2127_v28 }
0x2a11   :  { %v2140_v41 = vor.u32 1.1754944e-38, %v2139_v34  ;;  %vm2138_vm1 = vcmp.eq.f32.partialorder %v2137_v37, 8.507059e+37 }
0x2a13   :  { %1839 = vrot.lane.b32.xlu0 %v2796_v22, %s2918_s11 }
0x2a15   :  { %v2800_v25 = vpop.eup %2799 }
0x2a16   :  { %v2129_v9 = vmul.f32 %v2800_v25, %v2127_v28  ;;  %vm2134_vm11 = vweird.f32 %v2800_v25 }
0x2a17   :  { %vm2135_vm15 = vmor %vm2133_vm12, %vm2134_vm11 }
0x2a18   :  { %v2130_v30 = vsub.f32 1.0, %v2129_v9 }
0x2a1a   :  { %v2131_v36 = vmul.f32 %v2800_v25, %v2130_v30 }
0x2a1c   :  { %v2132_v47 = vadd.f32 %v2800_v25, %v2131_v36 }
0x2a1e   :  { %v2136_v13 = vsel %vm2135_vm15, %v2800_v25, %v2132_v47 }
0x2a1f   :  { %v2141_v44 = vsel %vm2138_vm1, %v2140_v41, %v2136_v13 }
0x2a20   :  { %v2147_v27 = vmul.f32 %v2145_v38, %v2141_v44 }
0x2a7d   :  { %v2150_v45 = vpop.permute.xlu0 %2149 }
0x2a7e   :  { %v2152_v19 = vmul.f32 %v2150_v45, %v2141_v44 }
0x2a80   :  { %2154 = vrot.lane.b32.xlu2 %v2152_v19, %s2919_s12 }
0x2a85   :  { %v1840_v42 = vpop.permute.xlu0 %1839 }
0x2a86   :  { %v1842_v40 = vmul.f32 %v1840_v42, %v1820_v14 }
0x2a88   :  { %v1848_v33 = vsel %vm650_vm4, %v3407_v32, %v1842_v40 }
0x2a89   :  { %1863 = vrot.lane.b32.xlu2 %v1848_v33, %s2919_s12 }
0x2ada   :  { %v2155_v49 = vpop.permute.xlu2 %2154 }
0x2adb   :  { %v2157_v50 = vadd.f32 %v2155_v49, %v2147_v27 }
0x2add   :  { %2801 = vtanh.f32 %v2157_v50  ;;  %v2212_v8 = vrot.slane %v2157_v50, 6 }
0x2ae3   :  { %v2802_v51 = vpop.eup %2801  ;;  %v1864_v52 = vpop.permute.xlu2 %1863 }
0x2ae4   :  { %2160 = vrot.lane.b32.xlu1 %v2802_v51, %s2918_s11  ;;  %2549 = vmatmul.msk.f32.gmra.mxu2 %vm66_vm0, %v1864_v52 }
0x2b56   :  { %v2161_v53 = vpop.permute.xlu1 %2160 }
0x2b57   :  { %v2163_v54 = vmul.f32 %v2161_v53, %v2141_v44 }
0x2b59   :  { %v2165_v55 = vrot.slane %v2163_v54, 6 }
0x2b5b   :  { %2166 = vrot.lane.b32.xlu0 %v2165_v55, %s2919_s12 }
0x2b67   :  { %v1889_v56 = vpop.f32.mrf.mxu2 }
0x2b68   :  { %v3443_v57 = vadd.f32 %v3359_v35, %v1889_v56 }
0x2bcd   :  { %v2167_v32 = vpop.permute.xlu0 %2166 }
0x2bce   :  { %2557 = vmatmul.msk.f32.vlgmr.msrb.gmra.mxu0 %vm66_vm0, %v2167_v32 }
0x2c4b   :  { %v2187_v17 = vpop.f32.mrf.mxu0 }
0x2c4c   :  { %v2190_v58 = vadd.f32 %v2187_v17, %v3443_v57 }
0x2c4e   :  { %2803 = vtanh.f32 %v2190_v58  ;;  %v2558_v60 = vmul.f32 -1.442695, %v2190_v58 }
0x2c50   :  { %2805 = vpow2.f32 %v2558_v60 }
0x2c54   :  { %v2804_v59 = vpop.eup %2803 }
0x2c55   :  { %2216 = vrot.lane.b32.xlu1 %v2804_v59, %s2918_s11 }
0x2c56   :  { %v2806_v61 = vpop.eup %2805 }
0x2c57   :  { %v2194_v2 = vadd.f32 1.0, %v2806_v61 }
0x2c59   :  { %2807 = vrcp.f32 %v2194_v2  ;;  %v2206_v35 = vand.u32 2147483648, %v2194_v2  ;;  %vm2200_vm2 = vweird.f32 %v2194_v2  ;;  %v2204_v3 = vand.u32 2147483647, %v2194_v2 }
0x2c5b   :  { %v2207_v5 = vor.u32 1.1754944e-38, %v2206_v35  ;;  %vm2205_vm13 = vcmp.eq.f32.partialorder %v2204_v3, 8.507059e+37 }
0x2c5f   :  { %v2808_v39 = vpop.eup %2807 }
0x2c60   :  { %v2196_v62 = vmul.f32 %v2808_v39, %v2194_v2  ;;  %vm2201_vm4 = vweird.f32 %v2808_v39 }
0x2c61   :  { %vm2202_vm3 = vmor %vm2200_vm2, %vm2201_vm4  ;;  %vm2474_vm2 = vcmask 58368  }
0x2c62   :  { %v2197_v63 = vsub.f32 1.0, %v2196_v62 }
0x2c64   :  { %v2198_v43 = vmul.f32 %v2808_v39, %v2197_v63 }
0x2c66   :  { %v2199_v1 = vadd.f32 %v2808_v39, %v2198_v43 }
0x2c68   :  { %v2203_v4 = vsel %vm2202_vm3, %v2808_v39, %v2199_v1 }
0x2c69   :  { %v2208_v7 = vsel %vm2205_vm13, %v2207_v5, %v2203_v4 }
0x2c6a   :  { %v2214_v11 = vmul.f32 %v2212_v8, %v2208_v7 }
0x2cc7   :  { %v2217_v6 = vpop.permute.xlu1 %2216 }
0x2cc8   :  { %v2219_v0 = vmul.f32 %v2217_v6, %v2208_v7 }
0x2cca   :  { %2221 = vrot.lane.b32.xlu2 %v2219_v0, %s2919_s12 }
0x2d24   :  { %v2222_v12 = vpop.permute.xlu2 %2221 }
0x2d25   :  { %v2224_v46 = vadd.f32 %v2222_v12, %v2214_v11 }
0x2d27   :  { %2809 = vtanh.f32 %v2224_v46  ;;  %v2281_v41 = vrot.slane %v2224_v46, 6 }
0x2d2d   :  { %v2810_v14 = vpop.eup %2809 }
0x2d2e   :  { %2227 = vrot.lane.b32.xlu0 %v2810_v14, %s2918_s11 }
0x2da0   :  { %v2228_v15 = vpop.permute.xlu0 %2227 }
0x2da1   :  { %v2230_v31 = vmul.f32 %v2228_v15, %v2208_v7 }
0x2da3   :  { %2232 = vrot.lane.b32.xlu1 %v2230_v31, %s2919_s12 }
0x2e15   :  { %v2233_v16 = vpop.permute.xlu1 %2232 }
0x2e16   :  { %2559 = vmatmul.msk.f32.vlgmr.msrb.gmra.mxu1 %vm66_vm0, %v2233_v16 }
0x2e93   :  { %v2253_v21 = vpop.f32.mrf.mxu1 }
0x2e94   :  { %v2257_v23 = vrot.slane %v2253_v21, 6 }
0x2e96   :  { %v2259_v26 = vadd.f32 %v2257_v23, %v3443_v57 }
0x2e98   :  { %2811 = vtanh.f32 %v2259_v26  ;;  %v2560_v10 = vmul.f32 -1.442695, %v2259_v26 }
0x2e9a   :  { %2813 = vpow2.f32 %v2560_v10 }
0x2e9e   :  { %v2812_v29 = vpop.eup %2811 }
0x2e9f   :  { %2285 = vrot.lane.b32.xlu2 %v2812_v29, %s2918_s11 }
0x2ea0   :  { %v2814_v20 = vpop.eup %2813 }
0x2ea1   :  { %v2263_v18 = vadd.f32 1.0, %v2814_v20 }
0x2ea3   :  { %2815 = vrcp.f32 %v2263_v18  ;;  %v2275_v9 = vand.u32 2147483648, %v2263_v18  ;;  %vm2269_vm5 = vweird.f32 %v2263_v18  ;;  %v2273_v30 = vand.u32 2147483647, %v2263_v18 }
0x2ea5   :  { %v2276_v47 = vor.u32 1.1754944e-38, %v2275_v9  ;;  %vm2274_vm7 = vcmp.eq.f32.partialorder %v2273_v30, 8.507059e+37 }
0x2ea9   :  { %v2816_v22 = vpop.eup %2815 }
0x2eaa   :  { %v2265_v48 = vmul.f32 %v2816_v22, %v2263_v18  ;;  %vm2270_vm14 = vweird.f32 %v2816_v22 }
0x2eab   :  { %vm2271_vm6 = vmor %vm2269_vm5, %vm2270_vm14 }
0x2eac   :  { %v2266_v24 = vsub.f32 1.0, %v2265_v48 }
0x2eae   :  { %v2267_v28 = vmul.f32 %v2816_v22, %v2266_v24 }
0x2eb0   :  { %v2268_v25 = vadd.f32 %v2816_v22, %v2267_v28 }
0x2eb2   :  { %v2272_v36 = vsel %vm2271_vm6, %v2816_v22, %v2268_v25 }
0x2eb3   :  { %v2277_v37 = vsel %vm2274_vm7, %v2276_v47, %v2272_v36 }
0x2eb4   :  { %v2283_v45 = vmul.f32 %v2281_v41, %v2277_v37  ;;  %v2440_v41 = vld [vmem:[%s3491_s4] sm:$0xff] }
0x2ef9   :  { %v2286_v34 = vpop.permute.xlu2 %2285 }
0x2efa   :  { %v2288_v13 = vmul.f32 %v2286_v34, %v2277_v37  ;;  %v2443_v34 = vld [vmem:[%s3491_s4 + $0x18] sm:$0xff] }
0x2efb   :  { %2466 = vmatpush.msra.mxu0 %v2443_v34 }
0x2efc   :  { %2290 = vrot.lane.b32.xlu0 %v2288_v13, %s2919_s12  ;;  %v2441_v13 = vld [vmem:[%s3491_s4 + $0x8] sm:$0xff] }
0x2f6e   :  { %v2291_v44 = vpop.permute.xlu0 %2290 }
0x2f6f   :  { %v2293_v19 = vadd.f32 %v2291_v44, %v2283_v45 }
0x2f71   :  { %2817 = vtanh.f32 %v2293_v19  ;;  %v2351_v1 = vrot.slane %v2293_v19, 6 }
0x2f77   :  { %v2818_v42 = vpop.eup %2817 }
0x2f78   :  { %2296 = vrot.lane.b32.xlu1 %v2818_v42, %s2918_s11 }
0x2fea   :  { %v2297_v40 = vpop.permute.xlu1 %2296 }
0x2feb   :  { %v2299_v33 = vmul.f32 %v2297_v40, %v2277_v37  ;;  %v2442_v37 = vld [vmem:[%s3491_s4 + $0x10] sm:$0xff]  ;;  %v2578_v40 = vld [vmem:[%s3492_s5] ss:$0 sm:$0xff]  ;;  %s2483_s4 = sshll.u32 %s3493_s6, 4  ;;  %s2484_s4 = int_to_ptr.hbm [resolvable:$true] %s2483_s4 }
0x2fec   :  { %2467 = vmatpush.msra.mxu0 %v2442_v37 }
0x2fed   :  { %v2301_v38 = vrot.slane %v2299_v33, 2 }
0x2fee   :  { %2468 = vmatpush.msra.mxu0 %v2441_v13 }
0x2fef   :  { %2302 = vrot.lane.b32.xlu2 %v2301_v38, %s2919_s12 }
0x2ff0   :  { %2469 = vmatpush.msra.mxu0 %v2440_v41 }
0x3049   :  { %v2303_v27 = vpop.permute.xlu2 %2302 }
0x304a   :  { %2561 = vmatmul.msk.f32.vlgmr.msrb.gmra.mxu2 %vm66_vm0, %v2303_v27 }
0x30cd   :  { %v2323_v49 = vpop.f32.mrf.mxu2 }
0x30ce   :  { %v2327_v50 = vrot.slane %v2323_v49, 4 }
0x30d0   :  { %v2329_v51 = vadd.f32 %v2327_v50, %v3443_v57 }
0x30d2   :  { %2819 = vtanh.f32 %v2329_v51  ;;  %v2562_v53 = vmul.f32 -1.442695, %v2329_v51 }
0x30d4   :  { %2821 = vpow2.f32 %v2562_v53 }
0x30d8   :  { %v2820_v52 = vpop.eup %2819 }
0x30d9   :  { %2355 = vrot.lane.b32.xlu0 %v2820_v52, %s2918_s11 }
0x30da   :  { %v2822_v54 = vpop.eup %2821 }
0x30db   :  { %v2333_v55 = vadd.f32 1.0, %v2822_v54 }
0x30dd   :  { %2823 = vrcp.f32 %v2333_v55  ;;  %v2345_v60 = vand.u32 2147483648, %v2333_v55  ;;  %vm2339_vm9 = vweird.f32 %v2333_v55  ;;  %v2343_v61 = vand.u32 2147483647, %v2333_v55 }
0x30df   :  { %v2346_v39 = vor.u32 1.1754944e-38, %v2345_v60  ;;  %vm2344_vm11 = vcmp.eq.f32.partialorder %v2343_v61, 8.507059e+37 }
0x30e3   :  { %v2824_v32 = vpop.eup %2823 }
0x30e4   :  { %v2335_v56 = vmul.f32 %v2824_v32, %v2333_v55  ;;  %vm2340_vm8 = vweird.f32 %v2824_v32 }
0x30e5   :  { %vm2341_vm10 = vmor %vm2339_vm9, %vm2340_vm8 }
0x30e6   :  { %v2336_v17 = vsub.f32 1.0, %v2335_v56 }
0x30e8   :  { %v2337_v58 = vmul.f32 %v2824_v32, %v2336_v17 }
0x30ea   :  { %v2338_v59 = vadd.f32 %v2824_v32, %v2337_v58 }
0x30ec   :  { %v2342_v2 = vsel %vm2341_vm10, %v2824_v32, %v2338_v59 }
0x30ed   :  { %v2347_v63 = vsel %vm2344_vm11, %v2346_v39, %v2342_v2 }
0x30ee   :  { %v2353_v35 = vmul.f32 %v2351_v1, %v2347_v63 }
0x314b   :  { %v2356_v62 = vpop.permute.xlu0 %2355 }
0x314c   :  { %v2358_v43 = vmul.f32 %v2356_v62, %v2347_v63 }
0x314e   :  { %2360 = vrot.lane.b32.xlu1 %v2358_v43, %s2919_s12 }
0x31c0   :  { %v2361_v3 = vpop.permute.xlu1 %2360 }
0x31c1   :  { %v2363_v4 = vadd.f32 %v2361_v3, %v2353_v35 }
0x31c3   :  { %2825 = vtanh.f32 %v2363_v4  ;;  %v2421_v25 = vrot.slane %v2363_v4, 6 }
0x31c9   :  { %v2826_v5 = vpop.eup %2825 }
0x31ca   :  { %2366 = vrot.lane.b32.xlu2 %v2826_v5, %s2918_s11 }
0x3224   :  { %v2367_v6 = vpop.permute.xlu2 %2366 }
0x3225   :  { %v2369_v7 = vmul.f32 %v2367_v6, %v2347_v63 }
0x3227   :  { %v2371_v0 = vrot.slane %v2369_v7, 4 }
0x3229   :  { %2372 = vrot.lane.b32.xlu0 %v2371_v0, %s2919_s12 }
0x329b   :  { %v2373_v8 = vpop.permute.xlu0 %2372 }
0x329c   :  { %2563 = vmatmul.msk.f32.vlgmr.msrb.gmra.mxu3 %vm66_vm0, %v2373_v8 }
0x331f   :  { %v2393_v11 = vpop.f32.mrf.mxu3 }
0x3320   :  { %v2397_v12 = vrot.slane %v2393_v11, 2 }
0x3322   :  { %v2399_v46 = vadd.f32 %v2397_v12, %v3443_v57 }
0x3324   :  { %2827 = vtanh.f32 %v2399_v46  ;;  %v2564_v15 = vmul.f32 -1.442695, %v2399_v46 }
0x3326   :  { %2829 = vpow2.f32 %v2564_v15 }
0x332a   :  { %v2828_v14 = vpop.eup %2827 }
0x332b   :  { %2425 = vrot.lane.b32.xlu1 %v2828_v14, %s2918_s11 }
0x332c   :  { %v2830_v31 = vpop.eup %2829 }
0x332d   :  { %v2403_v16 = vadd.f32 1.0, %v2830_v31 }
0x332f   :  { %2831 = vrcp.f32 %v2403_v16  ;;  %v2415_v20 = vand.u32 2147483648, %v2403_v16  ;;  %vm2409_vm15 = vweird.f32 %v2403_v16  ;;  %v2413_v18 = vand.u32 2147483647, %v2403_v16 }
0x3331   :  { %v2416_v22 = vor.u32 1.1754944e-38, %v2415_v20  ;;  %vm2414_vm4 = vcmp.eq.f32.partialorder %v2413_v18, 8.507059e+37 }
0x3335   :  { %v2832_v21 = vpop.eup %2831 }
0x3336   :  { %v2405_v23 = vmul.f32 %v2832_v21, %v2403_v16  ;;  %vm2410_vm12 = vweird.f32 %v2832_v21 }
0x3337   :  { %vm2411_vm1 = vmor %vm2409_vm15, %vm2410_vm12 }
0x3338   :  { %v2406_v26 = vsub.f32 1.0, %v2405_v23 }
0x333a   :  { %v2407_v29 = vmul.f32 %v2832_v21, %v2406_v26 }
0x333c   :  { %v2408_v10 = vadd.f32 %v2832_v21, %v2407_v29 }
0x333e   :  { %v2412_v57 = vsel %vm2411_vm1, %v2832_v21, %v2408_v10 }
0x333f   :  { %v2417_v24 = vsel %vm2414_vm4, %v2416_v22, %v2412_v57 }
0x3340   :  { %v2423_v9 = vmul.f32 %v2421_v25, %v2417_v24 }
0x339d   :  { %v2426_v48 = vpop.permute.xlu1 %2425 }
0x339e   :  { %v2428_v28 = vmul.f32 %v2426_v48, %v2417_v24 }
0x33a0   :  { %2430 = vrot.lane.b32.xlu2 %v2428_v28, %s2919_s12 }
0x33fa   :  { %v2431_v30 = vpop.permute.xlu2 %2430 }
0x33fb   :  { %v2433_v36 = vadd.f32 %v2431_v30, %v2423_v9 }
0x33fd   :  { %2833 = vtanh.f32 %v2433_v36 }
0x3403   :  { %v2834_v47 = vpop.eup %2833 }
0x3404   :  { %2436 = vrot.lane.b32.xlu0 %v2834_v47, %s2918_s11 }
0x3476   :  { %v2437_v45 = vpop.permute.xlu0 %2436 }
0x3477   :  { %v2439_v44 = vmul.f32 %v2437_v45, %v2417_v24 }
0x3479   :  { %v2449_v19 = vrot.slane %v2439_v44, 6 }
0x347b   :  { %2450 = vrot.lane.b32.xlu1 %v2449_v19, %s2919_s12 }
0x34ed   :  { %v2451_v42 = vpop.permute.xlu1 %2450 }
0x34ee   :  { %2565 = vmatmul.msk.f32.vlgmr.msra.gmra.mxu0 %vm66_vm0, %v2451_v42 }
0x356b   :  { %v2471_v33 = vpop.f32.mrf.mxu0 }
0x356c   :  { %v2472_v38 = vadd.f32 %v2578_v40, %v2471_v33 }
0x356e   :  { %2475 = vst.msk [vmem:[#allocation7] sm:$0x3] %vm2474_vm2, %v2472_v38 }
0x356f   :  { %2486 = dma.vmem_to_hbm [thread:$0]  %s2482_s30, 32, %s2484_s4, [#allocation4]  }
0x3570   :  { %2911 = dma.done.wait [#allocation4], 32  }
0x3571   :  { %2912 = vsyncadd [#allocation4], 4294967264 }
0x3572   :  { %2491 = vsyncpa [#allocation3], 1 }
0x3573   :  { %2492 = vsyncpa [#allocation6], 1 }
0x3574   :  { %2493 = vsyncpa [#allocation4], 1 }

</bundles_post_ra>
